<compile_context>
chip_gen: v6e
topology: v6e:2x2x1
jax: 0.10.0
libtpu: 0.0.40
codegen_flags: <defaults>
</compile_context>

<pallas_src>
import numpy as np
import jax
import jax.numpy as jnp
from jax.experimental import pallas as pl
from jax.experimental.pallas import tpu as pltpu


# ----------------------------------------------------------------------------- helpers
def _round_up(v, m):
    return ((v + m - 1) // m) * m


def _cdiv(a, b):
    return (a + b - 1) // b


def _gaussian_1d(size=7, sigma=1.0):
    # The reference 2D Gaussian (isotropic, normalized) factorizes exactly as
    # outer(g1, g1) with g1 the normalized 1-D Gaussian.
    c = (size - 1) / 2.0
    g = np.exp(-((np.arange(size, dtype=np.float64) - c) ** 2) / (2.0 * sigma ** 2))
    g /= g.sum()
    return g.astype(np.float32)


def _iteration_radii(boundary_width, boundary_iteration):
    radii = []
    diff = boundary_width // boundary_iteration if boundary_iteration != 0 else 0
    for it in range(boundary_iteration):
        if boundary_width == 0 or it == boundary_iteration - 1:
            radii.append(0)
        else:
            radii.append(boundary_width - diff * it - 1)
    return radii


def _vmem_capacity():
    try:
        return int(pltpu.get_tpu_info().vmem_capacity_bytes)
    except Exception:
        return 64 << 20       # conservative (v7x per-core VMEM)


def _clamp_vmem(est, cap):
    return int(min(max(est, 32 << 20), int(cap * 0.9)))


def _shift(v, dy, dx):
    """result[r, c] = v[r + dy, c + dx] (wrap-around; the wrapped ring is
    absorbed by the tile halo / border fixups).  Assumes pltpu.roll follows
    jnp.roll semantics: roll(v, s)[i] = v[(i - s) % n]."""
    if dy:
        v = pltpu.roll(v, (-dy) % v.shape[0], axis=0)
    if dx:
        v = pltpu.roll(v, (-dx) % v.shape[1], axis=1)
    return v


# ----------------------------------------------------------------------------- stage A: boundary suppression
def _make_suppress_kernel(H, W, TH, Wp, Wo, radii):
    R = TH + 16                                    # 8-row halo top & bottom
    needed = sorted({r for r in radii if r > 0})
    max_r = needed[-1] if needed else 0

    def cross_max(v):                              # flat cross (plus-shaped) dilation
        return jnp.maximum(
            jnp.maximum(v, jnp.maximum(_shift(v, -1, 0), _shift(v, 1, 0))),
            jnp.maximum(_shift(v, 0, -1), _shift(v, 0, 1)))

    def kernel(x_hbm, p_hbm, o_ref, xbuf, pbuf, sems):
        n = pl.program_id(0)
        i = pl.program_id(1)
        row0 = pl.multiple_of(i * TH, 8)

        cx = pltpu.make_async_copy(x_hbm.at[n, pl.ds(row0, R)], xbuf, sems.at[0])
        cp = pltpu.make_async_copy(p_hbm.at[n, pl.ds(row0, R)], pbuf, sems.at[1])
        cx.start()
        cp.start()
        cx.wait()
        cp.wait()

        xv = xbuf[...]
        pv = pbuf[...]

        # Fixup masks: positions of the true image border inside this tile
        # (hoisted out of the iteration loop).
        rows = jax.lax.broadcasted_iota(jnp.int32, (R, Wp), 0)
        cols = jax.lax.broadcasted_iota(jnp.int32, (R, Wp), 1)
        is_r0 = rows == (8 - row0)                 # global row 0
        is_r1 = rows == (H - 1 + 8 - row0)         # global row H-1
        is_c0 = cols == 8                          # global col 0
        is_c1 = cols == (8 + W - 1)                # global col W-1

        def box3(v):
            # separable 3x3 all-ones sum; ReplicationPad2d(1) semantics at the
            # true image border via the fixup selects, roll wrap elsewhere.
            left = jnp.where(is_c0, v, _shift(v, 0, -1))
            right = jnp.where(is_c1, v, _shift(v, 0, 1))
            rsum = v + left + right
            up = jnp.where(is_r0, rsum, _shift(rsum, -1, 0))
            down = jnp.where(is_r1, rsum, _shift(rsum, 1, 0))
            return rsum + up + down

        # find_boundaries: cross dilation vs 3x3 erosion of the prediction.
        # Replicate pre-padding is equivalent to kornia's geodesic border here.
        dil = cross_max(pv)
        rmin = jnp.minimum(jnp.minimum(pv, _shift(pv, 0, -1)), _shift(pv, 0, 1))
        ero = jnp.minimum(jnp.minimum(rmin, _shift(rmin, -1, 0)), _shift(rmin, 1, 0))
        bnd = (dil != ero).astype(jnp.float32)

        # expand_boundaries: diamond (L1-ball) dilation of every needed radius,
        # produced incrementally in one sweep of cross dilations.
        snaps = {}
        cur = bnd
        for k in range(1, max_r + 1):
            cur = cross_max(cur)
            if k in needed:
                snaps[k] = cur

        out = xv
        for r in radii:
            prev = out
            exp = bnd if r == 0 else snaps[r]
            nb = exp == 0.0                        # non-boundary mask (bool)
            xm = jnp.where(nb, out, 0.0)
            y = box3(xm)
            num = box3(nb.astype(jnp.float32))     # exact small-integer counts
            num_zero = num == 0.0
            denom = jnp.where(num_zero, 1.0, num)
            rcp = pl.reciprocal(denom, approx=True)
            rcp = rcp * (2.0 - denom * rcp)        # Newton step -> ~exact f32 divide
            avg = y * rcp
            out = jnp.where(jnp.logical_or(nb, num_zero), prev, avg)

        o_ref[...] = out[8:8 + TH, 8:8 + Wo]

    return kernel


def _suppress_stage(x, pred, radii, TH, Wo, vmem_cap):
    N, H, W = x.shape
    nt = _cdiv(H, TH)
    Ht = nt * TH
    Wp = Wo + 128                                  # 8-col halo + lane-multiple width
    pad_r = (8, Ht - H + 8)
    pad_c = (8, Wp - 8 - W)
    xp = jnp.pad(x, ((0, 0), pad_r, pad_c), mode="edge")
    pp = jnp.pad(pred, ((0, 0), pad_r, pad_c), mode="edge")

    buf_bytes = (TH + 16) * Wp * 4
    vlim = _clamp_vmem(16 * buf_bytes + 4 * TH * Wo * 4 + (8 << 20), vmem_cap)
    cost = pl.CostEstimate(
        flops=int(N * nt * (TH + 16) * Wp * (30 + 40 * max(len(radii), 1))),
        transcendentals=int(N * nt * (TH + 16) * Wp * len(radii)),
        bytes_accessed=int((2 * xp.size + N * Ht * Wo) * 4))

    out = pl.pallas_call(
        _make_suppress_kernel(H, W, TH, Wp, Wo, radii),
        out_shape=jax.ShapeDtypeStruct((N, Ht, Wo), jnp.float32),
        grid=(N, nt),
        in_specs=[pl.BlockSpec(memory_space=pl.ANY),
                  pl.BlockSpec(memory_space=pl.ANY)],
        out_specs=pl.BlockSpec((None, TH, Wo), lambda n, i: (n, i, 0)),
        scratch_shapes=[pltpu.VMEM((TH + 16, Wp), jnp.float32),
                        pltpu.VMEM((TH + 16, Wp), jnp.float32),
                        pltpu.SemaphoreType.DMA((2,))],
        compiler_params=pltpu.CompilerParams(
            dimension_semantics=("parallel", "parallel"),
            vmem_limit_bytes=vlim),
        cost_estimate=cost,
    )(xp, pp)
    return out[:, :H, :W]


# ----------------------------------------------------------------------------- stage B: dilated Gaussian smoothing
def _make_gauss_kernel(TH, Wp, Wo, PAD, D, g, RB):
    def kernel(in_hbm, o_ref, buf, hbuf, sems):
        n = pl.program_id(0)
        i = pl.program_id(1)
        row0 = pl.multiple_of(i * TH, 8)
        cp = pltpu.make_async_copy(in_hbm.at[n, pl.ds(row0, RB)], buf, sems.at[0])
        cp.start()
        cp.wait()

        v = buf[...]
        # horizontal pass: taps paired by Gaussian symmetry (4 muls, 6 rolls)
        hh = (g[3] * v
              + g[2] * (_shift(v, 0, -D) + _shift(v, 0, D))
              + g[1] * (_shift(v, 0, -2 * D) + _shift(v, 0, 2 * D))
              + g[0] * (_shift(v, 0, -3 * D) + _shift(v, 0, 3 * D)))
        # single lane rotate to a lane-aligned intermediate, then aligned loads
        hbuf[...] = hh[:, PAD:PAD + Wo]
        out = (g[3] * hbuf[3 * D:3 * D + TH, :]
               + g[2] * (hbuf[2 * D:2 * D + TH, :] + hbuf[4 * D:4 * D + TH, :])
               + g[1] * (hbuf[D:D + TH, :] + hbuf[5 * D:5 * D + TH, :])
               + g[0] * (hbuf[0:TH, :] + hbuf[6 * D:6 * D + TH, :]))
        o_ref[...] = out

    return kernel


def _gauss_stage(x, g, D, TH, Wo, vmem_cap):
    N, H, W = x.shape
    PAD = 3 * D
    assert min(H, W) > PAD, "ReplicationPad2d requires pad < spatial dim"
    nt = _cdiv(H, TH)
    Ht = nt * TH
    RB = TH + _round_up(2 * PAD, 8)
    Wp = Wo + _round_up(2 * PAD, 128)
    Hp = Ht + (RB - TH)
    xp = jnp.pad(x, ((0, 0), (PAD, Hp - PAD - H), (PAD, Wp - PAD - W)), mode="edge")

    buf_bytes = RB * Wp * 4
    vlim = _clamp_vmem(8 * buf_bytes + RB * Wo * 4 + 4 * TH * Wo * 4 + (8 << 20), vmem_cap)
    cost = pl.CostEstimate(flops=int(N * nt * RB * Wp * 22),
                           transcendentals=0,
                           bytes_accessed=int((xp.size + N * Ht * Wo) * 4))

    out = pl.pallas_call(
        _make_gauss_kernel(TH, Wp, Wo, PAD, D, g, RB),
        out_shape=jax.ShapeDtypeStruct((N, Ht, Wo), jnp.float32),
        grid=(N, nt),
        in_specs=[pl.BlockSpec(memory_space=pl.ANY)],
        out_specs=pl.BlockSpec((None, TH, Wo), lambda n, i: (n, i, 0)),
        scratch_shapes=[pltpu.VMEM((RB, Wp), jnp.float32),
                        pltpu.VMEM((RB, Wo), jnp.float32),
                        pltpu.SemaphoreType.DMA((1,))],
        compiler_params=pltpu.CompilerParams(
            dimension_semantics=("parallel", "parallel"),
            vmem_limit_bytes=vlim),
        cost_estimate=cost,
    )(xp)
    return out[:, :H, :W]


# ----------------------------------------------------------------------------- public wrapper
def boundary_suppression_with_smoothing(x, prediction=None, *,
                                        boundary_suppression=True,
                                        boundary_width=4,
                                        boundary_iteration=4,
                                        dilated_smoothing=True,
                                        kernel_size=7,
                                        dilation=6,
                                        tile_rows=None):
    """JAX/Pallas equivalent of BoundarySuppressionWithSmoothing.forward."""
    x = jnp.asarray(x, dtype=jnp.float32)
    if x.ndim == 4:
        assert x.shape[1] == 1
        x = x[:, 0]
    assert x.ndim == 3
    N, H, W = x.shape

    if not boundary_suppression and not dilated_smoothing:
        return x

    assert kernel_size == 7, "reference hard-codes a 7x7 sigma=1 Gaussian"
    g1d = [float(v) for v in _gaussian_1d(kernel_size, 1.0)]

    radii = []
    if boundary_suppression:
        assert prediction is not None
        if boundary_iteration != 0:
            assert boundary_width % boundary_iteration == 0
        radii = _iteration_radii(boundary_width, boundary_iteration)

    cap = _vmem_capacity()
    Wo = _round_up(W, 128)
    if tile_rows is None:
        # keep (halo'd scratch slabs + ~16 live plane-sized temporaries)
        # comfortably under VMEM capacity (64 MiB on v7x, 128 MiB on v5e/v6e).
        tile_rows = max(32, min(256, (cap // 2) // (18 * 4 * (Wo + 128)) - 16))
    TH = min(_round_up(max(int(tile_rows), 8), 8), _round_up(H, 8))

    out = x
    if boundary_suppression and radii:
        pred = jnp.asarray(prediction, dtype=jnp.float32)
        if pred.ndim == 4:
            pred = pred[:, 0]
        assert pred.shape == (N, H, W)
        out = _suppress_stage(out, pred, radii, TH, Wo, cap)
    if dilated_smoothing:
        out = _gauss_stage(out, g1d, dilation, TH, Wo, cap)
    return out


if __name__ == "__main__":
    key = jax.random.PRNGKey(0)
    k1, k2 = jax.random.split(key)
    # min(H, W) must exceed dilation*3 = 18 (ReplicationPad2d constraint).
    # tile_rows=16 exercises the multi-row-tile path at small shapes.
    N, H, W = 2, 40, 96
    x = jax.random.normal(k1, (N, H, W), dtype=jnp.float32)
    prediction = jax.random.randint(k2, (N, H, W), 0, 5).astype(jnp.float32)

    out = boundary_suppression_with_smoothing(x, prediction, tile_rows=16)
    out = jax.block_until_ready(out)

    assert out.shape == (N, H, W)
    assert out.dtype == jnp.float32
    assert bool(jnp.isfinite(out).all())
    print("KERNEL_OK")
</pallas_src>

<mosaic_0001>
module attributes {stable_mosaic.version = 11 : i64} {
  func.func @kernel(%arg0: i32, %arg1: i32, %arg2: memref<2x64x256xf32, #tpu.memory_space<any>>, %arg3: memref<2x64x256xf32, #tpu.memory_space<any>>, %arg4: memref<1x16x128xf32, #tpu.memory_space<vmem>>, %arg5: memref<32x256xf32, #tpu.memory_space<vmem>>, %arg6: memref<32x256xf32, #tpu.memory_space<vmem>>, %arg7: memref<2x!tpu.dma_semaphore, #tpu.memory_space<semaphore_mem>>) attributes {dimension_semantics = [#tpu.dimension_semantics<parallel>, #tpu.dimension_semantics<parallel>], iteration_bounds = array<i64: 2, 3>, scalar_prefetch = 0 : i64, scratch_operands = 3 : i64, tpu.core_type = #tpu.core_type<tc>, window_params = [{}, {}, {transform_indices = @transform_2, window_bounds = array<i64: 1, 16, 128>}]} {
    %c16_i32 = arith.constant 16 : i32
    %0 = arith.muli %arg1, %c16_i32 : i32
    %1 = tpu.assume_multiple %0, 8 : i32
    %c0_i32 = arith.constant 0 : i32
    %c0_i32_0 = arith.constant 0 : i32
    %2 = tpu.memref_slice %arg2[%arg0, %1, %c0_i32_0] : memref<2x64x256xf32, #tpu.memory_space<any>> -> memref<1x32x256xf32, #tpu.memory_space<any>>
    %3 = tpu.memref_squeeze %2 : memref<1x32x256xf32, #tpu.memory_space<any>> -> memref<32x256xf32, #tpu.memory_space<any>>
    %4 = tpu.memref_slice %arg7[%c0_i32] : memref<2x!tpu.dma_semaphore, #tpu.memory_space<semaphore_mem>> -> memref<1x!tpu.dma_semaphore, #tpu.memory_space<semaphore_mem>>
    %5 = tpu.memref_squeeze %4 : memref<1x!tpu.dma_semaphore, #tpu.memory_space<semaphore_mem>> -> memref<!tpu.dma_semaphore, #tpu.memory_space<semaphore_mem>>
    tpu.enqueue_dma source(%3 : memref<32x256xf32, #tpu.memory_space<any>>) target(%arg5 : memref<32x256xf32, #tpu.memory_space<vmem>>) target_semaphore(%5 : memref<!tpu.dma_semaphore, #tpu.memory_space<semaphore_mem>>)
    %c1_i32 = arith.constant 1 : i32
    %c0_i32_1 = arith.constant 0 : i32
    %6 = tpu.memref_slice %arg3[%arg0, %1, %c0_i32_1] : memref<2x64x256xf32, #tpu.memory_space<any>> -> memref<1x32x256xf32, #tpu.memory_space<any>>
    %7 = tpu.memref_squeeze %6 : memref<1x32x256xf32, #tpu.memory_space<any>> -> memref<32x256xf32, #tpu.memory_space<any>>
    %8 = tpu.memref_slice %arg7[%c1_i32] : memref<2x!tpu.dma_semaphore, #tpu.memory_space<semaphore_mem>> -> memref<1x!tpu.dma_semaphore, #tpu.memory_space<semaphore_mem>>
    %9 = tpu.memref_squeeze %8 : memref<1x!tpu.dma_semaphore, #tpu.memory_space<semaphore_mem>> -> memref<!tpu.dma_semaphore, #tpu.memory_space<semaphore_mem>>
    tpu.enqueue_dma source(%7 : memref<32x256xf32, #tpu.memory_space<any>>) target(%arg6 : memref<32x256xf32, #tpu.memory_space<vmem>>) target_semaphore(%9 : memref<!tpu.dma_semaphore, #tpu.memory_space<semaphore_mem>>)
    %c0_i32_2 = arith.constant 0 : i32
    %c0_i32_3 = arith.constant 0 : i32
    %10 = tpu.memref_slice %arg2[%arg0, %1, %c0_i32_3] : memref<2x64x256xf32, #tpu.memory_space<any>> -> memref<1x32x256xf32, #tpu.memory_space<any>>
    %11 = tpu.memref_squeeze %10 : memref<1x32x256xf32, #tpu.memory_space<any>> -> memref<32x256xf32, #tpu.memory_space<any>>
    %12 = tpu.memref_slice %arg7[%c0_i32_2] : memref<2x!tpu.dma_semaphore, #tpu.memory_space<semaphore_mem>> -> memref<1x!tpu.dma_semaphore, #tpu.memory_space<semaphore_mem>>
    %13 = tpu.memref_squeeze %12 : memref<1x!tpu.dma_semaphore, #tpu.memory_space<semaphore_mem>> -> memref<!tpu.dma_semaphore, #tpu.memory_space<semaphore_mem>>
    tpu.wait_dma2 semaphore(%13 : memref<!tpu.dma_semaphore, #tpu.memory_space<semaphore_mem>>) src(%11 : memref<32x256xf32, #tpu.memory_space<any>>) dst(%arg5 : memref<32x256xf32, #tpu.memory_space<vmem>>)
    %c1_i32_4 = arith.constant 1 : i32
    %c0_i32_5 = arith.constant 0 : i32
    %14 = tpu.memref_slice %arg3[%arg0, %1, %c0_i32_5] : memref<2x64x256xf32, #tpu.memory_space<any>> -> memref<1x32x256xf32, #tpu.memory_space<any>>
    %15 = tpu.memref_squeeze %14 : memref<1x32x256xf32, #tpu.memory_space<any>> -> memref<32x256xf32, #tpu.memory_space<any>>
    %16 = tpu.memref_slice %arg7[%c1_i32_4] : memref<2x!tpu.dma_semaphore, #tpu.memory_space<semaphore_mem>> -> memref<1x!tpu.dma_semaphore, #tpu.memory_space<semaphore_mem>>
    %17 = tpu.memref_squeeze %16 : memref<1x!tpu.dma_semaphore, #tpu.memory_space<semaphore_mem>> -> memref<!tpu.dma_semaphore, #tpu.memory_space<semaphore_mem>>
    tpu.wait_dma2 semaphore(%17 : memref<!tpu.dma_semaphore, #tpu.memory_space<semaphore_mem>>) src(%15 : memref<32x256xf32, #tpu.memory_space<any>>) dst(%arg6 : memref<32x256xf32, #tpu.memory_space<vmem>>)
    %c0 = arith.constant 0 : index
    %c0_6 = arith.constant 0 : index
    %18 = vector.load %arg5[%c0, %c0_6] : memref<32x256xf32, #tpu.memory_space<vmem>>, vector<32x256xf32>
    %c0_7 = arith.constant 0 : index
    %c0_8 = arith.constant 0 : index
    %19 = vector.load %arg6[%c0_7, %c0_8] : memref<32x256xf32, #tpu.memory_space<vmem>>, vector<32x256xf32>
    %20 = tpu.iota {dimensions = array<i32: 0>} : vector<32x256xi32>
    %21 = tpu.iota {dimensions = array<i32: 1>} : vector<32x256xi32>
    %c8_i32 = arith.constant 8 : i32
    %22 = arith.subi %c8_i32, %1 : i32
    %23 = vector.broadcast %22 : i32 to vector<32x256xi32>
    %24 = arith.cmpi eq, %20, %23 : vector<32x256xi32>
    %c47_i32 = arith.constant 47 : i32
    %25 = arith.subi %c47_i32, %1 : i32
    %26 = vector.broadcast %25 : i32 to vector<32x256xi32>
    %27 = arith.cmpi eq, %20, %26 : vector<32x256xi32>
    %c8_i32_9 = arith.constant 8 : i32
    %28 = vector.broadcast %c8_i32_9 : i32 to vector<32x256xi32>
    %29 = arith.cmpi eq, %21, %28 : vector<32x256xi32>
    %c103_i32 = arith.constant 103 : i32
    %30 = vector.broadcast %c103_i32 : i32 to vector<32x256xi32>
    %31 = arith.cmpi eq, %21, %30 : vector<32x256xi32>
    %c1_i32_10 = arith.constant 1 : i32
    %32 = tpu.dynamic_rotate %19 by %c1_i32_10 dim 0 : vector<32x256xf32>, i32 -> vector<32x256xf32>
    %c31_i32 = arith.constant 31 : i32
    %33 = tpu.dynamic_rotate %19 by %c31_i32 dim 0 : vector<32x256xf32>, i32 -> vector<32x256xf32>
    %34 = arith.maximumf %32, %33 : vector<32x256xf32>
    %35 = arith.maximumf %19, %34 : vector<32x256xf32>
    %c1_i32_11 = arith.constant 1 : i32
    %36 = tpu.dynamic_rotate %19 by %c1_i32_11 dim 1 : vector<32x256xf32>, i32 -> vector<32x256xf32>
    %c255_i32 = arith.constant 255 : i32
    %37 = tpu.dynamic_rotate %19 by %c255_i32 dim 1 : vector<32x256xf32>, i32 -> vector<32x256xf32>
    %38 = arith.maximumf %36, %37 : vector<32x256xf32>
    %39 = arith.maximumf %35, %38 : vector<32x256xf32>
    %c1_i32_12 = arith.constant 1 : i32
    %40 = tpu.dynamic_rotate %19 by %c1_i32_12 dim 1 : vector<32x256xf32>, i32 -> vector<32x256xf32>
    %41 = arith.minimumf %19, %40 : vector<32x256xf32>
    %c255_i32_13 = arith.constant 255 : i32
    %42 = tpu.dynamic_rotate %19 by %c255_i32_13 dim 1 : vector<32x256xf32>, i32 -> vector<32x256xf32>
    %43 = arith.minimumf %41, %42 : vector<32x256xf32>
    %c1_i32_14 = arith.constant 1 : i32
    %44 = tpu.dynamic_rotate %43 by %c1_i32_14 dim 0 : vector<32x256xf32>, i32 -> vector<32x256xf32>
    %45 = arith.minimumf %43, %44 : vector<32x256xf32>
    %c31_i32_15 = arith.constant 31 : i32
    %46 = tpu.dynamic_rotate %43 by %c31_i32_15 dim 0 : vector<32x256xf32>, i32 -> vector<32x256xf32>
    %47 = arith.minimumf %45, %46 : vector<32x256xf32>
    %48 = arith.cmpf one, %39, %47 : vector<32x256xf32>
    %49 = arith.extui %48 : vector<32x256xi1> to vector<32x256xi32>
    %50 = arith.sitofp %49 : vector<32x256xi32> to vector<32x256xf32>
    %c1_i32_16 = arith.constant 1 : i32
    %51 = tpu.dynamic_rotate %50 by %c1_i32_16 dim 0 : vector<32x256xf32>, i32 -> vector<32x256xf32>
    %c31_i32_17 = arith.constant 31 : i32
    %52 = tpu.dynamic_rotate %50 by %c31_i32_17 dim 0 : vector<32x256xf32>, i32 -> vector<32x256xf32>
    %53 = arith.maximumf %51, %52 : vector<32x256xf32>
    %54 = arith.maximumf %50, %53 : vector<32x256xf32>
    %c1_i32_18 = arith.constant 1 : i32
    %55 = tpu.dynamic_rotate %50 by %c1_i32_18 dim 1 : vector<32x256xf32>, i32 -> vector<32x256xf32>
    %c255_i32_19 = arith.constant 255 : i32
    %56 = tpu.dynamic_rotate %50 by %c255_i32_19 dim 1 : vector<32x256xf32>, i32 -> vector<32x256xf32>
    %57 = arith.maximumf %55, %56 : vector<32x256xf32>
    %58 = arith.maximumf %54, %57 : vector<32x256xf32>
    %c1_i32_20 = arith.constant 1 : i32
    %59 = tpu.dynamic_rotate %58 by %c1_i32_20 dim 0 : vector<32x256xf32>, i32 -> vector<32x256xf32>
    %c31_i32_21 = arith.constant 31 : i32
    %60 = tpu.dynamic_rotate %58 by %c31_i32_21 dim 0 : vector<32x256xf32>, i32 -> vector<32x256xf32>
    %61 = arith.maximumf %59, %60 : vector<32x256xf32>
    %62 = arith.maximumf %58, %61 : vector<32x256xf32>
    %c1_i32_22 = arith.constant 1 : i32
    %63 = tpu.dynamic_rotate %58 by %c1_i32_22 dim 1 : vector<32x256xf32>, i32 -> vector<32x256xf32>
    %c255_i32_23 = arith.constant 255 : i32
    %64 = tpu.dynamic_rotate %58 by %c255_i32_23 dim 1 : vector<32x256xf32>, i32 -> vector<32x256xf32>
    %65 = arith.maximumf %63, %64 : vector<32x256xf32>
    %66 = arith.maximumf %62, %65 : vector<32x256xf32>
    %c1_i32_24 = arith.constant 1 : i32
    %67 = tpu.dynamic_rotate %66 by %c1_i32_24 dim 0 : vector<32x256xf32>, i32 -> vector<32x256xf32>
    %c31_i32_25 = arith.constant 31 : i32
    %68 = tpu.dynamic_rotate %66 by %c31_i32_25 dim 0 : vector<32x256xf32>, i32 -> vector<32x256xf32>
    %69 = arith.maximumf %67, %68 : vector<32x256xf32>
    %70 = arith.maximumf %66, %69 : vector<32x256xf32>
    %c1_i32_26 = arith.constant 1 : i32
    %71 = tpu.dynamic_rotate %66 by %c1_i32_26 dim 1 : vector<32x256xf32>, i32 -> vector<32x256xf32>
    %c255_i32_27 = arith.constant 255 : i32
    %72 = tpu.dynamic_rotate %66 by %c255_i32_27 dim 1 : vector<32x256xf32>, i32 -> vector<32x256xf32>
    %73 = arith.maximumf %71, %72 : vector<32x256xf32>
    %74 = arith.maximumf %70, %73 : vector<32x256xf32>
    %cst = arith.constant 0.000000e+00 : f32
    %75 = vector.broadcast %cst : f32 to vector<32x256xf32>
    %76 = arith.cmpf oeq, %74, %75 : vector<32x256xf32>
    %cst_28 = arith.constant 0.000000e+00 : f32
    %77 = vector.broadcast %cst_28 : f32 to vector<32x256xf32>
    %78 = arith.select %76, %18, %77 : vector<32x256xi1>, vector<32x256xf32>
    %c1_i32_29 = arith.constant 1 : i32
    %79 = tpu.dynamic_rotate %78 by %c1_i32_29 dim 1 : vector<32x256xf32>, i32 -> vector<32x256xf32>
    %80 = arith.select %29, %78, %79 : vector<32x256xi1>, vector<32x256xf32>
    %c255_i32_30 = arith.constant 255 : i32
    %81 = tpu.dynamic_rotate %78 by %c255_i32_30 dim 1 : vector<32x256xf32>, i32 -> vector<32x256xf32>
    %82 = arith.select %31, %78, %81 : vector<32x256xi1>, vector<32x256xf32>
    %83 = arith.addf %78, %80 : vector<32x256xf32>
    %84 = arith.addf %83, %82 : vector<32x256xf32>
    %c1_i32_31 = arith.constant 1 : i32
    %85 = tpu.dynamic_rotate %84 by %c1_i32_31 dim 0 : vector<32x256xf32>, i32 -> vector<32x256xf32>
    %86 = arith.select %24, %84, %85 : vector<32x256xi1>, vector<32x256xf32>
    %c31_i32_32 = arith.constant 31 : i32
    %87 = tpu.dynamic_rotate %84 by %c31_i32_32 dim 0 : vector<32x256xf32>, i32 -> vector<32x256xf32>
    %88 = arith.select %27, %84, %87 : vector<32x256xi1>, vector<32x256xf32>
    %89 = arith.addf %84, %86 : vector<32x256xf32>
    %90 = arith.addf %89, %88 : vector<32x256xf32>
    %91 = arith.extui %76 : vector<32x256xi1> to vector<32x256xi32>
    %92 = arith.sitofp %91 : vector<32x256xi32> to vector<32x256xf32>
    %c1_i32_33 = arith.constant 1 : i32
    %93 = tpu.dynamic_rotate %92 by %c1_i32_33 dim 1 : vector<32x256xf32>, i32 -> vector<32x256xf32>
    %94 = arith.select %29, %92, %93 : vector<32x256xi1>, vector<32x256xf32>
    %c255_i32_34 = arith.constant 255 : i32
    %95 = tpu.dynamic_rotate %92 by %c255_i32_34 dim 1 : vector<32x256xf32>, i32 -> vector<32x256xf32>
    %96 = arith.select %31, %92, %95 : vector<32x256xi1>, vector<32x256xf32>
    %97 = arith.addf %92, %94 : vector<32x256xf32>
    %98 = arith.addf %97, %96 : vector<32x256xf32>
    %c1_i32_35 = arith.constant 1 : i32
    %99 = tpu.dynamic_rotate %98 by %c1_i32_35 dim 0 : vector<32x256xf32>, i32 -> vector<32x256xf32>
    %100 = arith.select %24, %98, %99 : vector<32x256xi1>, vector<32x256xf32>
    %c31_i32_36 = arith.constant 31 : i32
    %101 = tpu.dynamic_rotate %98 by %c31_i32_36 dim 0 : vector<32x256xf32>, i32 -> vector<32x256xf32>
    %102 = arith.select %27, %98, %101 : vector<32x256xi1>, vector<32x256xf32>
    %103 = arith.addf %98, %100 : vector<32x256xf32>
    %104 = arith.addf %103, %102 : vector<32x256xf32>
    %cst_37 = arith.constant 0.000000e+00 : f32
    %105 = vector.broadcast %cst_37 : f32 to vector<32x256xf32>
    %106 = arith.cmpf oeq, %104, %105 : vector<32x256xf32>
    %cst_38 = arith.constant 1.000000e+00 : f32
    %107 = vector.broadcast %cst_38 : f32 to vector<32x256xf32>
    %108 = arith.select %106, %107, %104 : vector<32x256xi1>, vector<32x256xf32>
    %109 = tpu.reciprocal %108 {approx = true} : vector<32x256xf32> -> vector<32x256xf32>
    %110 = arith.mulf %108, %109 : vector<32x256xf32>
    %cst_39 = arith.constant 2.000000e+00 : f32
    %111 = vector.broadcast %cst_39 : f32 to vector<32x256xf32>
    %112 = arith.subf %111, %110 : vector<32x256xf32>
    %113 = arith.mulf %109, %112 : vector<32x256xf32>
    %114 = arith.mulf %90, %113 : vector<32x256xf32>
    %115 = arith.ori %76, %106 : vector<32x256xi1>
    %116 = arith.select %115, %18, %114 : vector<32x256xi1>, vector<32x256xf32>
    %cst_40 = arith.constant 0.000000e+00 : f32
    %117 = vector.broadcast %cst_40 : f32 to vector<32x256xf32>
    %118 = arith.cmpf oeq, %66, %117 : vector<32x256xf32>
    %cst_41 = arith.constant 0.000000e+00 : f32
    %119 = vector.broadcast %cst_41 : f32 to vector<32x256xf32>
    %120 = arith.select %118, %116, %119 : vector<32x256xi1>, vector<32x256xf32>
    %c1_i32_42 = arith.constant 1 : i32
    %121 = tpu.dynamic_rotate %120 by %c1_i32_42 dim 1 : vector<32x256xf32>, i32 -> vector<32x256xf32>
    %122 = arith.select %29, %120, %121 : vector<32x256xi1>, vector<32x256xf32>
    %c255_i32_43 = arith.constant 255 : i32
    %123 = tpu.dynamic_rotate %120 by %c255_i32_43 dim 1 : vector<32x256xf32>, i32 -> vector<32x256xf32>
    %124 = arith.select %31, %120, %123 : vector<32x256xi1>, vector<32x256xf32>
    %125 = arith.addf %120, %122 : vector<32x256xf32>
    %126 = arith.addf %125, %124 : vector<32x256xf32>
    %c1_i32_44 = arith.constant 1 : i32
    %127 = tpu.dynamic_rotate %126 by %c1_i32_44 dim 0 : vector<32x256xf32>, i32 -> vector<32x256xf32>
    %128 = arith.select %24, %126, %127 : vector<32x256xi1>, vector<32x256xf32>
    %c31_i32_45 = arith.constant 31 : i32
    %129 = tpu.dynamic_rotate %126 by %c31_i32_45 dim 0 : vector<32x256xf32>, i32 -> vector<32x256xf32>
    %130 = arith.select %27, %126, %129 : vector<32x256xi1>, vector<32x256xf32>
    %131 = arith.addf %126, %128 : vector<32x256xf32>
    %132 = arith.addf %131, %130 : vector<32x256xf32>
    %133 = arith.extui %118 : vector<32x256xi1> to vector<32x256xi32>
    %134 = arith.sitofp %133 : vector<32x256xi32> to vector<32x256xf32>
    %c1_i32_46 = arith.constant 1 : i32
    %135 = tpu.dynamic_rotate %134 by %c1_i32_46 dim 1 : vector<32x256xf32>, i32 -> vector<32x256xf32>
    %136 = arith.select %29, %134, %135 : vector<32x256xi1>, vector<32x256xf32>
    %c255_i32_47 = arith.constant 255 : i32
    %137 = tpu.dynamic_rotate %134 by %c255_i32_47 dim 1 : vector<32x256xf32>, i32 -> vector<32x256xf32>
    %138 = arith.select %31, %134, %137 : vector<32x256xi1>, vector<32x256xf32>
    %139 = arith.addf %134, %136 : vector<32x256xf32>
    %140 = arith.addf %139, %138 : vector<32x256xf32>
    %c1_i32_48 = arith.constant 1 : i32
    %141 = tpu.dynamic_rotate %140 by %c1_i32_48 dim 0 : vector<32x256xf32>, i32 -> vector<32x256xf32>
    %142 = arith.select %24, %140, %141 : vector<32x256xi1>, vector<32x256xf32>
    %c31_i32_49 = arith.constant 31 : i32
    %143 = tpu.dynamic_rotate %140 by %c31_i32_49 dim 0 : vector<32x256xf32>, i32 -> vector<32x256xf32>
    %144 = arith.select %27, %140, %143 : vector<32x256xi1>, vector<32x256xf32>
    %145 = arith.addf %140, %142 : vector<32x256xf32>
    %146 = arith.addf %145, %144 : vector<32x256xf32>
    %cst_50 = arith.constant 0.000000e+00 : f32
    %147 = vector.broadcast %cst_50 : f32 to vector<32x256xf32>
    %148 = arith.cmpf oeq, %146, %147 : vector<32x256xf32>
    %cst_51 = arith.constant 1.000000e+00 : f32
    %149 = vector.broadcast %cst_51 : f32 to vector<32x256xf32>
    %150 = arith.select %148, %149, %146 : vector<32x256xi1>, vector<32x256xf32>
    %151 = tpu.reciprocal %150 {approx = true} : vector<32x256xf32> -> vector<32x256xf32>
    %152 = arith.mulf %150, %151 : vector<32x256xf32>
    %cst_52 = arith.constant 2.000000e+00 : f32
    %153 = vector.broadcast %cst_52 : f32 to vector<32x256xf32>
    %154 = arith.subf %153, %152 : vector<32x256xf32>
    %155 = arith.mulf %151, %154 : vector<32x256xf32>
    %156 = arith.mulf %132, %155 : vector<32x256xf32>
    %157 = arith.ori %118, %148 : vector<32x256xi1>
    %158 = arith.select %157, %116, %156 : vector<32x256xi1>, vector<32x256xf32>
    %cst_53 = arith.constant 0.000000e+00 : f32
    %159 = vector.broadcast %cst_53 : f32 to vector<32x256xf32>
    %160 = arith.cmpf oeq, %58, %159 : vector<32x256xf32>
    %cst_54 = arith.constant 0.000000e+00 : f32
    %161 = vector.broadcast %cst_54 : f32 to vector<32x256xf32>
    %162 = arith.select %160, %158, %161 : vector<32x256xi1>, vector<32x256xf32>
    %c1_i32_55 = arith.constant 1 : i32
    %163 = tpu.dynamic_rotate %162 by %c1_i32_55 dim 1 : vector<32x256xf32>, i32 -> vector<32x256xf32>
    %164 = arith.select %29, %162, %163 : vector<32x256xi1>, vector<32x256xf32>
    %c255_i32_56 = arith.constant 255 : i32
    %165 = tpu.dynamic_rotate %162 by %c255_i32_56 dim 1 : vector<32x256xf32>, i32 -> vector<32x256xf32>
    %166 = arith.select %31, %162, %165 : vector<32x256xi1>, vector<32x256xf32>
    %167 = arith.addf %162, %164 : vector<32x256xf32>
    %168 = arith.addf %167, %166 : vector<32x256xf32>
    %c1_i32_57 = arith.constant 1 : i32
    %169 = tpu.dynamic_rotate %168 by %c1_i32_57 dim 0 : vector<32x256xf32>, i32 -> vector<32x256xf32>
    %170 = arith.select %24, %168, %169 : vector<32x256xi1>, vector<32x256xf32>
    %c31_i32_58 = arith.constant 31 : i32
    %171 = tpu.dynamic_rotate %168 by %c31_i32_58 dim 0 : vector<32x256xf32>, i32 -> vector<32x256xf32>
    %172 = arith.select %27, %168, %171 : vector<32x256xi1>, vector<32x256xf32>
    %173 = arith.addf %168, %170 : vector<32x256xf32>
    %174 = arith.addf %173, %172 : vector<32x256xf32>
    %175 = arith.extui %160 : vector<32x256xi1> to vector<32x256xi32>
    %176 = arith.sitofp %175 : vector<32x256xi32> to vector<32x256xf32>
    %c1_i32_59 = arith.constant 1 : i32
    %177 = tpu.dynamic_rotate %176 by %c1_i32_59 dim 1 : vector<32x256xf32>, i32 -> vector<32x256xf32>
    %178 = arith.select %29, %176, %177 : vector<32x256xi1>, vector<32x256xf32>
    %c255_i32_60 = arith.constant 255 : i32
    %179 = tpu.dynamic_rotate %176 by %c255_i32_60 dim 1 : vector<32x256xf32>, i32 -> vector<32x256xf32>
    %180 = arith.select %31, %176, %179 : vector<32x256xi1>, vector<32x256xf32>
    %181 = arith.addf %176, %178 : vector<32x256xf32>
    %182 = arith.addf %181, %180 : vector<32x256xf32>
    %c1_i32_61 = arith.constant 1 : i32
    %183 = tpu.dynamic_rotate %182 by %c1_i32_61 dim 0 : vector<32x256xf32>, i32 -> vector<32x256xf32>
    %184 = arith.select %24, %182, %183 : vector<32x256xi1>, vector<32x256xf32>
    %c31_i32_62 = arith.constant 31 : i32
    %185 = tpu.dynamic_rotate %182 by %c31_i32_62 dim 0 : vector<32x256xf32>, i32 -> vector<32x256xf32>
    %186 = arith.select %27, %182, %185 : vector<32x256xi1>, vector<32x256xf32>
    %187 = arith.addf %182, %184 : vector<32x256xf32>
    %188 = arith.addf %187, %186 : vector<32x256xf32>
    %cst_63 = arith.constant 0.000000e+00 : f32
    %189 = vector.broadcast %cst_63 : f32 to vector<32x256xf32>
    %190 = arith.cmpf oeq, %188, %189 : vector<32x256xf32>
    %cst_64 = arith.constant 1.000000e+00 : f32
    %191 = vector.broadcast %cst_64 : f32 to vector<32x256xf32>
    %192 = arith.select %190, %191, %188 : vector<32x256xi1>, vector<32x256xf32>
    %193 = tpu.reciprocal %192 {approx = true} : vector<32x256xf32> -> vector<32x256xf32>
    %194 = arith.mulf %192, %193 : vector<32x256xf32>
    %cst_65 = arith.constant 2.000000e+00 : f32
    %195 = vector.broadcast %cst_65 : f32 to vector<32x256xf32>
    %196 = arith.subf %195, %194 : vector<32x256xf32>
    %197 = arith.mulf %193, %196 : vector<32x256xf32>
    %198 = arith.mulf %174, %197 : vector<32x256xf32>
    %199 = arith.ori %160, %190 : vector<32x256xi1>
    %200 = arith.select %199, %158, %198 : vector<32x256xi1>, vector<32x256xf32>
    %cst_66 = arith.constant 0.000000e+00 : f32
    %201 = vector.broadcast %cst_66 : f32 to vector<32x256xf32>
    %202 = arith.cmpf oeq, %50, %201 : vector<32x256xf32>
    %cst_67 = arith.constant 0.000000e+00 : f32
    %203 = vector.broadcast %cst_67 : f32 to vector<32x256xf32>
    %204 = arith.select %202, %200, %203 : vector<32x256xi1>, vector<32x256xf32>
    %c1_i32_68 = arith.constant 1 : i32
    %205 = tpu.dynamic_rotate %204 by %c1_i32_68 dim 1 : vector<32x256xf32>, i32 -> vector<32x256xf32>
    %206 = arith.select %29, %204, %205 : vector<32x256xi1>, vector<32x256xf32>
    %c255_i32_69 = arith.constant 255 : i32
    %207 = tpu.dynamic_rotate %204 by %c255_i32_69 dim 1 : vector<32x256xf32>, i32 -> vector<32x256xf32>
    %208 = arith.select %31, %204, %207 : vector<32x256xi1>, vector<32x256xf32>
    %209 = arith.addf %204, %206 : vector<32x256xf32>
    %210 = arith.addf %209, %208 : vector<32x256xf32>
    %c1_i32_70 = arith.constant 1 : i32
    %211 = tpu.dynamic_rotate %210 by %c1_i32_70 dim 0 : vector<32x256xf32>, i32 -> vector<32x256xf32>
    %212 = arith.select %24, %210, %211 : vector<32x256xi1>, vector<32x256xf32>
    %c31_i32_71 = arith.constant 31 : i32
    %213 = tpu.dynamic_rotate %210 by %c31_i32_71 dim 0 : vector<32x256xf32>, i32 -> vector<32x256xf32>
    %214 = arith.select %27, %210, %213 : vector<32x256xi1>, vector<32x256xf32>
    %215 = arith.addf %210, %212 : vector<32x256xf32>
    %216 = arith.addf %215, %214 : vector<32x256xf32>
    %217 = arith.extui %202 : vector<32x256xi1> to vector<32x256xi32>
    %218 = arith.sitofp %217 : vector<32x256xi32> to vector<32x256xf32>
    %c1_i32_72 = arith.constant 1 : i32
    %219 = tpu.dynamic_rotate %218 by %c1_i32_72 dim 1 : vector<32x256xf32>, i32 -> vector<32x256xf32>
    %220 = arith.select %29, %218, %219 : vector<32x256xi1>, vector<32x256xf32>
    %c255_i32_73 = arith.constant 255 : i32
    %221 = tpu.dynamic_rotate %218 by %c255_i32_73 dim 1 : vector<32x256xf32>, i32 -> vector<32x256xf32>
    %222 = arith.select %31, %218, %221 : vector<32x256xi1>, vector<32x256xf32>
    %223 = arith.addf %218, %220 : vector<32x256xf32>
    %224 = arith.addf %223, %222 : vector<32x256xf32>
    %c1_i32_74 = arith.constant 1 : i32
    %225 = tpu.dynamic_rotate %224 by %c1_i32_74 dim 0 : vector<32x256xf32>, i32 -> vector<32x256xf32>
    %226 = arith.select %24, %224, %225 : vector<32x256xi1>, vector<32x256xf32>
    %c31_i32_75 = arith.constant 31 : i32
    %227 = tpu.dynamic_rotate %224 by %c31_i32_75 dim 0 : vector<32x256xf32>, i32 -> vector<32x256xf32>
    %228 = arith.select %27, %224, %227 : vector<32x256xi1>, vector<32x256xf32>
    %229 = arith.addf %224, %226 : vector<32x256xf32>
    %230 = arith.addf %229, %228 : vector<32x256xf32>
    %cst_76 = arith.constant 0.000000e+00 : f32
    %231 = vector.broadcast %cst_76 : f32 to vector<32x256xf32>
    %232 = arith.cmpf oeq, %230, %231 : vector<32x256xf32>
    %cst_77 = arith.constant 1.000000e+00 : f32
    %233 = vector.broadcast %cst_77 : f32 to vector<32x256xf32>
    %234 = arith.select %232, %233, %230 : vector<32x256xi1>, vector<32x256xf32>
    %235 = tpu.reciprocal %234 {approx = true} : vector<32x256xf32> -> vector<32x256xf32>
    %236 = arith.mulf %234, %235 : vector<32x256xf32>
    %cst_78 = arith.constant 2.000000e+00 : f32
    %237 = vector.broadcast %cst_78 : f32 to vector<32x256xf32>
    %238 = arith.subf %237, %236 : vector<32x256xf32>
    %239 = arith.mulf %235, %238 : vector<32x256xf32>
    %240 = arith.mulf %216, %239 : vector<32x256xf32>
    %241 = arith.ori %202, %232 : vector<32x256xi1>
    %242 = arith.select %241, %200, %240 : vector<32x256xi1>, vector<32x256xf32>
    %243 = vector.extract_strided_slice %242 {offsets = [8, 8], sizes = [16, 128], strides = [1, 1]} : vector<32x256xf32> to vector<16x128xf32>
    %c0_79 = arith.constant 0 : index
    %c0_80 = arith.constant 0 : index
    %c0_81 = arith.constant 0 : index
    %244 = vector.load %arg4[%c0_79, %c0_80, %c0_81] : memref<1x16x128xf32, #tpu.memory_space<vmem>>, vector<1x16x128xf32>
    %245 = vector.shape_cast %244 : vector<1x16x128xf32> to vector<16x128xf32>
    %246 = vector.shape_cast %243 : vector<16x128xf32> to vector<1x16x128xf32>
    tpu.vector_store %arg4[%c0_79, %c0_80, %c0_81], %246 {strides = array<i32>} : memref<1x16x128xf32, #tpu.memory_space<vmem>>, vector<1x16x128xf32>,
    return
  }
  func.func @transform_2(%arg0: i32, %arg1: i32) -> (i32, i32, i32) {
    %c0_i32 = arith.constant 0 : i32
    %c0_i32_0 = arith.constant 0 : i32
    return %arg0, %arg1, %c0_i32 : i32, i32, i32
  }
}

</mosaic_0001>

<bundles_post_ra>
// kernel: tpu_custom_call.1
= control target key start
LH: loop header
LB: loop body
LE: loop exit
PB: predicated region body
PF: predicated region fallthrough
CT: control target
= control target key end

     0   :  { %7 = vsyncpa [#allocation6], 0  ;;  %s6333_s0 = inlined_call_operand.hbm [shape: f32[2,64,256], index: 0, kind: input, shape index: {}]   ;;  %s6334_s1 = inlined_call_operand.hbm [shape: f32[2,64,256], index: 1, kind: input, shape index: {}]   ;;  %s6335_s2 = inlined_call_operand.hbm [shape: f32[2,48,128], index: 2, kind: output, shape index: {}]  }
   0x1   :  { %9 = vsyncpa [#allocation6 + $0x1], 0  ;;  %s2859_s9 = smov 0   ;;  %s2861_s10 = smov 0  }
   0x2   :  { %s2863_s11 = smov 0   ;;  %s2865_s12 = smov 0  }
   0x3   :  { %s2867_s13 = smov 0  }
   0x4 LB: > { %s21_s14 = sadd.s32 1, %s2825_s11  ;;  %s24_s15 = sadd.s32 1, %s2829_s12  ;;  %s2833_s13 = sphi %s2867_s13, %s15_s13   ;;  %s2829_s12 = sphi %s2865_s12, %s7066_s12   ;;  %s2825_s11 = sphi %s2863_s11, %s7065_s11   ;;  %s2821_s10 = sphi %s2861_s10, %s7064_s10   ;;  %s2817_s9 = sphi %s2859_s9, %s7063_s9  }
   0x5   : > { %p22_p0 = scmp.ge.s32.totalorder %s21_s14, 3  ;;  %s2269_s16 = sadd.s32 4294967295, %s2833_s13  }
   0x6   : > { %p42_p1 = scmp.ne.s32.totalorder %s2821_s10, %s2817_s9  ;;  %p43_p3 = scmp.eq.s32.totalorder %s2269_s16, 5 }
   0x7   : > { %s7068_s14 = smov (%p22_p0, %s21_s14), 0  ;;  %s7070_s15 = smov (!%p22_p0, %s24_s15), %s2829_s12 }
   0x8   : > { %p26_p2 = scmp.ge.s32.totalorder %s7070_s15, 2  ;;  %s29_s17 = ssub.s32 %s2825_s11, %s7068_s14 }
   0x9   : > { %p2896_p4 = por %p43_p3, %p42_p1  ;;  %s33_s20 = sadd.s32 1, %s2821_s10 }
   0xa   : > { %s7072_s15 = smov (%p26_p2, %s7070_s15), 0  ;;  %p37_p5 = scmp.eq.s32.totalorder %s2833_s13, 5 }
   0xb   : > { %s28_s19 = ssub.s32 %s2829_s12, %s7072_s15  ;;  %p2271_p9 = scmp.ge.s32.totalorder %s2833_s13, 6 }
   0xc   : > { %s30_s21 = sor.u32 %s29_s17, %s28_s19 }
   0xd   : > { %p31_p6 = scmp.eq.s32.totalorder %s30_s21, 0  ;;  %p2270_p7 = scmp.ne.s32.totalorder %s30_s21, 0 }
   0xe   : > { %52 = sbr.rel (%p2271_p9) target bundleno = 1463 (0x5b7), region = 12 }
   0xf   : > { %s2905_s22 = scalar_select %p31_p6, %s2821_s10, %s33_s20  }
  0x10   : > { %p2907_p8 = por %p2270_p7, %p37_p5 }
  0x13   : > { %s57_s24 = sand.u32 1, %s2821_s10   ;;  %s2914_s25 = sshll.u32 %s2825_s11, 4 }
  0x14   : > { %s2918_s26 = sshll.u32 %s57_s24, 4  ;;  %s62_s27 = sshra.s32 %s2914_s25, 3 }
  0x15   : > { %s2274_s28 = sshll.u32 %s62_s27, 1  ;;  %s2275_s29 = sshll.u32 %s2829_s12, 4 }
  0x16   : > { %s66_s30 = sadd.s32 %s2275_s29, %s2274_s28  ;;  %s2835_s3 = smov [#allocation2]  }
  0x17   : > { %s76_s4 = sshll.u32 %s2835_s3, 4  ;;  %s2276_s5 = sshll.u32 %s66_s30, 7  ;;  %s77_s4 = int_to_ptr.vmem [resolvable:$true] %s76_s4 }
  0x18   : > { %s68_s8 = scalar_lea.hbm %s6333_s0, %s2276_s5  ;;  %s2727_s16 = scalar_lea.vmem %s77_s4, 1024 }
  0x19   : > { %p2728_p10 = scmp.ne.s32.totalorder %s77_s4, %s2727_s16  ;;  %p2732_p11 = scmp.lt.s32.totalorder %s77_s4, %s77_s4 }
  0x1a   : > { %p2733_p12 = scmp.lt.s32.totalorder %s2727_s16, %s2727_s16 }
  0x1c   : > { %p2734_p13 = por %p2733_p12, %p2732_p11 }
  0x1e   : > { %p2735_p0 = pnand %p2734_p13, %p2728_p10 }
  0x20   : > { %2738 = shalt.err (!%p2735_p0)  }
  0x21   : > { %79 = dma.hbm_to_vmem [thread:$0]  %s68_s8, 1024, %s77_s4, [#allocation4] }
  0x22   : > { %s81_s20 = scalar_lea.hbm %s6334_s1, %s2276_s5  ;;  %s2836_s21 = smov [#allocation3]  }
  0x23   : > { %s90_s27 = sshll.u32 %s2836_s21, 4  ;;  %s91_s27 = int_to_ptr.vmem [resolvable:$true] %s90_s27 }
  0x24   : > { %s2749_s28 = scalar_lea.vmem %s91_s27, 1024  ;;  %p2754_p2 = scmp.lt.s32.totalorder %s91_s27, %s91_s27 }
  0x25   : > { %p2750_p1 = scmp.ne.s32.totalorder %s91_s27, %s2749_s28  ;;  %p2755_p3 = scmp.lt.s32.totalorder %s2749_s28, %s2749_s28 }
  0x27   : > { %p2756_p5 = por %p2755_p3, %p2754_p2 }
  0x29   : > { %p2757_p6 = pnand %p2756_p5, %p2750_p1 }
  0x2b   : > { %2760 = shalt.err (!%p2757_p6)  }
  0x2c   : > { %93 = dma.hbm_to_vmem [thread:$0]  %s81_s20, 1024, %s91_s27, [#allocation4 + $0x1] }
  0x2d   : > { %s2929_s29 = scalar_lea.vmem [#allocation5], %s2918_s26 }
  0x2e   : > { %2807 = dma.done.wait [#allocation4], 1024 }
  0x2f   : > { %2808 = vsyncadd [#allocation4], 4294966272 }
  0x30   : > { %2809 = dma.done.wait [#allocation4 + $0x1], 1024 }
  0x31   : > { %2810 = vsyncadd [#allocation4 + $0x1], 4294966272  ;;  %v2931_v0 = vld [vmem:[#allocation3 + $0x20] sm:$0xff]  ;;  %s2837_s30 = smov 1   ;;  %v2939_v2 = vld [vmem:[#allocation3 + $0x30] sm:$0xff]  ;;  %s2838_s26 = smov 127   ;;  %v116_v8 = vlaneseq }
  0x32   : > { %v2933_v1 = vld [vmem:[#allocation3] sm:$0xff]  ;;  %194 = vrot.lane.b32.xlu1 %v2931_v0, %s2837_s30  ;;  %v2941_v3 = vld [vmem:[#allocation3 + $0x10] sm:$0xff]  ;;  %v2947_v4 = vld [vmem:[#allocation3 + $0x18] sm:$0xff]  ;;  %v161_v14 = vrot.slane %v2931_v0, 1  ;;  %v146_v22 = vrot.slane %v2939_v2, 7  ;;  %v144_v36 = vrot.slane %v2931_v0, 7 }
  0x33   : > { %190 = vrot.lane.b32.xlu0 %v2933_v1, %s2837_s30  ;;  %v2949_v5 = vld [vmem:[#allocation3 + $0x8] sm:$0xff]  ;;  %v2955_v6 = vld [vmem:[#allocation3 + $0x38] sm:$0xff]  ;;  %v2983_v11 = vshrl.u32 %v116_v8, 7  ;;  %v143_v12 = vrot.slane %v2947_v4, 7  ;;  %v160_v13 = vrot.slane %v2947_v4, 1  ;;  %v140_v16 = vrot.slane %v2933_v1, 7 }
  0x34   : > { %v2957_v7 = vld [vmem:[#allocation3 + $0x28] sm:$0xff]  ;;  %v141_v17 = vrot.slane %v2949_v5, 7  ;;  %v142_v20 = vrot.slane %v2941_v3, 7  ;;  %v159_v21 = vrot.slane %v2941_v3, 1  ;;  %v147_v23 = vrot.slane %v2955_v6, 7  ;;  %s124_s3 = ssub.s32 8, %s2914_s25 }
  0x35   : > { %v162_v15 = vrot.slane %v2957_v7, 1  ;;  %vm6506_vm0 = vcmp.lt.s32.totalorder %v2983_v11, 1  ;;  %vm6457_vm1 = vcmp.lt.s32.totalorder %v2983_v11, 7  ;;  %v158_v24 = vrot.slane %v2949_v5, 1  ;;  %s130_s4 = ssub.s32 47, %s2914_s25  ;;  %s2840_s25 = smov 120  }
  0x36   : > { %196 = vrot.lane.b32.xlu1 %v2939_v2, %s2837_s30  ;;  %v157_v25 = vrot.slane %v2933_v1, 1  ;;  %v153_v29 = vsel %vm6506_vm0, %v140_v16, %v142_v20  ;;  %v154_v30 = vsel %vm6506_vm0, %v141_v17, %v143_v12  ;;  %v168_v31 = vsel %vm6457_vm1, %v159_v21, %v161_v14  ;;  %s2325_s5 = smul.u32 6, %s2829_s12  ;;  %s2319_s6 = sshll.u32 %s2825_s11, 1 }
  0x37   : > { %192 = vrot.lane.b32.xlu0 %v2941_v3, %s2837_s30  ;;  %v169_v28 = vsel %vm6457_vm1, %v160_v13, %v162_v15  ;;  %v156_v32 = vsel %vm6506_vm0, %v147_v23, %v141_v17  ;;  %v171_v33 = vsel %vm6457_vm1, %v158_v24, %v160_v13  ;;  %v155_v34 = vsel %vm6506_vm0, %v146_v22, %v140_v16  ;;  %s2191_s8 = sshll.u32 %s2929_s29, 4  ;;  %s2176_s11 = scalar_lea.sflag [#allocation6], %s57_s24  ;;  %s2192_s8 = int_to_ptr.vmem [resolvable:$true] %s2191_s8 }
  0x38   : > { %v170_v35 = vsel %vm6457_vm1, %v157_v25, %v159_v21  ;;  %v145_v37 = vrot.slane %v2957_v7, 7  ;;  %v163_v38 = vrot.slane %v2939_v2, 1  ;;  %v164_v39 = vrot.slane %v2955_v6, 1  ;;  %s2188_s7 = sadd.s32 %s2325_s5, %s2319_s6  ;;  %s2761_s12 = scalar_lea.vmem %s2192_s8, 256 }
  0x39   : > { %v3019_v40 = vand.u32 127, %v116_v8  ;;  %v176_v43 = vmax.f32 %v153_v29, %v168_v31  ;;  %v177_v44 = vmax.f32 %v154_v30, %v169_v28  ;;  %v175_v45 = vmax.f32 %v156_v32, %v171_v33  ;;  %s2320_s16 = sshll.u32 %s2188_s7, 7  ;;  %p2762_p7 = scmp.ne.s32.totalorder %s2192_s8, %s2761_s12 }
  0x3a   : > { %200 = vrot.lane.b32.xlu1 %v2947_v4, %s2837_s30  ;;  %v174_v46 = vmax.f32 %v155_v34, %v170_v35  ;;  %v149_v47 = vsel %vm6506_vm0, %v144_v36, %v146_v22  ;;  %v150_v48 = vsel %vm6506_vm0, %v145_v37, %v147_v23  ;;  %v172_v49 = vsel %vm6457_vm1, %v163_v38, %v157_v25  ;;  %s2190_s20 = scalar_lea.hbm %s6335_s2, %s2320_s16  ;;  %s2841_s21 = smov [#allocation5]  }
  0x3b   : > { %198 = vrot.lane.b32.xlu0 %v2949_v5, %s2837_s30  ;;  %v173_v50 = vsel %vm6457_vm1, %v164_v39, %v158_v24  ;;  %v151_v51 = vsel %vm6506_vm0, %v142_v20, %v144_v36  ;;  %v152_v52 = vsel %vm6506_vm0, %v143_v12, %v145_v37  ;;  %v166_v53 = vsel %vm6457_vm1, %v161_v14, %v163_v38  ;;  %p2763_p9 = pnand %p2762_p7, %p2907_p8  ;;  %s2765_s27 = sshll.u32 %s2841_s21, 4  ;;  %s2766_s27 = int_to_ptr.vmem [resolvable:$false] %s2765_s27 }
  0x3c   : > { %v167_v54 = vsel %vm6457_vm1, %v162_v15, %v164_v39  ;;  %vm6455_vm2 = vcmp.lt.s32.totalorder %v3019_v40, 1  ;;  %v180_v57 = vmax.f32 %v149_v47, %v172_v49  ;;  %vm6454_vm3 = vcmp.lt.s32.totalorder %v3019_v40, 127  ;;  %s2767_s28 = scalar_lea.vmem %s2766_s27, 512  ;;  %p2768_p11 = scmp.lt.s32.totalorder %s2192_s8, %s2766_s27 }
  0x3d   : > { %v181_v58 = vmax.f32 %v150_v48, %v173_v50  ;;  %v178_v59 = vmax.f32 %v151_v51, %v166_v53  ;;  %v179_v60 = vmax.f32 %v152_v52, %v167_v54  ;;  %v184_v61 = vmax.f32 %v2941_v3, %v176_v43  ;;  %p2764_p10 = pneg %p2763_p9  ;;  %p2769_p12 = scmp.lt.s32.totalorder %s2767_s28, %s2761_s12 }
  0x3e   : > { %204 = vrot.lane.b32.xlu1 %v2955_v6, %s2837_s30  ;;  %v185_v62 = vmax.f32 %v2947_v4, %v177_v44  ;;  %v183_v63 = vmax.f32 %v2949_v5, %v175_v45  ;;  %v182_v8 = vmax.f32 %v2933_v1, %v174_v46  ;;  %v188_v22 = vmax.f32 %v2939_v2, %v180_v57 }
  0x3f   : > { %202 = vrot.lane.b32.xlu0 %v2957_v7, %s2837_s30  ;;  %v3066_v23 = vmax.f32 %v2955_v6, %v181_v58  ;;  %v3072_v24 = vmax.f32 %v2957_v7, %v179_v60  ;;  %p2770_p13 = por %p2769_p12, %p2768_p11 }
  0x41   : > { %p2771_p0 = pnand %p2770_p13, %p2764_p10 }
  0x42   : > { %217 = vrot.lane.b32.xlu1 %v2941_v3, %s2838_s26 }
  0x43   : > { %215 = vrot.lane.b32.xlu0 %v2933_v1, %s2838_s26 }
  0x46   : > { %221 = vrot.lane.b32.xlu1 %v2939_v2, %s2838_s26 }
  0x47   : > { %219 = vrot.lane.b32.xlu0 %v2931_v0, %s2838_s26 }
  0x4a   : > { %225 = vrot.lane.b32.xlu1 %v2947_v4, %s2838_s26 }
  0x4b   : > { %223 = vrot.lane.b32.xlu0 %v2949_v5, %s2838_s26 }
  0x4e   : > { %229 = vrot.lane.b32.xlu1 %v2955_v6, %s2838_s26 }
  0x4f   : > { %227 = vrot.lane.b32.xlu0 %v2957_v7, %s2838_s26 }
  0xa4   : > { %v2979_v9 = vpop.permute.xlu1 %194 }
  0xa5   : > { %v2981_v10 = vpop.permute.xlu0 %190 }
  0xa8   : > { %v197_v18 = vpop.permute.xlu1 %196 }
  0xa9   : > { %v193_v19 = vpop.permute.xlu0 %192 }
  0xac   : > { %v201_v26 = vpop.permute.xlu1 %200 }
  0xad   : > { %v199_v27 = vpop.permute.xlu0 %198  ;;  %v208_v12 = vsel %vm6455_vm2, %v193_v19, %v201_v26  ;;  %v212_v13 = vsel %vm6455_vm2, %v201_v26, %v193_v19 }
  0xae   : > { %v207_v14 = vsel %vm6455_vm2, %v2981_v10, %v199_v27  ;;  %v211_v15 = vsel %vm6455_vm2, %v199_v27, %v2981_v10  ;;  %v3069_v10 = vmax.f32 %v2931_v0, %v178_v59  ;;  %v258_v25 = vmin.f32 %v2941_v3, %v212_v13 }
  0xaf   : > { %v256_v26 = vmin.f32 %v2933_v1, %v211_v15  ;;  %v257_v27 = vmin.f32 %v2949_v5, %v207_v14 }
  0xb0   : > { %v205_v41 = vpop.permute.xlu1 %204 }
  0xb1   : > { %v203_v42 = vpop.permute.xlu0 %202  ;;  %v3055_v20 = vsel %vm6455_vm2, %v197_v18, %v205_v41  ;;  %v214_v21 = vsel %vm6455_vm2, %v205_v41, %v197_v18  ;;  %v259_v18 = vmin.f32 %v2947_v4, %v208_v12 }
  0xb2   : > { %v3062_v19 = vsel %vm6455_vm2, %v203_v42, %v2979_v9  ;;  %v262_v28 = vmin.f32 %v2939_v2, %v214_v21  ;;  %v263_v29 = vmin.f32 %v2955_v6, %v3055_v20  ;;  %v3084_v30 = vsel %vm6455_vm2, %v2979_v9, %v203_v42 }
  0xb3   : > { %v260_v31 = vmin.f32 %v2931_v0, %v3062_v19  ;;  %v261_v38 = vmin.f32 %v2957_v7, %v3084_v30 }
  0xb4   : > { %v218_v55 = vpop.permute.xlu1 %217 }
  0xb5   : > { %v216_v56 = vpop.permute.xlu0 %215 }
  0xb8   : > { %v222_v16 = vpop.permute.xlu1 %221 }
  0xb9   : > { %v220_v17 = vpop.permute.xlu0 %219 }
  0xbc   : > { %v226_v3 = vpop.permute.xlu1 %225 }
  0xbd   : > { %v224_v32 = vpop.permute.xlu0 %223  ;;  %v233_v1 = vsel %vm6454_vm3, %v218_v55, %v226_v3  ;;  %v237_v4 = vsel %vm6454_vm3, %v226_v3, %v218_v55 }
  0xbe   : > { %v232_v2 = vsel %vm6454_vm3, %v216_v56, %v224_v32  ;;  %v236_v5 = vsel %vm6454_vm3, %v224_v32, %v216_v56  ;;  %v242_v6 = vmax.f32 %v212_v13, %v233_v1  ;;  %v243_v9 = vmax.f32 %v208_v12, %v237_v4 }
  0xbf   : > { %v3096_v33 = vmin.f32 %v258_v25, %v233_v1  ;;  %v3098_v34 = vmin.f32 %v259_v18, %v237_v4  ;;  %v240_v0 = vmax.f32 %v211_v15, %v232_v2  ;;  %v241_v35 = vmax.f32 %v207_v14, %v236_v5 }
  0xc0   : > { %v264_v36 = vmin.f32 %v256_v26, %v232_v2  ;;  %v3100_v37 = vmin.f32 %v257_v27, %v236_v5  ;;  %v3104_v39 = vmax.f32 %v184_v61, %v242_v6  ;;  %v230_v43 = vpop.permute.xlu1 %229  ;;  %v3108_v45 = vmax.f32 %v185_v62, %v243_v9 }
  0xc1   : > { %v274_v41 = vrot.slane %v3096_v33, 7  ;;  %v275_v42 = vrot.slane %v3098_v34, 7  ;;  %v228_v44 = vpop.permute.xlu0 %227  ;;  %v298_v46 = vrot.slane %v3096_v33, 1  ;;  %v299_v47 = vrot.slane %v3098_v34, 1 }
  0xc2   : > { %v3112_v48 = vmax.f32 %v182_v8, %v240_v0  ;;  %v272_v49 = vrot.slane %v264_v36, 7  ;;  %v273_v50 = vrot.slane %v3100_v37, 7  ;;  %v296_v7 = vrot.slane %v264_v36, 1 }
  0xc3   : > { %v297_v51 = vrot.slane %v3100_v37, 1  ;;  %v3116_v52 = vmax.f32 %v183_v63, %v241_v35  ;;  %v235_v53 = vsel %vm6454_vm3, %v222_v16, %v230_v43  ;;  %v239_v54 = vsel %vm6454_vm3, %v230_v43, %v222_v16 }
  0xc4   : > { %v234_v55 = vsel %vm6454_vm3, %v220_v17, %v228_v44  ;;  %v284_v56 = vsel %vm6506_vm0, %v272_v49, %v274_v41  ;;  %v285_v57 = vsel %vm6506_vm0, %v273_v50, %v275_v42  ;;  %v308_v58 = vsel %vm6457_vm1, %v296_v7, %v298_v46 }
  0xc5   : > { %v238_v59 = vsel %vm6454_vm3, %v228_v44, %v220_v17  ;;  %v290_v60 = vmin.f32 %v3096_v33, %v284_v56  ;;  %v309_v61 = vsel %vm6457_vm1, %v297_v51, %v299_v47  ;;  %v246_v62 = vmax.f32 %v214_v21, %v235_v53 }
  0xc6   : > { %v247_v63 = vmax.f32 %v3055_v20, %v239_v54  ;;  %v291_v8 = vmin.f32 %v3098_v34, %v285_v57  ;;  %v270_v12 = vmin.f32 %v262_v28, %v235_v53  ;;  %v271_v13 = vmin.f32 %v263_v29, %v239_v54 }
  0xc7   : > { %v244_v14 = vmax.f32 %v3062_v19, %v234_v55  ;;  %v254_v15 = vmax.f32 %v188_v22, %v246_v62  ;;  %v245_v16 = vmax.f32 %v3084_v30, %v238_v59  ;;  %v268_v25 = vmin.f32 %v260_v31, %v234_v55 }
  0xc8   : > { %v269_v18 = vmin.f32 %v261_v38, %v238_v59  ;;  %v278_v17 = vrot.slane %v270_v12, 7  ;;  %v279_v26 = vrot.slane %v271_v13, 7  ;;  %v302_v27 = vrot.slane %v270_v12, 1 }
  0xc9   : > { %v303_v3 = vrot.slane %v271_v13, 1  ;;  %v255_v32 = vmax.f32 %v3066_v23, %v247_v63  ;;  %v252_v21 = vmax.f32 %v3069_v10, %v244_v14  ;;  %v276_v20 = vrot.slane %v268_v25, 7 }
  0xca   : > { %v277_v1 = vrot.slane %v269_v18, 7  ;;  %v286_v28 = vsel %vm6506_vm0, %v278_v17, %v272_v49  ;;  %v287_v19 = vsel %vm6506_vm0, %v279_v26, %v273_v50  ;;  %v310_v22 = vsel %vm6457_vm1, %v302_v27, %v296_v7 }
  0xcb   : > { %v311_v29 = vsel %vm6457_vm1, %v303_v3, %v297_v51  ;;  %v288_v30 = vmin.f32 %v264_v36, %v286_v28  ;;  %v289_v31 = vmin.f32 %v3100_v37, %v287_v19  ;;  %v280_v23 = vsel %vm6506_vm0, %v276_v20, %v278_v17 }
  0xcc   : > { %v281_v10 = vsel %vm6506_vm0, %v277_v1, %v279_v26  ;;  %v282_v4 = vsel %vm6506_vm0, %v274_v41, %v276_v20  ;;  %v283_v2 = vsel %vm6506_vm0, %v275_v42, %v277_v1  ;;  %v294_v5 = vmin.f32 %v270_v12, %v280_v23 }
  0xcd   : > { %v295_v6 = vmin.f32 %v271_v13, %v281_v10  ;;  %v292_v9 = vmin.f32 %v268_v25, %v282_v4  ;;  %v293_v33 = vmin.f32 %v269_v18, %v283_v2  ;;  %v300_v34 = vrot.slane %v268_v25, 1 }
  0xce   : > { %v301_v0 = vrot.slane %v269_v18, 1  ;;  %v318_v35 = vmin.f32 %v294_v5, %v310_v22  ;;  %v312_v36 = vmin.f32 %v288_v30, %v308_v58  ;;  %v313_v38 = vmin.f32 %v289_v31, %v309_v61 }
  0xcf   : > { %v319_v37 = vmin.f32 %v295_v6, %v311_v29  ;;  %v304_v43 = vsel %vm6457_vm1, %v300_v34, %v302_v27  ;;  %v306_v41 = vsel %vm6457_vm1, %v298_v46, %v300_v34  ;;  %v253_v49 = vmax.f32 %v3072_v24, %v245_v16 }
  0xd0   : > { %v305_v44 = vsel %vm6457_vm1, %v301_v0, %v303_v3  ;;  %v307_v42 = vsel %vm6457_vm1, %v299_v47, %v301_v0  ;;  %v314_v50 = vmin.f32 %v290_v60, %v306_v41  ;;  %v316_v7 = vmin.f32 %v292_v9, %v304_v43 }
  0xd1   : > { %v317_v51 = vmin.f32 %v293_v33, %v305_v44  ;;  %v315_v53 = vmin.f32 %v291_v8, %v307_v42  ;;  %vm326_vm4 = vcmp.ne.f32.partialorder %v254_v15, %v318_v35  ;;  %vm320_vm5 = vcmp.ne.f32.partialorder %v3112_v48, %v312_v36 }
  0xd2   : > { %vm327_vm6 = vcmp.ne.f32.partialorder %v255_v32, %v319_v37  ;;  %vm324_vm7 = vcmp.ne.f32.partialorder %v252_v21, %v316_v7  ;;  %v6336_v54 = vmov 0.0   ;;  %vm322_vm9 = vcmp.ne.f32.partialorder %v3104_v39, %v314_v50 }
  0xd3   : > { %vm325_vm8 = vcmp.ne.f32.partialorder %v253_v49, %v317_v51  ;;  %v3169_v55 = vsel %vm326_vm4, 1.0, %v6336_v54  ;;  %v3173_v46 = vsel %vm324_vm7, 1.0, %v6336_v54  ;;  %v3179_v47 = vsel %vm320_vm5, 1.0, %v6336_v54 }
  0xd4   : > { %6552 = vst [vmem:[#allocation16_spill] sm:$0xff] %v3169_v55  ;;  %6553 = vst [vmem:[#allocation17_spill] sm:$0xff] %v3173_v46  ;;  %v3176_v24 = vsel %vm325_vm8, 1.0, %v6336_v54  ;;  %vm321_vm10 = vcmp.ne.f32.partialorder %v3116_v52, %v313_v38  ;;  %v348_v48 = vrot.slane %v3173_v46, 7  ;;  %v3185_v57 = vsel %vm322_vm9, 1.0, %v6336_v54 }
  0xd5   : > { %6554 = vst [vmem:[#allocation18_spill] sm:$0xff] %v3176_v24  ;;  %6555 = vst [vmem:[#allocation19_spill] sm:$0xff] %v3179_v47  ;;  %v349_v56 = vrot.slane %v3176_v24, 7  ;;  %v2386_v39 = vpack.i.bf16 %v3169_v55, %v3173_v46  ;;  %v2381_v58 = vpack.i.bf16 %v3185_v57, %v3179_v47  ;;  %v3192_v59 = vsel %vm327_vm6, 1.0, %v6336_v54 }
  0xd6   : > { %6556 = vst [vmem:[#allocation20_spill] sm:$0xff] %v3185_v57  ;;  %6557 = vst [vmem:[#allocation21_spill] sm:$0xff] %v3192_v59  ;;  %vm323_vm11 = vcmp.ne.f32.partialorder %v3108_v45, %v315_v53  ;;  %v364_v52 = vrot.slane %v3173_v46, 1  ;;  %v365_v60 = vrot.slane %v3176_v24, 1  ;;  %v3198_v61 = vsel %vm321_vm10, 1.0, %v6336_v54 }
  0xd7   : > { %6558 = vst [vmem:[#allocation22_spill] sm:$0xff] %v3198_v61  ;;  %v3201_v62 = vsel %vm323_vm11, 1.0, %v6336_v54  ;;  %2387 = vrot.lane.b32.xlu1 %v2386_v39, %s2837_s30  ;;  %2382 = vrot.lane.b32.xlu0 %v2381_v58, %s2837_s30  ;;  %v2396_v63 = vpack.i.bf16 %v3192_v59, %v3176_v24  ;;  %v351_v12 = vrot.slane %v3192_v59, 7  ;;  %v361_v13 = vrot.slane %v3198_v61, 1 }
  0xd8   : > { %6559 = vst [vmem:[#allocation23_spill] sm:$0xff] %v3201_v62  ;;  %v2391_v45 = vpack.i.bf16 %v3201_v62, %v3198_v61  ;;  %v347_v8 = vrot.slane %v3201_v62, 7  ;;  %v367_v14 = vrot.slane %v3192_v59, 1  ;;  %v346_v16 = vrot.slane %v3185_v57, 7 }
  0xd9   : > { %v350_v25 = vrot.slane %v3169_v55, 7  ;;  %v360_v18 = vrot.slane %v3179_v47, 1  ;;  %v353_v17 = vsel %vm6506_vm0, %v349_v56, %v351_v12  ;;  %v366_v3 = vrot.slane %v3169_v55, 1 }
  0xda   : > { %v355_v15 = vsel %vm6506_vm0, %v347_v8, %v349_v56  ;;  %v369_v26 = vsel %vm6457_vm1, %v365_v60, %v367_v14  ;;  %v375_v27 = vsel %vm6457_vm1, %v367_v14, %v361_v13  ;;  %v344_v1 = vrot.slane %v3179_v47, 7 }
  0xdb   : > { %2397 = vrot.lane.b32.xlu1 %v2396_v63, %s2837_s30  ;;  %2392 = vrot.lane.b32.xlu0 %v2391_v45, %s2837_s30  ;;  %v381_v32 = vmax.f32 %v355_v15, %v369_v26  ;;  %v383_v21 = vmax.f32 %v353_v17, %v375_v27  ;;  %v352_v20 = vsel %vm6506_vm0, %v348_v48, %v350_v25  ;;  %v345_v29 = vrot.slane %v3198_v61, 7 }
  0xdc   : > { %v354_v28 = vsel %vm6506_vm0, %v346_v16, %v348_v48  ;;  %v368_v19 = vsel %vm6457_vm1, %v364_v52, %v366_v3  ;;  %v374_v22 = vsel %vm6457_vm1, %v366_v3, %v360_v18  ;;  %v358_v2 = vsel %vm6506_vm0, %v350_v25, %v344_v1 }
  0xdd   : > { %v3238_v30 = vmax.f32 %v3176_v24, %v381_v32  ;;  %v3241_v31 = vmax.f32 %v3192_v59, %v383_v21  ;;  %v380_v23 = vmax.f32 %v354_v28, %v368_v19  ;;  %v382_v10 = vmax.f32 %v352_v20, %v374_v22 }
  0xde   : > { %v357_v4 = vsel %vm6506_vm0, %v345_v29, %v347_v8  ;;  %v359_v5 = vsel %vm6506_vm0, %v351_v12, %v345_v29  ;;  %v363_v6 = vrot.slane %v3201_v62, 1  ;;  %v356_v34 = vsel %vm6506_vm0, %v344_v1, %v346_v16 }
  0xdf   : > { %2407 = vrot.lane.b32.xlu1 %v2386_v39, %s2838_s26  ;;  %2402 = vrot.lane.b32.xlu0 %v2381_v58, %s2838_s26  ;;  %v3253_v9 = vmax.f32 %v3173_v46, %v380_v23  ;;  %v3256_v33 = vmax.f32 %v3169_v55, %v382_v10  ;;  %v362_v0 = vrot.slane %v3185_v57, 1 }
  0xe0   : > { %v371_v35 = vsel %vm6457_vm1, %v363_v6, %v365_v60  ;;  %v373_v36 = vsel %vm6457_vm1, %v361_v13, %v363_v6 }
  0xe1   : > { %v377_v37 = vmax.f32 %v359_v5, %v373_v36  ;;  %v379_v38 = vmax.f32 %v357_v4, %v371_v35  ;;  %v370_v43 = vsel %vm6457_vm1, %v362_v0, %v364_v52  ;;  %v372_v44 = vsel %vm6457_vm1, %v360_v18, %v362_v0 }
  0xe2   : > { %v376_v41 = vmax.f32 %v358_v2, %v372_v44  ;;  %v378_v42 = vmax.f32 %v356_v34, %v370_v43 }
  0xe3   : > { %2417 = vrot.lane.b32.xlu1 %v2396_v63, %s2838_s26  ;;  %2412 = vrot.lane.b32.xlu0 %v2391_v45, %s2838_s26  ;;  %v385_v49 = vmax.f32 %v3198_v61, %v377_v37  ;;  %v387_v50 = vmax.f32 %v3201_v62, %v379_v38 }
  0xe4   : > { %v384_v7 = vmax.f32 %v3179_v47, %v376_v41  ;;  %v386_v51 = vmax.f32 %v3185_v57, %v378_v42 }
 0x149   : > { %v2388_v53 = vpop.permute.xlu1 %2387  ;;  %v2383_v48 = vpop.permute.xlu0 %2382 }
 0x14a   : > { %v2390_v13 = vunpack.i.h.bf16 %v2388_v53  ;;  %v2389_v45 = vunpack.i.l.bf16 %v2388_v53  ;;  %v2385_v14 = vunpack.i.h.bf16 %v2383_v48  ;;  %v2384_v15 = vunpack.i.l.bf16 %v2383_v48 }
 0x14d   : > { %v2398_v56 = vpop.permute.xlu1 %2397  ;;  %v2393_v39 = vpop.permute.xlu0 %2392 }
 0x14e   : > { %v2400_v58 = vunpack.i.h.bf16 %v2398_v56  ;;  %v2399_v52 = vunpack.i.l.bf16 %v2398_v56  ;;  %v2395_v60 = vunpack.i.h.bf16 %v2393_v39  ;;  %v2394_v8 = vunpack.i.l.bf16 %v2393_v39 }
 0x150   : > { %v410_v16 = vsel %vm6455_vm2, %v2389_v45, %v2399_v52  ;;  %v411_v25 = vsel %vm6455_vm2, %v2390_v13, %v2400_v58  ;;  %v414_v18 = vsel %vm6455_vm2, %v2399_v52, %v2389_v45  ;;  %v415_v17 = vsel %vm6455_vm2, %v2400_v58, %v2390_v13 }
 0x151   : > { %v2408_v12 = vpop.permute.xlu1 %2407  ;;  %v2403_v63 = vpop.permute.xlu0 %2402  ;;  %v408_v26 = vsel %vm6455_vm2, %v2384_v15, %v2394_v8  ;;  %v409_v27 = vsel %vm6455_vm2, %v2385_v14, %v2395_v60  ;;  %v412_v29 = vsel %vm6455_vm2, %v2394_v8, %v2384_v15  ;;  %v413_v23 = vsel %vm6455_vm2, %v2395_v60, %v2385_v14 }
 0x152   : > { %v2410_v3 = vunpack.i.h.bf16 %v2408_v12  ;;  %v2409_v32 = vunpack.i.l.bf16 %v2408_v12  ;;  %v2405_v10 = vunpack.i.h.bf16 %v2403_v63  ;;  %v2404_v4 = vunpack.i.l.bf16 %v2403_v63 }
 0x155   : > { %v2418_v21 = vpop.permute.xlu1 %2417  ;;  %v2413_v20 = vpop.permute.xlu0 %2412 }
 0x156   : > { %v2420_v1 = vunpack.i.h.bf16 %v2418_v21  ;;  %v2419_v28 = vunpack.i.l.bf16 %v2418_v21  ;;  %v2415_v19 = vunpack.i.h.bf16 %v2413_v20  ;;  %v2414_v22 = vunpack.i.l.bf16 %v2413_v20 }
 0x158   : > { %v434_v2 = vsel %vm6454_vm3, %v2409_v32, %v2419_v28  ;;  %v435_v5 = vsel %vm6454_vm3, %v2410_v3, %v2420_v1  ;;  %v438_v6 = vsel %vm6454_vm3, %v2419_v28, %v2409_v32  ;;  %v439_v34 = vsel %vm6454_vm3, %v2420_v1, %v2410_v3 }
 0x159   : > { %v444_v0 = vmax.f32 %v414_v18, %v434_v2  ;;  %v445_v35 = vmax.f32 %v410_v16, %v438_v6  ;;  %v446_v36 = vmax.f32 %v415_v17, %v435_v5  ;;  %v447_v37 = vmax.f32 %v411_v25, %v439_v34 }
 0x15a   : > { %v432_v38 = vsel %vm6454_vm3, %v2404_v4, %v2414_v22  ;;  %v433_v43 = vsel %vm6454_vm3, %v2405_v10, %v2415_v19  ;;  %v436_v44 = vsel %vm6454_vm3, %v2414_v22, %v2404_v4  ;;  %v437_v41 = vsel %vm6454_vm3, %v2415_v19, %v2405_v10 }
 0x15b   : > { %v3308_v42 = vmax.f32 %v3253_v9, %v444_v0  ;;  %v3311_v53 = vmax.f32 %v3238_v30, %v445_v35  ;;  %v3314_v48 = vmax.f32 %v3256_v33, %v446_v36  ;;  %v3317_v56 = vmax.f32 %v3241_v31, %v447_v37 }
 0x15c   : > { %v440_v39 = vmax.f32 %v412_v29, %v432_v38  ;;  %v441_v58 = vmax.f32 %v408_v26, %v436_v44  ;;  %v442_v52 = vmax.f32 %v413_v23, %v433_v43  ;;  %v443_v60 = vmax.f32 %v409_v27, %v437_v41 }
 0x15d   : > { %6560 = vst [vmem:[#allocation24_spill] sm:$0xff] %v3308_v42  ;;  %6561 = vst [vmem:[#allocation25_spill] sm:$0xff] %v3311_v53  ;;  %v2426_v8 = vpack.i.bf16 %v3314_v48, %v3308_v42  ;;  %v2436_v9 = vpack.i.bf16 %v3317_v56, %v3311_v53  ;;  %v462_v31 = vrot.slane %v3314_v48, 7  ;;  %v463_v13 = vrot.slane %v3317_v56, 7 }
 0x15e   : > { %6562 = vst [vmem:[#allocation26_spill] sm:$0xff] %v3314_v48  ;;  %6563 = vst [vmem:[#allocation27_spill] sm:$0xff] %v3317_v56  ;;  %v3323_v12 = vmax.f32 %v384_v7, %v440_v39  ;;  %v3325_v30 = vmax.f32 %v385_v49, %v441_v58  ;;  %v3327_v63 = vmax.f32 %v386_v51, %v442_v52  ;;  %v477_v45 = vrot.slane %v3311_v53, 1 }
 0x15f   : > { %v3329_v33 = vmax.f32 %v387_v50, %v443_v60  ;;  %2427 = vrot.lane.b32.xlu1 %v2426_v8, %s2837_s30  ;;  %v476_v14 = vrot.slane %v3308_v42, 1  ;;  %v461_v21 = vrot.slane %v3311_v53, 7  ;;  %v478_v6 = vrot.slane %v3314_v48, 1 }
 0x160   : > { %6564 = vst [vmem:[#allocation28_spill] sm:$0xff] %v3323_v12  ;;  %6565 = vst [vmem:[#allocation29_spill] sm:$0xff] %v3325_v30  ;;  %v2421_v7 = vpack.i.bf16 %v3327_v63, %v3323_v12  ;;  %v456_v51 = vrot.slane %v3323_v12, 7  ;;  %v457_v50 = vrot.slane %v3325_v30, 7  ;;  %v472_v16 = vrot.slane %v3323_v12, 1 }
 0x161   : > { %6566 = vst [vmem:[#allocation30_spill] sm:$0xff] %v3327_v63  ;;  %6567 = vst [vmem:[#allocation31_spill] sm:$0xff] %v3329_v33  ;;  %v2431_v49 = vpack.i.bf16 %v3329_v33, %v3325_v30  ;;  %v459_v15 = vrot.slane %v3329_v33, 7  ;;  %v473_v25 = vrot.slane %v3325_v30, 1  ;;  %v475_v18 = vrot.slane %v3329_v33, 1 }
 0x162   : > { %2422 = vrot.lane.b32.xlu0 %v2421_v7, %s2837_s30  ;;  %v458_v17 = vrot.slane %v3327_v63, 7  ;;  %v474_v26 = vrot.slane %v3327_v63, 1  ;;  %v470_v3 = vsel %vm6506_vm0, %v462_v31, %v456_v51  ;;  %v471_v32 = vsel %vm6506_vm0, %v463_v13, %v457_v50 }
 0x163   : > { %2437 = vrot.lane.b32.xlu1 %v2436_v9, %s2837_s30  ;;  %v469_v27 = vsel %vm6506_vm0, %v457_v50, %v459_v15  ;;  %v483_v20 = vsel %vm6457_vm1, %v475_v18, %v477_v45  ;;  %v485_v1 = vsel %vm6457_vm1, %v473_v25, %v475_v18  ;;  %v465_v2 = vsel %vm6506_vm0, %v461_v21, %v463_v13 }
 0x164   : > { %v468_v28 = vsel %vm6506_vm0, %v456_v51, %v458_v17  ;;  %v482_v19 = vsel %vm6457_vm1, %v474_v26, %v476_v14  ;;  %v489_v22 = vmax.f32 %v471_v32, %v485_v1  ;;  %v491_v29 = vmax.f32 %v469_v27, %v483_v20 }
 0x165   : > { %v484_v23 = vsel %vm6457_vm1, %v472_v16, %v474_v26  ;;  %v490_v10 = vmax.f32 %v468_v28, %v482_v19  ;;  %v467_v5 = vsel %vm6506_vm0, %v459_v15, %v461_v21  ;;  %v479_v36 = vrot.slane %v3317_v56, 1 }
 0x166   : > { %2432 = vrot.lane.b32.xlu0 %v2431_v49, %s2837_s30  ;;  %v488_v4 = vmax.f32 %v470_v3, %v484_v23  ;;  %v3375_v34 = vmax.f32 %v3325_v30, %v489_v22  ;;  %v3378_v0 = vmax.f32 %v3329_v33, %v491_v29  ;;  %v486_v38 = vsel %vm6457_vm1, %v478_v6, %v472_v16 }
 0x167   : > { %2447 = vrot.lane.b32.xlu1 %v2426_v8, %s2838_s26  ;;  %v3381_v35 = vmax.f32 %v3327_v63, %v490_v10  ;;  %v460_v43 = vrot.slane %v3308_v42, 7  ;;  %v480_v44 = vsel %vm6457_vm1, %v476_v14, %v478_v6  ;;  %v481_v41 = vsel %vm6457_vm1, %v477_v45, %v479_v36 }
 0x168   : > { %v3385_v37 = vmax.f32 %v3323_v12, %v488_v4  ;;  %v487_v39 = vsel %vm6457_vm1, %v479_v36, %v473_v25  ;;  %v493_v58 = vmax.f32 %v467_v5, %v481_v41 }
 0x169   : > { %v495_v52 = vmax.f32 %v465_v2, %v487_v39  ;;  %v464_v60 = vsel %vm6506_vm0, %v460_v43, %v462_v31  ;;  %v466_v8 = vsel %vm6506_vm0, %v458_v17, %v460_v43 }
 0x16a   : > { %2442 = vrot.lane.b32.xlu0 %v2421_v7, %s2838_s26  ;;  %v492_v13 = vmax.f32 %v466_v8, %v480_v44  ;;  %v494_v14 = vmax.f32 %v464_v60, %v486_v38  ;;  %v501_v51 = vmax.f32 %v3311_v53, %v493_v58 }
 0x16b   : > { %2457 = vrot.lane.b32.xlu1 %v2436_v9, %s2838_s26  ;;  %v503_v45 = vmax.f32 %v3317_v56, %v495_v52 }
 0x16c   : > { %v500_v50 = vmax.f32 %v3308_v42, %v492_v13  ;;  %v502_v7 = vmax.f32 %v3314_v48, %v494_v14 }
 0x16e   : > { %2452 = vrot.lane.b32.xlu0 %v2431_v49, %s2838_s26 }
 0x1d1   : > { %v2428_v15 = vpop.permute.xlu1 %2427 }
 0x1d2   : > { %v2430_v9 = vunpack.i.h.bf16 %v2428_v15  ;;  %v2429_v27 = vunpack.i.l.bf16 %v2428_v15 }
 0x1d4   : > { %v2423_v16 = vpop.permute.xlu0 %2422 }
 0x1d5   : > { %v2438_v31 = vpop.permute.xlu1 %2437  ;;  %v2425_v21 = vunpack.i.h.bf16 %v2423_v16  ;;  %v2424_v20 = vunpack.i.l.bf16 %v2423_v16 }
 0x1d6   : > { %v2440_v18 = vunpack.i.h.bf16 %v2438_v31  ;;  %v2439_v17 = vunpack.i.l.bf16 %v2438_v31 }
 0x1d8   : > { %v2433_v25 = vpop.permute.xlu0 %2432  ;;  %v522_v28 = vsel %vm6455_vm2, %v2429_v27, %v2439_v17  ;;  %v523_v49 = vsel %vm6455_vm2, %v2430_v9, %v2440_v18  ;;  %v526_v19 = vsel %vm6455_vm2, %v2439_v17, %v2429_v27  ;;  %v527_v22 = vsel %vm6455_vm2, %v2440_v18, %v2430_v9 }
 0x1d9   : > { %v2448_v26 = vpop.permute.xlu1 %2447  ;;  %v2435_v3 = vunpack.i.h.bf16 %v2433_v25  ;;  %v2434_v32 = vunpack.i.l.bf16 %v2433_v25 }
 0x1da   : > { %v2450_v23 = vunpack.i.h.bf16 %v2448_v26  ;;  %v2449_v10 = vunpack.i.l.bf16 %v2448_v26 }
 0x1db   : > { %v520_v5 = vsel %vm6455_vm2, %v2424_v20, %v2434_v32  ;;  %v521_v6 = vsel %vm6455_vm2, %v2425_v21, %v2435_v3  ;;  %v524_v14 = vsel %vm6455_vm2, %v2434_v32, %v2424_v20  ;;  %v525_v15 = vsel %vm6455_vm2, %v2435_v3, %v2425_v21 }
 0x1dc   : > { %v2443_v1 = vpop.permute.xlu0 %2442 }
 0x1dd   : > { %v2458_v29 = vpop.permute.xlu1 %2457  ;;  %v2445_v36 = vunpack.i.h.bf16 %v2443_v1  ;;  %v2444_v38 = vunpack.i.l.bf16 %v2443_v1 }
 0x1de   : > { %v2460_v4 = vunpack.i.h.bf16 %v2458_v29  ;;  %v2459_v2 = vunpack.i.l.bf16 %v2458_v29 }
 0x1e0   : > { %v2453_v43 = vpop.permute.xlu0 %2452  ;;  %v546_v44 = vsel %vm6454_vm3, %v2449_v10, %v2459_v2  ;;  %v547_v41 = vsel %vm6454_vm3, %v2450_v23, %v2460_v4  ;;  %v550_v39 = vsel %vm6454_vm3, %v2459_v2, %v2449_v10  ;;  %v551_v58 = vsel %vm6454_vm3, %v2460_v4, %v2450_v23 }
 0x1e1   : > { %v2455_v52 = vunpack.i.h.bf16 %v2453_v43  ;;  %v2454_v60 = vunpack.i.l.bf16 %v2453_v43  ;;  %v556_v8 = vmax.f32 %v526_v19, %v546_v44  ;;  %v557_v13 = vmax.f32 %v522_v28, %v550_v39 }
 0x1e2   : > { %v558_v16 = vmax.f32 %v527_v22, %v547_v41  ;;  %v559_v31 = vmax.f32 %v523_v49, %v551_v58 }
 0x1e3   : > { %v544_v25 = vsel %vm6454_vm3, %v2444_v38, %v2454_v60  ;;  %v545_v18 = vsel %vm6454_vm3, %v2445_v36, %v2455_v52  ;;  %v548_v17 = vsel %vm6454_vm3, %v2454_v60, %v2444_v38  ;;  %v549_v26 = vsel %vm6454_vm3, %v2455_v52, %v2445_v36 }
 0x1e4   : > { %v552_v9 = vmax.f32 %v524_v14, %v544_v25  ;;  %v553_v27 = vmax.f32 %v520_v5, %v548_v17  ;;  %v554_v32 = vmax.f32 %v525_v15, %v545_v18  ;;  %v555_v20 = vmax.f32 %v521_v6, %v549_v26 }
 0x1e5   : > { %v3439_v1 = vmax.f32 %v500_v50, %v556_v8  ;;  %v3441_v3 = vmax.f32 %v501_v51, %v557_v13  ;;  %v3443_v21 = vmax.f32 %v502_v7, %v558_v16  ;;  %v3445_v28 = vmax.f32 %v503_v45, %v559_v31 }
 0x1e6   : > { %v3448_v49 = vmax.f32 %v3385_v37, %v552_v9  ;;  %v3451_v19 = vmax.f32 %v3375_v34, %v553_v27  ;;  %v3454_v22 = vmax.f32 %v3381_v35, %v554_v32  ;;  %v3457_v29 = vmax.f32 %v3378_v0, %v555_v20 }
 0x1e7   : > { %6568 = vst [vmem:[#allocation32_spill] sm:$0xff] %v3439_v1  ;;  %6569 = vst [vmem:[#allocation33_spill] sm:$0xff] %v3441_v3  ;;  %v2466_v51 = vpack.i.bf16 %v3443_v21, %v3439_v1  ;;  %v2476_v50 = vpack.i.bf16 %v3445_v28, %v3441_v3  ;;  %v574_v7 = vrot.slane %v3443_v21, 7  ;;  %v588_v10 = vrot.slane %v3439_v1, 1 }
 0x1e8   : > { %6570 = vst [vmem:[#allocation34_spill] sm:$0xff] %v3443_v21  ;;  %6571 = vst [vmem:[#allocation35_spill] sm:$0xff] %v3445_v28  ;;  %v2461_v45 = vpack.i.bf16 %v3454_v22, %v3448_v49  ;;  %v2471_v37 = vpack.i.bf16 %v3457_v29, %v3451_v19  ;;  %v568_v34 = vrot.slane %v3448_v49, 7  ;;  %v584_v35 = vrot.slane %v3448_v49, 1 }
 0x1e9   : > { %6572 = vst [vmem:[#allocation36_spill] sm:$0xff] %v3448_v49  ;;  %6573 = vst [vmem:[#allocation37_spill] sm:$0xff] %v3451_v19  ;;  %2467 = vrot.lane.b32.xlu1 %v2466_v51, %s2837_s30  ;;  %v570_v0 = vrot.slane %v3454_v22, 7  ;;  %v586_v23 = vrot.slane %v3454_v22, 1  ;;  %v572_v4 = vrot.slane %v3439_v1, 7  ;;  %v590_v2 = vrot.slane %v3443_v21, 1 }
 0x1ea   : > { %6574 = vst [vmem:[#allocation38_spill] sm:$0xff] %v3454_v22  ;;  %6575 = vst [vmem:[#allocation39_spill] sm:$0xff] %v3457_v29  ;;  %2462 = vrot.lane.b32.xlu0 %v2461_v45, %s2837_s30  ;;  %v582_v6 = vsel %vm6506_vm0, %v574_v7, %v568_v34  ;;  %v569_v36 = vrot.slane %v3451_v19, 7  ;;  %v571_v38 = vrot.slane %v3457_v29, 7  ;;  %v575_v15 = vrot.slane %v3445_v28, 7 }
 0x1eb   : > { %v580_v5 = vsel %vm6506_vm0, %v568_v34, %v570_v0  ;;  %v594_v43 = vsel %vm6457_vm1, %v586_v23, %v588_v10  ;;  %v596_v44 = vsel %vm6457_vm1, %v584_v35, %v586_v23  ;;  %v578_v41 = vsel %vm6506_vm0, %v570_v0, %v572_v4 }
 0x1ec   : > { %v576_v39 = vsel %vm6506_vm0, %v572_v4, %v574_v7  ;;  %v600_v58 = vmax.f32 %v582_v6, %v596_v44  ;;  %v602_v52 = vmax.f32 %v580_v5, %v594_v43  ;;  %v592_v60 = vsel %vm6457_vm1, %v588_v10, %v590_v2 }
 0x1ed   : > { %2477 = vrot.lane.b32.xlu1 %v2476_v50, %s2837_s30  ;;  %v598_v8 = vsel %vm6457_vm1, %v590_v2, %v584_v35  ;;  %v604_v13 = vmax.f32 %v578_v41, %v592_v60  ;;  %v581_v16 = vsel %vm6506_vm0, %v569_v36, %v571_v38  ;;  %v585_v18 = vrot.slane %v3451_v19, 1 }
 0x1ee   : > { %2472 = vrot.lane.b32.xlu0 %v2471_v37, %s2837_s30  ;;  %v606_v14 = vmax.f32 %v576_v39, %v598_v8  ;;  %v3501_v31 = vmax.f32 %v3448_v49, %v600_v58  ;;  %v3504_v25 = vmax.f32 %v3454_v22, %v602_v52  ;;  %v587_v17 = vrot.slane %v3457_v29, 1 }
 0x1ef   : > { %v3509_v26 = vmax.f32 %v3439_v1, %v604_v13  ;;  %v583_v27 = vsel %vm6506_vm0, %v575_v15, %v569_v36  ;;  %v589_v32 = vrot.slane %v3441_v3, 1  ;;  %v573_v34 = vrot.slane %v3441_v3, 7 }
 0x1f0   : > { %v3512_v9 = vmax.f32 %v3443_v21, %v606_v14  ;;  %v597_v20 = vsel %vm6457_vm1, %v585_v18, %v587_v17  ;;  %v591_v35 = vrot.slane %v3445_v28, 1  ;;  %vm6342_vm8 = vcmp.eq.f32.partialorder %v3448_v49, 0.0 }
 0x1f1   : > { %2487 = vrot.lane.b32.xlu1 %v2466_v51, %s2838_s26  ;;  %v595_v0 = vsel %vm6457_vm1, %v587_v17, %v589_v32  ;;  %v601_v7 = vmax.f32 %v583_v27, %v597_v20  ;;  %v577_v10 = vsel %vm6506_vm0, %v573_v34, %v575_v15  ;;  %v579_v51 = vsel %vm6506_vm0, %v571_v38, %v573_v34 }
 0x1f2   : > { %2482 = vrot.lane.b32.xlu0 %v2461_v45, %s2838_s26  ;;  %v603_v23 = vmax.f32 %v581_v16, %v595_v0  ;;  %v593_v4 = vsel %vm6457_vm1, %v589_v32, %v591_v35  ;;  %v599_v5 = vsel %vm6457_vm1, %v591_v35, %v585_v18  ;;  %vm6408_vm9 = vcmp.eq.f32.partialorder %v3454_v22, 0.0 }
 0x1f3   : > { %v609_v2 = vmax.f32 %v3451_v19, %v601_v7  ;;  %v605_v45 = vmax.f32 %v579_v51, %v593_v4  ;;  %v607_v36 = vmax.f32 %v577_v10, %v599_v5  ;;  %vm6396_vm10 = vcmp.eq.f32.partialorder %v3439_v1, 0.0 }
 0x1f4   : > { %v611_v6 = vmax.f32 %v3457_v29, %v603_v23  ;;  %vm6400_vm11 = vcmp.eq.f32.partialorder %v3443_v21, 0.0  ;;  %v120_v22 = vadd.s32 24, %v2983_v11 }
 0x1f5   : > { %2497 = vrot.lane.b32.xlu1 %v2476_v50, %s2838_s26  ;;  %v613_v43 = vmax.f32 %v3441_v3, %v605_v45  ;;  %v615_v38 = vmax.f32 %v3445_v28, %v607_v36 }
 0x1f6   : > { %2492 = vrot.lane.b32.xlu0 %v2471_v37, %s2838_s26 }
 0x25b   : > { %v2468_v44 = vpop.permute.xlu1 %2467 }
 0x25c   : > { %v2463_v41 = vpop.permute.xlu0 %2462  ;;  %v2470_v15 = vunpack.i.h.bf16 %v2468_v44  ;;  %v2469_v50 = vunpack.i.l.bf16 %v2468_v44 }
 0x25d   : > { %v2465_v18 = vunpack.i.h.bf16 %v2463_v41  ;;  %v2464_v17 = vunpack.i.l.bf16 %v2463_v41 }
 0x25f   : > { %v2478_v39 = vpop.permute.xlu1 %2477 }
 0x260   : > { %v2473_v58 = vpop.permute.xlu0 %2472  ;;  %v2480_v52 = vunpack.i.h.bf16 %v2478_v39  ;;  %v2479_v60 = vunpack.i.l.bf16 %v2478_v39 }
 0x261   : > { %v2475_v8 = vunpack.i.h.bf16 %v2473_v58  ;;  %v2474_v13 = vunpack.i.l.bf16 %v2473_v58 }
 0x262   : > { %v634_v37 = vsel %vm6455_vm2, %v2469_v50, %v2479_v60  ;;  %v635_v27 = vsel %vm6455_vm2, %v2470_v15, %v2480_v52  ;;  %v638_v32 = vsel %vm6455_vm2, %v2479_v60, %v2469_v50  ;;  %v639_v20 = vsel %vm6455_vm2, %v2480_v52, %v2470_v15 }
 0x263   : > { %v2488_v14 = vpop.permute.xlu1 %2487  ;;  %v632_v34 = vsel %vm6455_vm2, %v2464_v17, %v2474_v13  ;;  %v633_v35 = vsel %vm6455_vm2, %v2465_v18, %v2475_v8  ;;  %v636_v0 = vsel %vm6455_vm2, %v2474_v13, %v2464_v17  ;;  %v637_v7 = vsel %vm6455_vm2, %v2475_v8, %v2465_v18 }
 0x264   : > { %v2483_v16 = vpop.permute.xlu0 %2482  ;;  %v2490_v10 = vunpack.i.h.bf16 %v2488_v14  ;;  %v2489_v51 = vunpack.i.l.bf16 %v2488_v14 }
 0x265   : > { %v2485_v36 = vunpack.i.h.bf16 %v2483_v16  ;;  %v2484_v44 = vunpack.i.l.bf16 %v2483_v16 }
 0x267   : > { %v2498_v23 = vpop.permute.xlu1 %2497 }
 0x268   : > { %v2493_v4 = vpop.permute.xlu0 %2492  ;;  %v2500_v5 = vunpack.i.h.bf16 %v2498_v23  ;;  %v2499_v45 = vunpack.i.l.bf16 %v2498_v23 }
 0x269   : > { %v2495_v41 = vunpack.i.h.bf16 %v2493_v4  ;;  %v2494_v39 = vunpack.i.l.bf16 %v2493_v4 }
 0x26a   : > { %v658_v58 = vsel %vm6454_vm3, %v2489_v51, %v2499_v45  ;;  %v659_v52 = vsel %vm6454_vm3, %v2490_v10, %v2500_v5  ;;  %v662_v60 = vsel %vm6454_vm3, %v2499_v45, %v2489_v51  ;;  %v663_v8 = vsel %vm6454_vm3, %v2500_v5, %v2490_v10 }
 0x26b   : > { %v656_v13 = vsel %vm6454_vm3, %v2484_v44, %v2494_v39  ;;  %v657_v14 = vsel %vm6454_vm3, %v2485_v36, %v2495_v41  ;;  %v660_v15 = vsel %vm6454_vm3, %v2494_v39, %v2484_v44  ;;  %v661_v50 = vsel %vm6454_vm3, %v2495_v41, %v2485_v36  ;;  %v3654_v41 = vld [vmem:[#allocation2] sm:$0xff]  ;;  %v3657_v39 = vld [vmem:[#allocation2 + $0x10] sm:$0xff] }
 0x26c   : > { %v664_v16 = vmax.f32 %v636_v0, %v656_v13  ;;  %v665_v18 = vmax.f32 %v632_v34, %v660_v15  ;;  %v666_v17 = vmax.f32 %v637_v7, %v657_v14  ;;  %v667_v23 = vmax.f32 %v633_v35, %v661_v50  ;;  %6584 = vst [vmem:[#allocation47_spill] sm:$0xff] %v3654_v41  ;;  %v3689_v15 = vld [vmem:[#allocation2 + $0x8] sm:$0xff]  ;;  %v3693_v50 = vld [vmem:[#allocation2 + $0x18] sm:$0xff] }
 0x26d   : > { %v668_v51 = vmax.f32 %v638_v32, %v658_v58  ;;  %v669_v4 = vmax.f32 %v634_v37, %v662_v60  ;;  %v670_v45 = vmax.f32 %v639_v20, %v659_v52  ;;  %v671_v10 = vmax.f32 %v635_v27, %v663_v8  ;;  %6585 = vst [vmem:[#allocation48_spill] sm:$0xff] %v3657_v39  ;;  %v3671_v60 = vld [vmem:[#allocation2 + $0x20] sm:$0xff]  ;;  %v3675_v8 = vld [vmem:[#allocation2 + $0x30] sm:$0xff] }
 0x26e   : > { %v3572_v5 = vmax.f32 %v3501_v31, %v664_v16  ;;  %v3575_v54 = vmax.f32 %v3504_v25, %v666_v17  ;;  %v3577_v62 = vmax.f32 %v609_v2, %v665_v18  ;;  %v3579_v44 = vmax.f32 %v611_v6, %v667_v23  ;;  %6586 = vst [vmem:[#allocation49_spill] sm:$0xff] %v3671_v60  ;;  %v3707_v17 = vld [vmem:[#allocation2 + $0x28] sm:$0xff]  ;;  %v3711_v23 = vld [vmem:[#allocation2 + $0x38] sm:$0xff] }
 0x26f   : > { %v3582_v36 = vmax.f32 %v3509_v26, %v668_v51  ;;  %v3585_v34 = vmax.f32 %v3512_v9, %v670_v45  ;;  %v3587_v32 = vmax.f32 %v613_v43, %v669_v4  ;;  %v3589_v37 = vmax.f32 %v615_v38, %v671_v10  ;;  %6587 = vst [vmem:[#allocation50_spill] sm:$0xff] %v3675_v8 }
 0x270   : > { %6576 = vst [vmem:[#allocation40_spill] sm:$0xff] %v3572_v5  ;;  %6577 = vst [vmem:[#allocation41_spill] sm:$0xff] %v3575_v54  ;;  %vm6343_vm12 = vcmp.eq.f32.partialorder %v3572_v5, 0.0  ;;  %vm6414_vm13 = vcmp.eq.f32.partialorder %v3575_v54, 0.0  ;;  %vm6428_vm14 = vcmp.eq.f32.partialorder %v3577_v62, 0.0  ;;  %vm6440_vm15 = vcmp.eq.f32.partialorder %v3579_v44, 0.0 }
 0x271   : > { %6578 = vst [vmem:[#allocation42_spill] sm:$0xff] %v3577_v62  ;;  %6579 = vst [vmem:[#allocation43_spill] sm:$0xff] %v3582_v36  ;;  %vm6340_vm4 = vcmp.eq.f32.partialorder %v3582_v36, 0.0  ;;  %vm6341_vm5 = vcmp.eq.f32.partialorder %v3585_v34, 0.0  ;;  %v6583_v31 = vmov 0.0   ;;  %vm6420_vm6 = vcmp.eq.f32.partialorder %v3587_v32, 0.0 }
 0x272   : > { %6580 = vst [vmem:[#allocation44_spill] sm:$0xff] %v3585_v34  ;;  %6581 = vst [vmem:[#allocation45_spill] sm:$0xff] %v3587_v32  ;;  %v3600_v25 = vsel %vm6343_vm12, 1.0, %v6583_v31  ;;  %v3605_v26 = vsel %vm6414_vm13, 1.0, %v6583_v31  ;;  %v3612_v2 = vsel %vm6340_vm4, 1.0, %v6583_v31  ;;  %v3617_v6 = vsel %vm6341_vm5, 1.0, %v6583_v31 }
 0x273   : > { %6582 = vst [vmem:[#allocation46_spill] sm:$0xff] %v3589_v37  ;;  %v2501_v9 = vpack.i.bf16 %v3605_v26, %v3600_v25  ;;  %v3622_v43 = vsel %vm6428_vm14, 1.0, %v6583_v31  ;;  %v2506_v38 = vpack.i.bf16 %v3617_v6, %v3612_v2  ;;  %v3629_v27 = vsel %vm6440_vm15, 1.0, %v6583_v31  ;;  %6589 = vst [vmem:[#allocation52_spill] sm:$0xff] %v3689_v15 }
 0x274   : > { %vm6426_vm7 = vcmp.eq.f32.partialorder %v3589_v37, 0.0  ;;  %v3637_v20 = vsel %vm6420_vm6, 1.0, %v6583_v31  ;;  %v2511_v0 = vpack.i.bf16 %v3629_v27, %v3622_v43  ;;  %v3662_v58 = vsel %vm6343_vm12, %v3654_v41, 0.0  ;;  %6590 = vst [vmem:[#allocation53_spill] sm:$0xff] %v3707_v17  ;;  %6591 = vst [vmem:[#allocation54_spill] sm:$0xff] %v3711_v23 }
 0x275   : > { %2502 = vrot.lane.b32.xlu0 %v2501_v9, %s2837_s30  ;;  %v3642_v35 = vsel %vm6426_vm7, 1.0, %v6583_v31  ;;  %2507 = vrot.lane.b32.xlu1 %v2506_v38, %s2837_s30  ;;  %v3667_v52 = vsel %vm6414_vm13, %v3657_v39, 0.0  ;;  %v3680_v13 = vsel %vm6340_vm4, %v3671_v60, 0.0  ;;  %v3685_v14 = vsel %vm6341_vm5, %v3675_v8, 0.0 }
 0x276   : > { %v2516_v7 = vpack.i.bf16 %v3642_v35, %v3637_v20  ;;  %6588 = vst [vmem:[#allocation51_spill] sm:$0xff] %v3685_v14  ;;  %v3698_v16 = vsel %vm6428_vm14, %v3689_v15, 0.0  ;;  %v3703_v18 = vsel %vm6440_vm15, %v3693_v50, 0.0  ;;  %v3716_v51 = vsel %vm6420_vm6, %v3707_v17, 0.0 }
 0x277   : > { %v3721_v4 = vsel %vm6426_vm7, %v3711_v23, 0.0  ;;  %v3746_v45 = vsel %vm6342_vm8, 1.0, %v6583_v31  ;;  %v3751_v10 = vsel %vm6408_vm9, 1.0, %v6583_v31  ;;  %vm6427_vm4 = vcmp.eq.f32.partialorder %v3451_v19, 0.0 }
 0x278   : > { %6592 = vst [vmem:[#allocation55_spill] sm:$0xff] %v3746_v45  ;;  %6593 = vst [vmem:[#allocation56_spill] sm:$0xff] %v3751_v10  ;;  %vm6439_vm5 = vcmp.eq.f32.partialorder %v3457_v29, 0.0  ;;  %vm6415_vm8 = vcmp.eq.f32.partialorder %v3441_v3, 0.0  ;;  %vm6423_vm12 = vcmp.eq.f32.partialorder %v3445_v28, 0.0  ;;  %v3778_v59 = vsel %vm6427_vm4, 1.0, %v6583_v31 }
 0x279   : > { %2512 = vrot.lane.b32.xlu0 %v2511_v0, %s2837_s30  ;;  %2517 = vrot.lane.b32.xlu1 %v2516_v7, %s2837_s30  ;;  %6596 = vst [vmem:[#allocation59_spill] sm:$0xff] %v3778_v59  ;;  %v3783_v55 = vsel %vm6439_vm5, 1.0, %v6583_v31  ;;  %v3789_v24 = vsel %vm6415_vm8, 1.0, %v6583_v31  ;;  %v3794_v57 = vsel %vm6423_vm12, 1.0, %v6583_v31  ;;  %vm6453_vm8 = vcmp.eq.s32.totalorder %v3019_v40, 8 }
 0x27a   : > { %6597 = vst [vmem:[#allocation60_spill] sm:$0xff] %v3783_v55  ;;  %6598 = vst [vmem:[#allocation61_spill] sm:$0xff] %v3789_v24  ;;  %v2551_v46 = vpack.i.bf16 %v3783_v55, %v3778_v59  ;;  %v2556_v61 = vpack.i.bf16 %v3794_v57, %v3789_v24  ;;  %vm6442_vm6 = vcmp.eq.s32.totalorder %v3019_v40, 103 }
 0x27b   : > { %6599 = vst [vmem:[#allocation62_spill] sm:$0xff] %v3794_v57 }
 0x27d   : > { %2522 = vrot.lane.b32.xlu0 %v2501_v9, %s2838_s26  ;;  %2527 = vrot.lane.b32.xlu1 %v2506_v38, %s2838_s26  ;;  %v3758_v9 = vsel %vm6396_vm10, 1.0, %v6583_v31  ;;  %v3763_v38 = vsel %vm6400_vm11, 1.0, %v6583_v31 }
 0x27e   : > { %6594 = vst [vmem:[#allocation57_spill] sm:$0xff] %v3758_v9  ;;  %6595 = vst [vmem:[#allocation58_spill] sm:$0xff] %v3763_v38 }
 0x281   : > { %2532 = vrot.lane.b32.xlu0 %v2511_v0, %s2838_s26  ;;  %2537 = vrot.lane.b32.xlu1 %v2516_v7, %s2838_s26  ;;  %v2541_v0 = vpack.i.bf16 %v3751_v10, %v3746_v45  ;;  %v2546_v7 = vpack.i.bf16 %v3763_v38, %v3758_v9 }
 0x285   : > { %696 = vrot.lane.b32.xlu0 %v3662_v58, %s2837_s30  ;;  %698 = vrot.lane.b32.xlu1 %v3667_v52, %s2837_s30 }
 0x289   : > { %700 = vrot.lane.b32.xlu0 %v3680_v13, %s2837_s30  ;;  %702 = vrot.lane.b32.xlu1 %v3685_v14, %s2837_s30 }
 0x28d   : > { %704 = vrot.lane.b32.xlu0 %v3698_v16, %s2837_s30  ;;  %706 = vrot.lane.b32.xlu1 %v3703_v18, %s2837_s30 }
 0x291   : > { %708 = vrot.lane.b32.xlu0 %v3716_v51, %s2837_s30  ;;  %710 = vrot.lane.b32.xlu1 %v3721_v4, %s2837_s30 }
 0x295   : > { %728 = vrot.lane.b32.xlu0 %v3662_v58, %s2838_s26  ;;  %730 = vrot.lane.b32.xlu1 %v3667_v52, %s2838_s26 }
 0x299   : > { %732 = vrot.lane.b32.xlu0 %v3680_v13, %s2838_s26  ;;  %734 = vrot.lane.b32.xlu1 %v3685_v14, %s2838_s26 }
 0x29d   : > { %736 = vrot.lane.b32.xlu0 %v3698_v16, %s2838_s26  ;;  %738 = vrot.lane.b32.xlu1 %v3703_v18, %s2838_s26 }
 0x2a1   : > { %740 = vrot.lane.b32.xlu0 %v3716_v51, %s2838_s26  ;;  %742 = vrot.lane.b32.xlu1 %v3721_v4, %s2838_s26 }
 0x2a5   : > { %2542 = vrot.lane.b32.xlu0 %v2541_v0, %s2837_s30  ;;  %2547 = vrot.lane.b32.xlu1 %v2546_v7, %s2837_s30 }
 0x2a9   : > { %2552 = vrot.lane.b32.xlu0 %v2551_v46, %s2837_s30  ;;  %2557 = vrot.lane.b32.xlu1 %v2556_v61, %s2837_s30 }
 0x2ad   : > { %2562 = vrot.lane.b32.xlu0 %v2541_v0, %s2838_s26  ;;  %2567 = vrot.lane.b32.xlu1 %v2546_v7, %s2838_s26 }
 0x2b1   : > { %2572 = vrot.lane.b32.xlu0 %v2551_v46, %s2838_s26  ;;  %2577 = vrot.lane.b32.xlu1 %v2556_v61, %s2838_s26 }
 0x2e7   : > { %v3807_v47 = vpop.permute.xlu0 %2502  ;;  %v3809_v9 = vpop.permute.xlu1 %2507 }
 0x2e8   : > { %v6383_v0 = vunpack.i.h.bf16 %v3807_v47  ;;  %v6377_v7 = vunpack.i.l.bf16 %v3807_v47  ;;  %v6386_v56 = vunpack.i.l.bf16 %v3809_v9  ;;  %v6616_v54 = vunpack.i.h.bf16 %v3807_v47 }
 0x2e9   : > { %v6633_v14 = vunpack.i.h.bf16 %v3809_v9 }
 0x2eb   : > { %v3811_v10 = vpop.permute.xlu0 %2512  ;;  %v3815_v24 = vpop.permute.xlu1 %2517 }
 0x2ec   : > { %v6382_v45 = vunpack.i.h.bf16 %v3811_v10  ;;  %v6376_v38 = vunpack.i.l.bf16 %v3811_v10  ;;  %v6600_v30 = vunpack.i.l.bf16 %v3815_v24  ;;  %v6617_v3 = vunpack.i.h.bf16 %v3811_v10 }
 0x2ed   : > { %v6632_v62 = vunpack.i.l.bf16 %v3815_v24  ;;  %v6634_v29 = vunpack.i.h.bf16 %v3815_v24 }
 0x2ee   : > { %v872_v46 = vsel %vm6455_vm2, %v6377_v7, %v6376_v38  ;;  %v873_v61 = vsel %vm6455_vm2, %v6383_v0, %v6382_v45 }
 0x2ef   : > { %v3819_v55 = vpop.permute.xlu0 %2522  ;;  %v3833_v59 = vpop.permute.xlu1 %2527  ;;  %v921_v38 = vadd.f32 %v3622_v43, %v872_v46  ;;  %v923_v7 = vadd.f32 %v3629_v27, %v873_v61  ;;  %v874_v43 = vsel %vm6455_vm2, %v6386_v56, %v6600_v30  ;;  %v6601_v27 = vunpack.i.h.bf16 %v3815_v24 }
 0x2f0   : > { %v6392_v45 = vunpack.i.l.bf16 %v3819_v55  ;;  %v6602_v46 = vunpack.i.h.bf16 %v3809_v9  ;;  %v6603_v30 = vunpack.i.h.bf16 %v3819_v55  ;;  %v6397_v0 = vunpack.i.l.bf16 %v3833_v59 }
 0x2f1   : > { %v6628_v37 = vunpack.i.l.bf16 %v3819_v55 }
 0x2f2   : > { %v875_v61 = vsel %vm6455_vm2, %v6602_v46, %v6601_v27  ;;  %v118_v27 = vadd.s32 8, %v2983_v11  ;;  %v6401_v46 = vunpack.i.h.bf16 %v3833_v59 }
 0x2f3   : > { %v3841_v53 = vpop.permute.xlu0 %2532  ;;  %v3847_v33 = vpop.permute.xlu1 %2537 }
 0x2f4   : > { %v6393_v57 = vunpack.i.l.bf16 %v3841_v53  ;;  %v6604_v56 = vunpack.i.h.bf16 %v3841_v53 }
 0x2f6   : > { %v908_v12 = vsel %vm6454_vm3, %v6393_v57, %v6392_v45  ;;  %v909_v31 = vsel %vm6454_vm3, %v6604_v56, %v6603_v30  ;;  %v925_v45 = vadd.f32 %v3637_v20, %v874_v43  ;;  %v927_v57 = vadd.f32 %v3642_v35, %v875_v61 }
 0x2f7   : > { %v3879_v63 = vadd.f32 %v921_v38, %v908_v12  ;;  %v3881_v48 = vadd.f32 %v923_v7, %v909_v31  ;;  %v3883_v42 = vpop.permute.xlu0 %696  ;;  %v3888_v1 = vpop.permute.xlu1 %698  ;;  %v125_v56 = vstv %s124_s3  ;;  %v6605_v30 = vunpack.i.l.bf16 %v3847_v33 }
 0x2f8   : > { %v6606_v31 = vunpack.i.h.bf16 %v3847_v33  ;;  %v131_v7 = vstv %s130_s4  ;;  %vm3908_vm10 = vcmp.eq.s32.totalorder %v118_v27, %v125_v56  ;;  %v6607_v61 = vmov 0 }
 0x2f9   : > { %v910_v12 = vsel %vm6454_vm3, %v6605_v30, %v6397_v0  ;;  %v6608_v61 = vsel %vm3908_vm10, 4294967295, %v6607_v61  ;;  %v937_v30 = vrot.slane %v3879_v63, 7  ;;  %v939_v0 = vrot.slane %v3881_v48, 7 }
 0x2fa   : > { %v911_v38 = vsel %vm6454_vm3, %v6606_v31, %v6401_v46  ;;  %v3902_v20 = vadd.f32 %v925_v45, %v910_v12  ;;  %6609 = vst [vmem:[#allocation63_spill] sm:$0xff] %v6608_v61  ;;  %v963_v60 = vrot.slane %v3881_v48, 1  ;;  %vm3920_vm11 = vcmp.eq.s32.totalorder %v118_v27, %v131_v7 }
 0x2fb   : > { %v3904_v35 = vadd.f32 %v927_v57, %v911_v38  ;;  %v3906_v43 = vpop.permute.xlu0 %700  ;;  %v3915_v36 = vpop.permute.xlu1 %702  ;;  %v949_v57 = vsel %vm6506_vm0, %v937_v30, %v939_v0  ;;  %vm3943_vm9 = vcmp.eq.s32.totalorder %v2983_v11, %v125_v56  ;;  %vm3980_vm12 = vcmp.eq.s32.totalorder %v2983_v11, %v131_v7 }
 0x2fc   : > { %v6409_v45 = vrot.slane %v3902_v20, 1  ;;  %v955_v31 = vsel %vm3908_vm10, %v3881_v48, %v949_v57  ;;  %vm3987_vm7 = vcmp.eq.s32.totalorder %v120_v22, %v125_v56  ;;  %vm3996_vm4 = vcmp.eq.s32.totalorder %v120_v22, %v131_v7 }
 0x2fd   : > { %v943_v46 = vrot.slane %v3904_v35, 7  ;;  %v987_v8 = vadd.f32 %v955_v31, %v3881_v48  ;;  %v961_v31 = vrot.slane %v3879_v63, 1  ;;  %v6627_v22 = vunpack.i.l.bf16 %v3841_v53 }
 0x2fe   : > { %v971_v38 = vsel %vm6457_vm1, %v963_v60, %v6409_v45 }
 0x2ff   : > { %v3932_v21 = vpop.permute.xlu0 %704  ;;  %v3935_v34 = vpop.permute.xlu1 %706  ;;  %v979_v27 = vsel %vm3920_vm11, %v3881_v48, %v971_v38  ;;  %v951_v45 = vsel %vm6506_vm0, %v943_v46, %v937_v30  ;;  %v119_v38 = vadd.s32 16, %v2983_v11  ;;  %v6614_v30 = vunpack.i.l.bf16 %v3807_v47 }
 0x300   : > { %v3940_v49 = vadd.f32 %v987_v8, %v979_v27  ;;  %v953_v48 = vsel %vm3943_vm9, %v3879_v63, %v951_v45  ;;  %v941_v8 = vrot.slane %v3902_v20, 7  ;;  %v6615_v27 = vunpack.i.l.bf16 %v3811_v10 }
 0x301   : > { %v877_v45 = vsel %vm6455_vm2, %v6617_v3, %v6616_v54  ;;  %v985_v47 = vadd.f32 %v953_v48, %v3879_v63  ;;  %v6622_v3 = vmov 0  ;;  %vm4002_vm14 = vcmp.eq.s32.totalorder %v119_v38, %v125_v56 }
 0x302   : > { %vm1003_vm13 = vcmp.eq.f32.partialorder %v3940_v49, 0.0  ;;  %v876_v39 = vsel %vm6455_vm2, %v6615_v27, %v6614_v30  ;;  %v973_v30 = vsel %vm6457_vm1, %v961_v31, %v963_v60  ;;  %v6623_v3 = vsel %vm3996_vm4, 4294967295, %v6622_v3 }
 0x303   : > { %v3949_v41 = vpop.permute.xlu0 %708  ;;  %v3951_v5 = vpop.permute.xlu1 %710  ;;  %v3994_v54 = vsel %vm1003_vm13, 1.0, %v3940_v49  ;;  %6624 = vst [vmem:[#allocation64_spill] sm:$0xff] %v6623_v3  ;;  %v945_v27 = vsel %vm6506_vm0, %v941_v8, %v943_v46  ;;  %v880_v48 = vsel %vm6453_vm8, %v3600_v25, %v876_v39  ;;  %v882_v23 = vsel %vm6453_vm8, %v3605_v26, %v877_v45 }
 0x304   : > { %v904_v19 = vsel %vm6454_vm3, %v6628_v37, %v6627_v22  ;;  %v6629_v46 = vunpack.i.h.bf16 %v3841_v53  ;;  %v6630_v56 = vunpack.i.h.bf16 %v3819_v55  ;;  %v6631_v39 = vunpack.i.l.bf16 %v3809_v9 }
 0x305   : > { %v879_v37 = vsel %vm6455_vm2, %v6634_v29, %v6633_v14  ;;  %v977_v55 = vsel %vm3980_vm12, %v3879_v63, %v973_v30  ;;  %v967_v22 = vrot.slane %v3904_v35, 1  ;;  %2661 = vrcp.f32 %v3994_v54 }
 0x306   : > { %v905_v15 = vsel %vm6454_vm3, %v6630_v56, %v6629_v46  ;;  %v878_v45 = vsel %vm6455_vm2, %v6632_v62, %v6631_v39  ;;  %v4045_v62 = vadd.f32 %v985_v47, %v977_v55  ;;  %v959_v24 = vsel %vm3987_vm7, %v3904_v35, %v945_v27 }
 0x307   : > { %v3975_v17 = vpop.permute.xlu0 %728  ;;  %v3977_v32 = vpop.permute.xlu1 %730  ;;  %v947_v29 = vsel %vm6506_vm0, %v939_v0, %v941_v8  ;;  %v920_v14 = vadd.f32 %v3600_v25, %v880_v48  ;;  %v912_v63 = vsel %vm6442_vm6, %v3600_v25, %v904_v19  ;;  %v914_v9 = vsel %vm6442_vm6, %v3605_v26, %v905_v15 }
 0x308   : > { %vm4059_vm5 = vcmp.eq.s32.totalorder %v119_v38, %v131_v7  ;;  %v922_v47 = vadd.f32 %v3605_v26, %v882_v23  ;;  %v884_v0 = vsel %vm6453_vm8, %v3612_v2, %v878_v45  ;;  %v713_v8 = vsel %vm6455_vm2, %v3888_v1, %v3935_v34 }
 0x309   : > { %v712_v19 = vsel %vm6455_vm2, %v3883_v42, %v3932_v21  ;;  %v886_v25 = vsel %vm6453_vm8, %v3617_v6, %v879_v37  ;;  %v975_v26 = vsel %vm6457_vm1, %v967_v22, %v961_v31  ;;  %v991_v23 = vadd.f32 %v959_v24, %v3904_v35 }
 0x30a   : > { %v957_v7 = vsel %vm4002_vm14, %v3902_v20, %v947_v29  ;;  %v4086_v38 = vadd.f32 %v920_v14, %v912_v63  ;;  %v4088_v27 = vadd.f32 %v922_v47, %v914_v9  ;;  %v6637_v48 = vunpack.i.l.bf16 %v3847_v33 }
 0x30b   : > { %v4036_v53 = vpop.permute.xlu0 %732  ;;  %v4042_v46 = vpop.permute.xlu1 %734  ;;  %v6638_v56 = vunpack.i.l.bf16 %v3833_v59  ;;  %vm6441_vm15 = vcmp.eq.f32.partialorder %v4045_v62, 0.0  ;;  %v763_v31 = vadd.f32 %v713_v8, %v3703_v18  ;;  %v761_v37 = vadd.f32 %v712_v19, %v3698_v16 }
 0x30c   : > { %v714_v29 = vsel %vm6455_vm2, %v3906_v43, %v3949_v41  ;;  %v983_v18 = vsel %vm3996_vm4, %v3904_v35, %v975_v26  ;;  %v6639_v16 = vrot.slane %v3902_v20, 1  ;;  %v989_v63 = vadd.f32 %v957_v7, %v3902_v20 }
 0x30d   : > { %v906_v39 = vsel %vm6454_vm3, %v6638_v56, %v6637_v48  ;;  %v924_v9 = vadd.f32 %v3612_v2, %v884_v0  ;;  %v6640_v47 = vunpack.i.h.bf16 %v3847_v33  ;;  %v6641_v8 = vunpack.i.h.bf16 %v3833_v59 }
 0x30e   : > { %v969_v14 = vsel %vm6457_vm1, %v6639_v16, %v967_v22  ;;  %v4133_v35 = vsel %vm6441_vm15, 1.0, %v4045_v62  ;;  %v4135_v26 = vadd.f32 %v991_v23, %v983_v18  ;;  %v916_v22 = vsel %vm6442_vm6, %v3612_v2, %v906_v39 }
 0x30f   : > { %v4078_v15 = vpop.permute.xlu0 %736  ;;  %v4096_v45 = vpop.permute.xlu1 %738  ;;  %v907_v19 = vsel %vm6454_vm3, %v6641_v8, %v6640_v47  ;;  %v715_v59 = vsel %vm6455_vm2, %v3915_v36, %v3951_v5  ;;  %v765_v56 = vadd.f32 %v714_v29, %v3716_v51  ;;  %v981_v23 = vsel %vm4059_vm5, %v3902_v20, %v969_v14 }
 0x310   : > { %v749_v55 = vsel %vm6454_vm3, %v4096_v45, %v3977_v32  ;;  %v748_v24 = vsel %vm6454_vm3, %v4078_v15, %v3975_v17  ;;  %v936_v18 = vrot.slane %v4086_v38, 7  ;;  %v6443_v2 = vrot.slane %v4088_v27, 7 }
 0x311   : > { %v4144_v33 = vadd.f32 %v763_v31, %v749_v55  ;;  %v4146_v0 = vadd.f32 %v761_v37, %v748_v24  ;;  %2663 = vrcp.f32 %v4133_v35  ;;  %v4165_v51 = vadd.f32 %v989_v63, %v981_v23 }
 0x312   : > { %v767_v20 = vadd.f32 %v715_v59, %v3721_v4  ;;  %vm6452_vm15 = vcmp.eq.f32.partialorder %v4135_v26, 0.0  ;;  %v918_v55 = vsel %vm6442_vm6, %v3617_v6, %v907_v19  ;;  %v4174_v24 = vadd.f32 %v924_v9, %v916_v22  ;;  %v2662_v14 = vpop.eup %2661 }
 0x313   : > { %v4128_v48 = vpop.permute.xlu0 %740  ;;  %v4148_v7 = vpop.permute.xlu1 %742  ;;  %v6446_v29 = vrot.slane %v4144_v33, 7  ;;  %v777_v16 = vrot.slane %v4146_v0, 7  ;;  %v926_v63 = vadd.f32 %v3617_v6, %v886_v25  ;;  %v4185_v8 = vsel %vm6452_vm15, 1.0, %v4135_v26 }
 0x314   : > { %v751_v39 = vsel %vm6454_vm3, %v4148_v7, %v4042_v46  ;;  %v750_v31 = vsel %vm6454_vm3, %v4128_v48, %v4036_v53  ;;  %vm6451_vm6 = vcmp.eq.f32.partialorder %v4165_v51, 0.0  ;;  %v948_v9 = vsel %vm6506_vm0, %v936_v18, %v6443_v2 }
 0x315   : > { %v4168_v37 = vadd.f32 %v765_v56, %v750_v31  ;;  %v4179_v47 = vadd.f32 %v767_v20, %v751_v39  ;;  %v4192_v19 = vadd.f32 %v926_v63, %v918_v55  ;;  %v962_v6 = vrot.slane %v4088_v27, 1 }
 0x316   : > { %v803_v25 = vrot.slane %v4144_v33, 1  ;;  %v789_v22 = vsel %vm6506_vm0, %v777_v16, %v6446_v29  ;;  %v1027_v59 = vmul.f32 %v2662_v14, %v3994_v54  ;;  %v6445_v56 = vrot.slane %v4174_v24, 1 }
 0x317   : > { %v6444_v4 = vrot.slane %v4168_v37, 1  ;;  %v6447_v23 = vrot.slane %v4179_v47, 7  ;;  %2665 = vrcp.f32 %v4185_v8  ;;  %v4207_v39 = vsel %vm6451_vm6, 1.0, %v4165_v51 }
 0x318   : > { %v954_v31 = vsel %vm3908_vm10, %v4088_v27, %v948_v9  ;;  %v716_v20 = vsel %vm6455_vm2, %v3932_v21, %v3883_v42  ;;  %v795_v55 = vsel %vm3908_vm10, %v4144_v33, %v789_v22  ;;  %v6450_v63 = vrot.slane %v4192_v19, 7 }
 0x319   : > { %v811_v54 = vsel %vm6457_vm1, %v803_v25, %v6444_v4  ;;  %v1035_v2 = vsub.f32 2.0, %v1027_v59  ;;  %2667 = vrcp.f32 %v4207_v39  ;;  %v970_v9 = vsel %vm6457_vm1, %v962_v6, %v6445_v56 }
 0x31a   : > { %v986_v4 = vadd.f32 %v954_v31, %v4088_v27  ;;  %v819_v42 = vsel %vm3920_vm11, %v4144_v33, %v811_v54  ;;  %v791_v21 = vsel %vm6506_vm0, %v6447_v23, %v777_v16  ;;  %v717_v22 = vsel %vm6455_vm2, %v3935_v34, %v3888_v1 }
 0x31b   : > { %v720_v59 = vsel %vm6453_vm8, %v3662_v58, %v716_v20  ;;  %v801_v31 = vrot.slane %v4146_v0, 1  ;;  %v827_v56 = vadd.f32 %v795_v55, %v4144_v33  ;;  %v718_v54 = vsel %vm6455_vm2, %v3949_v41, %v3906_v43 }
 0x31c   : > { %v978_v16 = vsel %vm3920_vm11, %v4088_v27, %v970_v9  ;;  %v950_v1 = vsel %vm6506_vm0, %v6450_v63, %v936_v18  ;;  %v960_v34 = vrot.slane %v4086_v38, 1  ;;  %v1043_v23 = vmul.f32 %v2662_v14, %v1035_v2 }
 0x31d   : > { %v835_v20 = vadd.f32 %v827_v56, %v819_v42  ;;  %v793_v55 = vsel %vm3943_vm9, %v4146_v0, %v791_v21  ;;  %v4261_v61 = vadd.f32 %v986_v4, %v978_v16  ;;  %v722_v41 = vsel %vm6453_vm8, %v3667_v52, %v717_v22 }
 0x31e   : > { %v2664_v29 = vpop.eup %2663  ;;  %v760_v43 = vadd.f32 %v720_v59, %v3662_v58  ;;  %v813_v18 = vsel %vm6457_vm1, %v801_v31, %v803_v25  ;;  %v825_v63 = vadd.f32 %v793_v55, %v4146_v0  ;;  %v719_v14 = vsel %vm6455_vm2, %v3951_v5, %v3915_v36 }
 0x31f   : > { %v1051_v9 = vmul.f32 %v1043_v23, %v835_v20  ;;  %v1025_v2 = vmul.f32 %v2664_v29, %v4133_v35  ;;  %v724_v4 = vsel %vm6453_vm8, %v3680_v13, %v718_v54  ;;  %vm6642_vm6 = vcmp.eq.f32.partialorder %v3579_v44, 0.0 }
 0x320   : > { %vm1059_vm15 = vmor %vm6642_vm6, %vm1003_vm13  ;;  %v952_v25 = vsel %vm3943_vm9, %v4086_v38, %v950_v1  ;;  %v972_v35 = vsel %vm6457_vm1, %v960_v34, %v962_v6  ;;  %v745_v5 = vsel %vm6454_vm3, %v3977_v32, %v4096_v45  ;;  %v744_v49 = vsel %vm6454_vm3, %v3975_v17, %v4078_v15  ;;  %v6643_v6 = vld [vmem:[#allocation39_spill] sm:$0xff] }
 0x321   : > { %v4298_v44 = vsel %vm1059_vm15, %v3693_v50, %v1051_v9  ;;  %vm1002_vm13 = vcmp.eq.f32.partialorder %v4261_v61, 0.0  ;;  %v807_v36 = vrot.slane %v4179_v47, 1  ;;  %v781_v56 = vrot.slane %v4168_v37, 7  ;;  %v6645_v50 = vld [vmem:[#allocation51_spill] sm:$0xff] }
 0x322   : > { %vm6644_vm6 = vcmp.eq.f32.partialorder %v6643_v6, 0.0  ;;  %v817_v32 = vsel %vm3980_vm12, %v4146_v0, %v813_v18  ;;  %v762_v17 = vadd.f32 %v722_v41, %v3667_v52  ;;  %v726_v15 = vsel %vm6453_vm8, %v6645_v50, %v719_v14 }
 0x323   : > { %v4306_v23 = vsel %vm6644_vm6, %v4298_v44, 0.0  ;;  %v833_v42 = vadd.f32 %v825_v63, %v817_v32  ;;  %v1033_v21 = vsub.f32 2.0, %v1025_v2  ;;  %v764_v22 = vadd.f32 %v724_v4, %v3680_v13 }
 0x324   : > { %v2666_v45 = vpop.eup %2665  ;;  %1098 = vrot.lane.b32.xlu1 %v4306_v23, %s2837_s30  ;;  %v976_v59 = vsel %vm3980_vm12, %v4086_v38, %v972_v35  ;;  %v984_v0 = vadd.f32 %v952_v25, %v4086_v38  ;;  %v940_v54 = vrot.slane %v4174_v24, 7  ;;  %vm6646_vm15 = vcmp.eq.s32.totalorder %v3019_v40, 103  ;;  %v6654_v25 = vld [vmem:[#allocation52_spill] sm:$0xff] }
 0x325   : > { %v754_v16 = vsel %vm6646_vm15, %v3667_v52, %v745_v5  ;;  %vm6647_vm6 = vmmov %vm6646_vm15  ;;  %v1041_v63 = vmul.f32 %v2664_v29, %v1033_v21  ;;  %v4332_v20 = vsel %vm1002_vm13, 1.0, %v4261_v61  ;;  %v747_v41 = vsel %vm6454_vm3, %v4042_v46, %v4148_v7 }
 0x326   : > { %v752_v1 = vsel %vm6647_vm6, %v3662_v58, %v744_v49  ;;  %v2668_v55 = vpop.eup %2667  ;;  %v6648_v9 = vrot.slane %v4179_v47, 7  ;;  %v815_v58 = vsel %vm6457_vm1, %v807_v36, %v801_v31  ;;  %v1031_v29 = vmul.f32 %v2666_v45, %v4185_v8  ;;  %v6651_v31 = vld [vmem:[#allocation42_spill] sm:$0xff] }
 0x327   : > { %v746_v18 = vsel %vm6454_vm3, %v4036_v53, %v4128_v48  ;;  %v1049_v2 = vmul.f32 %v1041_v63, %v833_v42  ;;  %v6649_v7 = vrot.slane %v4144_v33, 7  ;;  %vm6650_vm15 = vcmp.eq.f32.partialorder %v4045_v62, 0.0 }
 0x328   : > { %v785_v52 = vsel %vm6506_vm0, %v781_v56, %v6648_v9  ;;  %vm6652_vm6 = vcmp.eq.f32.partialorder %v6651_v31, 0.0  ;;  %v1039_v4 = vsub.f32 2.0, %v1031_v29  ;;  %v6653_v48 = vrot.slane %v4168_v37, 1  ;;  %v6663_v29 = vld [vmem:[#allocation54_spill] sm:$0xff] }
 0x329   : > { %v799_v46 = vsel %vm3987_vm7, %v4179_v47, %v785_v52  ;;  %v787_v14 = vsel %vm6506_vm0, %v6649_v7, %v781_v56  ;;  %vm1057_vm8 = vmor %vm6652_vm6, %vm6650_vm15  ;;  %v823_v62 = vsel %vm3996_vm4, %v4179_v47, %v815_v58  ;;  %v1029_v49 = vmul.f32 %v2668_v55, %v4207_v39  ;;  %v6655_v56 = vld [vmem:[#allocation37_spill] sm:$0xff] }
 0x32a   : > { %v831_v8 = vadd.f32 %v799_v46, %v4179_v47  ;;  %v797_v53 = vsel %vm4002_vm14, %v4168_v37, %v787_v14  ;;  %v809_v33 = vsel %vm6457_vm1, %v6653_v48, %v807_v36  ;;  %v4369_v35 = vsel %vm1057_vm8, %v6654_v25, %v1049_v2  ;;  %v6668_v2 = vld [vmem:[#allocation45_spill] sm:$0xff] }
 0x32b   : > { %v829_v5 = vadd.f32 %v797_v53, %v4168_v37  ;;  %vm6656_vm15 = vcmp.eq.f32.partialorder %v6655_v56, 0.0  ;;  %v1047_v21 = vmul.f32 %v2666_v45, %v1039_v4  ;;  %v821_v36 = vsel %vm4059_vm5, %v4168_v37, %v809_v33  ;;  %v6670_v14 = vld [vmem:[#allocation53_spill] sm:$0xff] }
 0x32c   : > { %v4379_v32 = vsel %vm6656_vm15, %v4369_v35, 0.0  ;;  %v839_v42 = vadd.f32 %v831_v8, %v823_v62  ;;  %v4384_v63 = vadd.f32 %v760_v43, %v752_v1  ;;  %vm6657_vm8 = vcmp.eq.s32.totalorder %v3019_v40, 103  ;;  %v6660_v43 = vld [vmem:[#allocation46_spill] sm:$0xff]  ;;  %v6672_v4 = vld [vmem:[#allocation33_spill] sm:$0xff] }
 0x32d   : > { %v756_v47 = vsel %vm6657_vm8, %v3680_v13, %v746_v18  ;;  %1096 = vrot.lane.b32.xlu0 %v4379_v32, %s2837_s30  ;;  %v837_v39 = vadd.f32 %v829_v5, %v821_v36  ;;  %v1037_v9 = vsub.f32 2.0, %v1029_v49  ;;  %v4391_v52 = vadd.f32 %v762_v17, %v754_v16  ;;  %vm6658_vm6 = vmmov %vm6657_vm8 }
 0x32e   : > { %v758_v45 = vsel %vm6658_vm6, %v6645_v50, %v747_v41  ;;  %v1055_v58 = vmul.f32 %v1047_v21, %v839_v42  ;;  %2669 = vrcp.f32 %v4332_v20  ;;  %v766_v37 = vadd.f32 %v726_v15, %v6645_v50  ;;  %v6665_v15 = vld [vmem:[#allocation35_spill] sm:$0xff] }
 0x32f   : > { %vm6659_vm15 = vcmp.eq.f32.partialorder %v4135_v26, 0.0  ;;  %vm6661_vm8 = vcmp.eq.f32.partialorder %v6660_v43, 0.0  ;;  %v1045_v13 = vmul.f32 %v2668_v55, %v1037_v9  ;;  %v4402_v1 = vadd.f32 %v984_v0, %v976_v59 }
 0x330   : > { %vm1063_vm3 = vmor %vm6661_vm8, %vm6659_vm15  ;;  %v6662_v17 = vrot.slane %v4192_v19, 7  ;;  %v4410_v41 = vadd.f32 %v764_v22, %v756_v47  ;;  %v966_v26 = vrot.slane %v4192_v19, 1  ;;  %v4416_v50 = vadd.f32 %v766_v37, %v758_v45 }
 0x331   : > { %v4413_v18 = vsel %vm1063_vm3, %v6663_v29, %v1055_v58  ;;  %vm6666_vm6 = vcmp.eq.f32.partialorder %v6665_v15, 0.0  ;;  %v1053_v0 = vmul.f32 %v1045_v13, %v837_v39  ;;  %vm1000_vm15 = vcmp.eq.f32.partialorder %v4402_v1, 0.0 }
 0x332   : > { %v944_v16 = vsel %vm6506_vm0, %v940_v54, %v6662_v17  ;;  %6664 = vst [vmem:[#allocation39_spill] sm:$0xff] %v4413_v18  ;;  %v4421_v59 = vsel %vm6666_vm6, %v4413_v18, 0.0  ;;  %v778_v55 = vrot.slane %v4391_v52, 7  ;;  %v776_v22 = vrot.slane %v4384_v63, 7 }
 0x333   : > { %1102 = vrot.lane.b32.xlu1 %v4421_v59, %s2837_s30  ;;  %vm6667_vm3 = vcmp.eq.f32.partialorder %v4165_v51, 0.0  ;;  %vm6669_vm8 = vcmp.eq.f32.partialorder %v6668_v2, 0.0  ;;  %v1008_v46 = vsel %vm1000_vm15, 1.0, %v4402_v1  ;;  %v958_v7 = vsel %vm3987_vm7, %v4192_v19, %v944_v16 }
 0x334   : > { %vm1061_vm2 = vmor %vm6669_vm8, %vm6667_vm3  ;;  %2671 = vrcp.f32 %v1008_v46  ;;  %v804_v8 = vrot.slane %v4410_v41, 1  ;;  %vm6673_vm6 = vcmp.eq.f32.partialorder %v6672_v4, 0.0  ;;  %v974_v53 = vsel %vm6457_vm1, %v966_v26, %v960_v34 }
 0x335   : > { %v4439_v31 = vsel %vm1061_vm2, %v6670_v14, %v1053_v0  ;;  %v782_v48 = vrot.slane %v4416_v50, 7  ;;  %v990_v33 = vadd.f32 %v958_v7, %v4192_v19  ;;  %v802_v25 = vrot.slane %v4391_v52, 1 }
 0x336   : > { %6671 = vst [vmem:[#allocation51_spill] sm:$0xff] %v4439_v31  ;;  %v4445_v51 = vsel %vm6673_vm6, %v4439_v31, 0.0  ;;  %v788_v62 = vsel %vm6506_vm0, %v776_v22, %v778_v55  ;;  %v982_v38 = vsel %vm3996_vm4, %v4192_v19, %v974_v53  ;;  %v6674_v34 = vrot.slane %v4088_v27, 7 }
 0x337   : > { %1100 = vrot.lane.b32.xlu0 %v4445_v51, %s2837_s30  ;;  %1130 = vrot.lane.b32.xlu1 %v4306_v23, %s2838_s26  ;;  %v4469_v49 = vadd.f32 %v990_v33, %v982_v38  ;;  %v6675_v21 = vrot.slane %v4174_v24, 1  ;;  %v810_v19 = vsel %vm6457_vm1, %v802_v25, %v804_v8  ;;  %v794_v47 = vsel %vm3908_vm10, %v4391_v52, %v788_v62 }
 0x338   : > { %v946_v5 = vsel %vm6506_vm0, %v6674_v34, %v940_v54  ;;  %v790_v39 = vsel %vm6506_vm0, %v782_v48, %v776_v22  ;;  %v800_v43 = vrot.slane %v4384_v63, 1  ;;  %v818_v13 = vsel %vm3920_vm11, %v4391_v52, %v810_v19  ;;  %v6677_v34 = vld [vmem:[#allocation41_spill] sm:$0xff] }
 0x339   : > { %v956_v42 = vsel %vm4002_vm14, %v4174_v24, %v946_v5  ;;  %v968_v36 = vsel %vm6457_vm1, %v6675_v21, %v966_v26  ;;  %vm1006_vm2 = vcmp.eq.f32.partialorder %v4469_v49, 0.0  ;;  %v826_v17 = vadd.f32 %v794_v47, %v4391_v52 }
 0x33a   : > { %v988_v27 = vadd.f32 %v956_v42, %v4174_v24  ;;  %v980_v9 = vsel %vm4059_vm5, %v4174_v24, %v968_v36  ;;  %v1014_v45 = vsel %vm1006_vm2, 1.0, %v4469_v49  ;;  %v792_v24 = vsel %vm3943_vm9, %v4384_v63, %v790_v39  ;;  %v6679_v42 = vld [vmem:[#allocation48_spill] sm:$0xff]  ;;  %v6698_v49 = vld [vmem:[#allocation49_spill] sm:$0xff] }
 0x33b   : > { %1128 = vrot.lane.b32.xlu0 %v4379_v32, %s2838_s26  ;;  %v2670_v37 = vpop.eup %2669  ;;  %2673 = vrcp.f32 %v1014_v45  ;;  %v780_v29 = vrot.slane %v4410_v41, 7  ;;  %v834_v0 = vadd.f32 %v826_v17, %v818_v13  ;;  %v812_v2 = vsel %vm6457_vm1, %v800_v43, %v802_v25 }
 0x33c   : > { %v996_v58 = vadd.f32 %v988_v27, %v980_v9  ;;  %v1026_v16 = vmul.f32 %v2670_v37, %v4332_v20  ;;  %v824_v7 = vadd.f32 %v792_v24, %v4384_v63  ;;  %v816_v62 = vsel %vm3980_vm12, %v4384_v63, %v812_v2  ;;  %v6681_v63 = vld [vmem:[#allocation38_spill] sm:$0xff]  ;;  %v6683_v9 = vld [vmem:[#allocation40_spill] sm:$0xff] }
 0x33d   : > { %v784_v53 = vsel %vm6506_vm0, %v780_v29, %v782_v48  ;;  %v806_v38 = vrot.slane %v4416_v50, 1  ;;  %vm6678_vm8 = vcmp.eq.f32.partialorder %v6677_v34, 0.0  ;;  %v786_v48 = vsel %vm6506_vm0, %v778_v55, %v780_v29 }
 0x33e   : > { %vm6456_vm3 = vcmp.eq.f32.partialorder %v996_v58, 0.0  ;;  %v1034_v22 = vsub.f32 2.0, %v1026_v16  ;;  %vm1058_vm6 = vmor %vm6678_vm8, %vm1002_vm13  ;;  %v832_v25 = vadd.f32 %v824_v7, %v816_v62  ;;  %v796_v39 = vsel %vm4002_vm14, %v4410_v41, %v786_v48  ;;  %v6687_v16 = vld [vmem:[#allocation36_spill] sm:$0xff] }
 0x33f   : > { %v1012_v26 = vsel %vm6456_vm3, 1.0, %v996_v58  ;;  %vm6682_vm3 = vcmp.eq.f32.partialorder %v6681_v63, 0.0  ;;  %v814_v27 = vsel %vm6457_vm1, %v806_v38, %v800_v43  ;;  %vm6684_vm13 = vcmp.eq.f32.partialorder %v6683_v9, 0.0 }
 0x340   : > { %2675 = vrcp.f32 %v1012_v26  ;;  %v1042_v14 = vmul.f32 %v2670_v37, %v1034_v22  ;;  %v6685_v37 = vld [vmem:[#allocation47_spill] sm:$0xff]  ;;  %vm6688_vm8 = vcmp.eq.f32.partialorder %v6687_v16, 0.0  ;;  %v822_v24 = vsel %vm3996_vm4, %v4416_v50, %v814_v27  ;;  %v6707_v27 = vld [vmem:[#allocation28_spill] sm:$0xff] }
 0x341   : > { %v2672_v52 = vpop.eup %2671  ;;  %v808_v1 = vsel %vm6457_vm1, %v804_v8, %v806_v38  ;;  %v828_v29 = vadd.f32 %v796_v39, %v4410_v41  ;;  %v6689_v8 = vld [vmem:[#allocation44_spill] sm:$0xff]  ;;  %v6693_v38 = vld [vmem:[#allocation34_spill] sm:$0xff]  ;;  %v6704_v48 = vmov 0.0   ;;  %v6709_v39 = vld [vmem:[#allocation25_spill] sm:$0xff] }
 0x342   : > { %v1024_v20 = vmul.f32 %v2672_v52, %v1008_v46  ;;  %v1050_v33 = vmul.f32 %v1042_v14, %v834_v0  ;;  %v798_v46 = vsel %vm3987_vm7, %v4416_v50, %v784_v53 }
 0x343   : > { %v830_v47 = vadd.f32 %v798_v46, %v4416_v50  ;;  %v6703_v46 = vld [vmem:[#allocation26_spill] sm:$0xff] }
 0x344   : > { %v1032_v5 = vsub.f32 2.0, %v1024_v20  ;;  %v4522_v21 = vsel %vm1058_vm6, %v6679_v42, %v1050_v33  ;;  %v6691_v33 = vld [vmem:[#allocation50_spill] sm:$0xff] }
 0x345   : > { %6680 = vst [vmem:[#allocation42_spill] sm:$0xff] %v4522_v21  ;;  %v4532_v36 = vsel %vm6682_vm3, %v4522_v21, 0.0  ;;  %vm1056_vm3 = vmor %vm6684_vm13, %vm1000_vm15  ;;  %vm6690_vm15 = vcmp.eq.f32.partialorder %v6689_v8, 0.0  ;;  %vm6694_vm13 = vcmp.eq.f32.partialorder %v6693_v38, 0.0  ;;  %v6726_v38 = vld [vmem:[#allocation62_spill] sm:$0xff] }
 0x346   : > { %v1040_v61 = vmul.f32 %v2672_v52, %v1032_v5  ;;  %1090 = vrot.lane.b32.xlu1 %v4532_v36, %s2837_s30  ;;  %v820_v52 = vsel %vm4059_vm5, %v4410_v41, %v808_v1  ;;  %vm1062_vm6 = vmor %vm6690_vm15, %vm1006_vm2  ;;  %v6696_v41 = vld [vmem:[#allocation43_spill] sm:$0xff]  ;;  %v6700_v5 = vld [vmem:[#allocation32_spill] sm:$0xff]  ;;  %vm6458_vm15 = vcmp.eq.f32.partialorder %v6703_v46, 0.0 }
 0x347   : > { %v836_v50 = vadd.f32 %v828_v29, %v820_v52  ;;  %vm6701_vm2 = vcmp.eq.f32.partialorder %v6700_v5, 0.0  ;;  %v6715_v29 = vld [vmem:[#allocation29_spill] sm:$0xff]  ;;  %v6728_v5 = vld [vmem:[#allocation60_spill] sm:$0xff] }
 0x348   : > { %v1048_v19 = vmul.f32 %v1040_v61, %v832_v25  ;;  %v2674_v55 = vpop.eup %2673 }
 0x349   : > { %v1030_v17 = vmul.f32 %v2674_v55, %v1014_v45  ;;  %v838_v45 = vadd.f32 %v830_v47, %v822_v24  ;;  %v6708_v47 = vld [vmem:[#allocation30_spill] sm:$0xff] }
 0x34a   : > { %v4547_v13 = vsel %vm1056_vm3, %v6685_v37, %v1048_v19  ;;  %vm6695_vm3 = vcmp.eq.f32.partialorder %v996_v58, 0.0  ;;  %v6702_v58 = vld [vmem:[#allocation24_spill] sm:$0xff]  ;;  %v4612_v19 = vsel %vm6458_vm15, 1.0, %v6704_v48 }
 0x34b   : > { %6686 = vst [vmem:[#allocation52_spill] sm:$0xff] %v4547_v13  ;;  %v4552_v43 = vsel %vm6688_vm8, %v4547_v13, 0.0  ;;  %v1038_v22 = vsub.f32 2.0, %v1030_v17  ;;  %vm6697_vm8 = vcmp.eq.f32.partialorder %v6696_v41, 0.0  ;;  %6706 = vst [vmem:[#allocation45_spill] sm:$0xff] %v4612_v19  ;;  %v6730_v13 = vld [vmem:[#allocation61_spill] sm:$0xff] }
 0x34c   : > { %1088 = vrot.lane.b32.xlu0 %v4552_v43, %s2837_s30  ;;  %vm1060_vm1 = vmor %vm6697_vm8, %vm6695_vm3  ;;  %vm6478_vm3 = vcmp.eq.f32.partialorder %v6709_v39, 0.0 }
 0x34d   : > { %v2676_v0 = vpop.eup %2675  ;;  %v1046_v7 = vmul.f32 %v2674_v55, %v1038_v22  ;;  %v6710_v55 = vld [vmem:[#allocation27_spill] sm:$0xff]  ;;  %v4637_v24 = vsel %vm6478_vm3, 1.0, %v6704_v48  ;;  %vm6723_vm3 = vcmp.lt.s32.totalorder %v3019_v40, 127 }
 0x34e   : > { %v1028_v2 = vmul.f32 %v2676_v0, %v1012_v26  ;;  %vm6477_vm8 = vcmp.eq.f32.partialorder %v6710_v55, 0.0  ;;  %6713 = vst [vmem:[#allocation41_spill] sm:$0xff] %v4637_v24 }
 0x34f   : > { %v1054_v20 = vmul.f32 %v1046_v7, %v838_v45  ;;  %v4642_v1 = vsel %vm6477_vm8, 1.0, %v6704_v48 }
 0x350   : > { %v1036_v14 = vsub.f32 2.0, %v1028_v2  ;;  %6714 = vst [vmem:[#allocation48_spill] sm:$0xff] %v4642_v1  ;;  %v2596_v22 = vpack.i.bf16 %v4642_v1, %v4637_v24 }
 0x351   : > { %v4572_v62 = vsel %vm1062_vm6, %v6691_v33, %v1054_v20  ;;  %vm6473_vm6 = vcmp.eq.f32.partialorder %v6707_v27, 0.0  ;;  %v6727_v27 = vld [vmem:[#allocation59_spill] sm:$0xff] }
 0x352   : > { %v1044_v53 = vmul.f32 %v2676_v0, %v1036_v14  ;;  %6692 = vst [vmem:[#allocation37_spill] sm:$0xff] %v4572_v62  ;;  %v4577_v26 = vsel %vm6694_vm13, %v4572_v62, 0.0  ;;  %vm6471_vm13 = vcmp.eq.f32.partialorder %v6708_v47, 0.0  ;;  %v4625_v37 = vsel %vm6473_vm6, 1.0, %v6704_v48  ;;  %v6716_v0 = vld [vmem:[#allocation31_spill] sm:$0xff]  ;;  %v2543_v14 = vpop.permute.xlu0 %2542 }
 0x353   : > { %1094 = vrot.lane.b32.xlu1 %v4577_v26, %s2837_s30  ;;  %6711 = vst [vmem:[#allocation53_spill] sm:$0xff] %v4625_v37  ;;  %v4630_v17 = vsel %vm6471_vm13, 1.0, %v6704_v48  ;;  %vm6488_vm15 = vcmp.eq.f32.partialorder %v6716_v0, 0.0  ;;  %v2545_v1 = vunpack.i.h.bf16 %v2543_v14 }
 0x354   : > { %v1052_v34 = vmul.f32 %v1044_v53, %v836_v50  ;;  %6712 = vst [vmem:[#allocation63_spill] sm:$0xff] %v4630_v17  ;;  %v2581_v45 = vpack.i.bf16 %v4630_v17, %v4625_v37  ;;  %v4659_v7 = vsel %vm6488_vm15, 1.0, %v6704_v48  ;;  %v2548_v50 = vpop.permute.xlu1 %2547 }
 0x355   : > { %6718 = vst [vmem:[#allocation47_spill] sm:$0xff] %v4659_v7  ;;  %v2549_v37 = vunpack.i.l.bf16 %v2548_v50 }
 0x356   : > { %v4585_v25 = vsel %vm1060_vm1, %v6698_v49, %v1052_v34  ;;  %vm6469_vm1 = vcmp.eq.f32.partialorder %v6702_v58, 0.0  ;;  %v2553_v8 = vpop.permute.xlu0 %2552 }
 0x357   : > { %6699 = vst [vmem:[#allocation46_spill] sm:$0xff] %v4585_v25  ;;  %v4590_v42 = vsel %vm6701_vm2, %v4585_v25, 0.0  ;;  %1122 = vrot.lane.b32.xlu1 %v4532_v36, %s2838_s26  ;;  %v4607_v61 = vsel %vm6469_vm1, 1.0, %v6704_v48  ;;  %vm6489_vm2 = vcmp.eq.f32.partialorder %v6715_v29, 0.0  ;;  %v2555_v41 = vunpack.i.h.bf16 %v2553_v8 }
 0x358   : > { %1092 = vrot.lane.b32.xlu0 %v4590_v42, %s2837_s30  ;;  %6705 = vst [vmem:[#allocation54_spill] sm:$0xff] %v4607_v61  ;;  %v2586_v9 = vpack.i.bf16 %v4612_v19, %v4607_v61  ;;  %v4654_v2 = vsel %vm6489_vm2, 1.0, %v6704_v48  ;;  %v2558_v20 = vpop.permute.xlu1 %2557  ;;  %v2554_v49 = vunpack.i.l.bf16 %v2553_v8  ;;  %vm6719_vm1 = vcmp.lt.s32.totalorder %v3019_v40, 1 }
 0x359   : > { %6717 = vst [vmem:[#allocation40_spill] sm:$0xff] %v4654_v2  ;;  %v2591_v52 = vpack.i.bf16 %v4659_v7, %v4654_v2  ;;  %v2560_v34 = vunpack.i.h.bf16 %v2558_v20  ;;  %v2559_v24 = vunpack.i.l.bf16 %v2558_v20  ;;  %vm6720_vm13 = vmmov %vm6719_vm1 }
 0x35a   : > { %v2563_v33 = vpop.permute.xlu0 %2562  ;;  %vm6721_vm6 = vmmov %vm6719_vm1 }
 0x35b   : > { %1126 = vrot.lane.b32.xlu1 %v4577_v26, %s2838_s26  ;;  %v1265_v8 = vsel %vm6721_vm6, %v2545_v1, %v2555_v41  ;;  %v2565_v46 = vunpack.i.h.bf16 %v2563_v33  ;;  %v2564_v58 = vunpack.i.l.bf16 %v2563_v33  ;;  %vm6722_vm8 = vmmov %vm6719_vm1 }
 0x35c   : > { %1120 = vrot.lane.b32.xlu0 %v4552_v43, %s2838_s26  ;;  %v4670_v53 = vpop.permute.xlu1 %2567  ;;  %v1266_v20 = vsel %vm6722_vm8, %v2549_v37, %v2559_v24 }
 0x35d   : > { %v2570_v48 = vunpack.i.h.bf16 %v4670_v53 }
 0x35e   : > { %v2573_v17 = vpop.permute.xlu0 %2572 }
 0x35f   : > { %1134 = vrot.lane.b32.xlu1 %v4421_v59, %s2838_s26  ;;  %v2574_v19 = vunpack.i.l.bf16 %v2573_v17 }
 0x360   : > { %1124 = vrot.lane.b32.xlu0 %v4590_v42, %s2838_s26  ;;  %v4672_v61 = vpop.permute.xlu1 %2577 }
 0x363   : > { %2587 = vrot.lane.b32.xlu1 %v2586_v9, %s2837_s30 }
 0x364   : > { %1132 = vrot.lane.b32.xlu0 %v4445_v51, %s2838_s26 }
 0x367   : > { %2597 = vrot.lane.b32.xlu1 %v2596_v22, %s2837_s30 }
 0x368   : > { %2582 = vrot.lane.b32.xlu0 %v2581_v45, %s2837_s30 }
 0x36b   : > { %2607 = vrot.lane.b32.xlu1 %v2586_v9, %s2838_s26  ;;  %v2550_v9 = vunpack.i.h.bf16 %v2548_v50 }
 0x36c   : > { %2592 = vrot.lane.b32.xlu0 %v2591_v52, %s2837_s30 }
 0x36d   : > { %v1267_v7 = vsel %vm6719_vm1, %v2550_v9, %v2560_v34  ;;  %vm6724_vm1 = vmmov %vm6723_vm3 }
 0x36e   : > { %v1300_v62 = vsel %vm6724_vm1, %v2574_v19, %v2564_v58  ;;  %v1319_v47 = vadd.f32 %v6726_v38, %v1267_v7  ;;  %vm6729_vm6 = vmmov %vm6724_vm1 }
 0x36f   : > { %2617 = vrot.lane.b32.xlu1 %v2596_v22, %s2838_s26  ;;  %v2580_v22 = vunpack.i.h.bf16 %v4672_v61 }
 0x370   : > { %2602 = vrot.lane.b32.xlu0 %v2581_v45, %s2838_s26  ;;  %v2544_v45 = vunpack.i.l.bf16 %v2543_v14  ;;  %v2579_v14 = vunpack.i.l.bf16 %v4672_v61  ;;  %v1315_v61 = vadd.f32 %v6728_v5, %v1265_v8  ;;  %v6732_v5 = vld [vmem:[#allocation58_spill] sm:$0xff]  ;;  %v6739_v8 = vld [vmem:[#allocation55_spill] sm:$0xff] }
 0x371   : > { %v1303_v50 = vsel %vm6723_vm3, %v2580_v22, %v2570_v48  ;;  %vm6731_vm3 = vmmov %vm6722_vm8  ;;  %vm6733_vm8 = vcmp.eq.s32.totalorder %v3019_v40, 8 }
 0x372   : > { %v1264_v2 = vsel %vm6720_vm13, %v2544_v45, %v2554_v49  ;;  %vm6725_vm13 = vmmov %vm6724_vm1  ;;  %v4698_v63 = vadd.f32 %v1319_v47, %v1303_v50  ;;  %v1271_v39 = vsel %vm6731_vm3, %v2560_v34, %v2550_v9 }
 0x373   : > { %v1313_v33 = vadd.f32 %v6727_v27, %v1264_v2  ;;  %v1278_v7 = vsel %vm6733_vm8, %v6732_v5, %v1271_v39  ;;  %vm6734_vm1 = vmmov %vm6731_vm3 }
 0x374   : > { %2612 = vrot.lane.b32.xlu0 %v2591_v52, %s2838_s26  ;;  %v2575_v52 = vunpack.i.h.bf16 %v2573_v17  ;;  %v2569_v17 = vunpack.i.l.bf16 %v4670_v53  ;;  %v1317_v53 = vadd.f32 %v6730_v13, %v1266_v20  ;;  %v1335_v27 = vrot.slane %v4698_v63, 7  ;;  %vm6736_vm3 = vmmov %vm6729_vm6 }
 0x375   : > { %v4700_v16 = vadd.f32 %v1313_v33, %v1300_v62  ;;  %v1268_v13 = vsel %vm6734_vm1, %v2554_v49, %v2544_v45  ;;  %vm6737_vm15 = vmmov %vm6736_vm3 }
 0x376   : > { %v1301_v25 = vsel %vm6725_vm13, %v2575_v52, %v2565_v46  ;;  %v1302_v21 = vsel %vm6729_vm6, %v2579_v14, %v2569_v17  ;;  %vm6735_vm13 = vmmov %vm6734_vm1  ;;  %v1297_v47 = vsel %vm6737_vm15, %v2565_v46, %v2575_v52  ;;  %v1272_v49 = vsel %vm6733_vm8, %v6739_v8, %v1268_v13 }
 0x377   : > { %v1323_v55 = vadd.f32 %v1315_v61, %v1301_v25  ;;  %v1325_v18 = vadd.f32 %v1317_v53, %v1302_v21  ;;  %v1329_v38 = vrot.slane %v4700_v16, 7  ;;  %v1269_v62 = vsel %vm6735_vm13, %v2555_v41, %v2545_v1  ;;  %vm6738_vm2 = vmmov %vm6734_vm1  ;;  %v6740_v1 = vld [vmem:[#allocation56_spill] sm:$0xff] }
 0x378   : > { %v1299_v25 = vsel %vm6729_vm6, %v2570_v48, %v2580_v22  ;;  %v1296_v21 = vsel %vm6736_vm3, %v2564_v58, %v2574_v19  ;;  %v1270_v9 = vsel %vm6738_vm2, %v2559_v24, %v2549_v37  ;;  %vm6741_vm1 = vmmov %vm6733_vm8  ;;  %v1318_v19 = vadd.f32 %v6732_v5, %v1278_v7 }
 0x379   : > { %v1331_v2 = vrot.slane %v1323_v55, 7  ;;  %v1333_v34 = vrot.slane %v1325_v18, 7  ;;  %v1274_v48 = vsel %vm6741_vm1, %v6740_v1, %v1269_v62  ;;  %v1343_v58 = vsel %vm6506_vm0, %v1335_v27, %v1329_v38  ;;  %vm6746_vm6 = vmmov %vm6741_vm1 }
 0x37a   : > { %vm6742_vm15 = vcmp.eq.s32.totalorder %v3019_v40, 103  ;;  %v1353_v22 = vrot.slane %v4700_v16, 1  ;;  %v1355_v52 = vrot.slane %v1323_v55, 1  ;;  %v1357_v20 = vrot.slane %v1325_v18, 1 }
 0x37b   : > { %v1341_v46 = vsel %vm6506_vm0, %v1329_v38, %v1331_v2  ;;  %v1310_v37 = vsel %vm6742_vm15, %v6732_v5, %v1299_v25  ;;  %vm6743_vm2 = vmmov %vm6742_vm15  ;;  %v1339_v50 = vsel %vm6506_vm0, %v1331_v2, %v1333_v34  ;;  %v1312_v33 = vadd.f32 %v6739_v8, %v1272_v49  ;;  %v6745_v5 = vld [vmem:[#allocation57_spill] sm:$0xff] }
 0x37c   : > { %v1304_v24 = vsel %vm6743_vm2, %v6739_v8, %v1296_v21  ;;  %vm6744_vm13 = vmmov %vm6743_vm2  ;;  %v1314_v61 = vadd.f32 %v6740_v1, %v1274_v48  ;;  %v1345_v53 = vsel %vm3943_vm9, %v4700_v16, %v1343_v58  ;;  %v1347_v38 = vsel %vm3908_vm10, %v1323_v55, %v1341_v46 }
 0x37d   : > { %v1306_v41 = vsel %vm6744_vm13, %v6740_v1, %v1297_v47  ;;  %v1276_v7 = vsel %vm6746_vm6, %v6745_v5, %v1270_v9  ;;  %v1298_v13 = vsel %vm6736_vm3, %v2569_v17, %v2579_v14  ;;  %v1359_v2 = vrot.slane %v4698_v63, 1  ;;  %vm6749_vm15 = vmmov %vm6743_vm2 }
 0x37e   : > { %v4761_v62 = vadd.f32 %v1318_v19, %v1310_v37  ;;  %v4763_v25 = vadd.f32 %v1312_v33, %v1304_v24  ;;  %v1322_v21 = vadd.f32 %v1314_v61, %v1306_v41  ;;  %v1349_v8 = vsel %vm4002_vm14, %v1325_v18, %v1339_v50 }
 0x37f   : > { %vm6747_vm8 = vcmp.lt.s32.totalorder %v2983_v11, 7  ;;  %v1377_v9 = vadd.f32 %v1345_v53, %v4700_v16  ;;  %v1379_v17 = vadd.f32 %v1347_v38, %v1323_v55  ;;  %v1316_v1 = vadd.f32 %v6745_v5, %v1276_v7 }
 0x380   : > { %v1365_v49 = vsel %vm6747_vm8, %v1353_v22, %v1355_v52  ;;  %vm6748_vm1 = vmmov %vm6747_vm8  ;;  %v1308_v48 = vsel %vm6749_vm15, %v6745_v5, %v1298_v13  ;;  %v1381_v19 = vadd.f32 %v1349_v8, %v1325_v18  ;;  %v1328_v41 = vrot.slane %v4763_v25, 7 }
 0x381   : > { %v1363_v14 = vsel %vm6748_vm1, %v1355_v52, %v1357_v20  ;;  %vm6750_vm2 = vmmov %vm6748_vm1  ;;  %v1369_v37 = vsel %vm3980_vm12, %v4700_v16, %v1365_v49  ;;  %v1334_v52 = vrot.slane %v4761_v62, 7  ;;  %v1337_v61 = vsel %vm6506_vm0, %v1333_v34, %v1335_v27 }
 0x382   : > { %v1361_v46 = vsel %vm6750_vm2, %v1357_v20, %v1359_v2  ;;  %v1371_v24 = vsel %vm3920_vm11, %v1323_v55, %v1363_v14  ;;  %v4789_v50 = vadd.f32 %v1377_v9, %v1369_v37  ;;  %v1330_v20 = vrot.slane %v1322_v21, 7  ;;  %vm6752_vm3 = vmmov %vm6748_vm1 }
 0x383   : > { %v4791_v33 = vadd.f32 %v1379_v17, %v1371_v24  ;;  %v1324_v53 = vadd.f32 %v1316_v1, %v1308_v48  ;;  %v1373_v16 = vsel %vm4059_vm5, %v1325_v18, %v1361_v46  ;;  %v1351_v55 = vsel %vm3987_vm7, %v4698_v63, %v1337_v61  ;;  %vm6754_vm15 = vmmov %vm6748_vm1 }
 0x384   : > { %v4799_v5 = vadd.f32 %v1381_v19, %v1373_v16  ;;  %v1342_v7 = vsel %vm6506_vm0, %v1334_v52, %v1328_v41  ;;  %vm1393_vm13 = vcmp.eq.f32.partialorder %v4789_v50, 0.0  ;;  %v1340_v27 = vsel %vm6506_vm0, %v1328_v41, %v1330_v20 }
 0x385   : > { %vm1395_vm6 = vcmp.eq.f32.partialorder %v4791_v33, 0.0  ;;  %v1367_v18 = vsel %vm6752_vm3, %v1359_v2, %v1353_v22  ;;  %v1352_v34 = vrot.slane %v4763_v25, 1  ;;  %v1354_v8 = vrot.slane %v1322_v21, 1  ;;  %vm6757_vm3 = vmmov %vm6748_vm1 }
 0x386   : > { %6751 = vst [vmem:[#allocation44_spill] sm:$0xff] %v4799_v5  ;;  %v1332_v49 = vrot.slane %v1324_v53, 7  ;;  %vm6493_vm8 = vcmp.eq.f32.partialorder %v4799_v5, 0.0  ;;  %v1383_v9 = vadd.f32 %v1351_v55, %v4698_v63  ;;  %v1344_v14 = vsel %vm3943_vm9, %v4763_v25, %v1342_v7 }
 0x387   : > { %v1356_v17 = vrot.slane %v1324_v53, 1  ;;  %v4825_v48 = vsel %vm1393_vm13, 1.0, %v4789_v50  ;;  %v1346_v22 = vsel %vm3908_vm10, %v1322_v21, %v1340_v27  ;;  %v4832_v2 = vsel %vm1395_vm6, 1.0, %v4791_v33 }
 0x388   : > { %v1375_v46 = vsel %vm3996_vm4, %v4698_v63, %v1367_v18  ;;  %v4840_v19 = vsel %vm6493_vm8, 1.0, %v4799_v5  ;;  %v1364_v37 = vsel %vm6748_vm1, %v1352_v34, %v1354_v8  ;;  %v1376_v24 = vadd.f32 %v1344_v14, %v4763_v25 }
 0x389   : > { %v1338_v41 = vsel %vm6506_vm0, %v1330_v20, %v1332_v49  ;;  %2677 = vrcp.f32 %v4825_v48  ;;  %v4850_v16 = vadd.f32 %v1383_v9, %v1375_v46  ;;  %v1362_v63 = vsel %vm6754_vm15, %v1354_v8, %v1356_v17 }
 0x38a   : > { %v1378_v55 = vadd.f32 %v1346_v22, %v1322_v21  ;;  %2679 = vrcp.f32 %v4832_v2  ;;  %v1358_v7 = vrot.slane %v4761_v62, 1  ;;  %v1368_v20 = vsel %vm3980_vm12, %v4763_v25, %v1364_v37 }
 0x38b   : > { %6753 = vst [vmem:[#allocation50_spill] sm:$0xff] %v4850_v16  ;;  %2681 = vrcp.f32 %v4840_v19  ;;  %v1348_v27 = vsel %vm4002_vm14, %v1324_v53, %v1338_v41  ;;  %v4864_v9 = vadd.f32 %v1376_v24, %v1368_v20  ;;  %v1370_v8 = vsel %vm3920_vm11, %v1322_v21, %v1362_v63 }
 0x38c   : > { %vm6491_vm2 = vcmp.eq.f32.partialorder %v4850_v16, 0.0  ;;  %v4869_v14 = vadd.f32 %v1378_v55, %v1370_v8  ;;  %v1360_v22 = vsel %vm6757_vm3, %v1356_v17, %v1358_v7  ;;  %v1380_v46 = vadd.f32 %v1348_v27, %v1324_v53 }
 0x38d   : > { %6755 = vst [vmem:[#allocation43_spill] sm:$0xff] %v4864_v9  ;;  %v1336_v25 = vsel %vm6506_vm0, %v1332_v49, %v1334_v52  ;;  %v4882_v24 = vsel %vm6491_vm2, 1.0, %v4850_v16  ;;  %vm6492_vm1 = vcmp.eq.f32.partialorder %v4864_v9, 0.0  ;;  %vm6758_vm15 = vcmp.lt.s32.totalorder %v3019_v40, 1 }
 0x38e   : > { %6756 = vst [vmem:[#allocation49_spill] sm:$0xff] %v4869_v14  ;;  %vm6501_vm3 = vcmp.eq.f32.partialorder %v4869_v14, 0.0  ;;  %v1372_v17 = vsel %vm4059_vm5, %v1324_v53, %v1360_v22  ;;  %v1350_v49 = vsel %vm3987_vm7, %v4761_v62, %v1336_v25  ;;  %vm6760_vm2 = vmmov %vm6758_vm15  ;;  %2683 = vrcp.f32 %v4882_v24 }
 0x38f   : > { %v4892_v52 = vadd.f32 %v1380_v46, %v1372_v17  ;;  %v4905_v55 = vsel %vm6492_vm1, 1.0, %v4864_v9  ;;  %v4914_v8 = vsel %vm6501_vm3, 1.0, %v4869_v14  ;;  %vm6763_vm8 = vcmp.lt.s32.totalorder %v2983_v11, 7 }
 0x390   : > { %v1366_v46 = vsel %vm6763_vm8, %v1358_v7, %v1352_v34  ;;  %v1382_v25 = vadd.f32 %v1350_v49, %v4761_v62  ;;  %2685 = vrcp.f32 %v4905_v55  ;;  %vm6764_vm8 = vmmov %vm6760_vm2 }
 0x391   : > { %6759 = vst [vmem:[#allocation29_spill] sm:$0xff] %v4892_v52  ;;  %2687 = vrcp.f32 %v4914_v8 }
 0x396   : > { %v4721_v39 = vpop.permute.xlu1 %1098 }
 0x39f   : > { %v4743_v45 = vpop.permute.xlu0 %1096 }
 0x3a5   : > { %v4765_v47 = vpop.permute.xlu1 %1102 }
 0x3a9   : > { %v4778_v58 = vpop.permute.xlu0 %1100  ;;  %v4795_v38 = vpop.permute.xlu1 %1130 }
 0x3ad   : > { %v4806_v13 = vpop.permute.xlu0 %1128 }
 0x3b8   : > { %v4820_v1 = vpop.permute.xlu1 %1090 }
 0x3b9   : > { %v1105_v41 = vsel %vm6760_vm2, %v4820_v1, %v4721_v39 }
 0x3ba   : > { %v1155_v17 = vadd.f32 %v1105_v41, %v4306_v23  ;;  %v1374_v41 = vsel %vm3996_vm4, %v4761_v62, %v1366_v46 }
 0x3be   : > { %v4847_v61 = vpop.permute.xlu0 %1088 }
 0x3bf   : > { %v1104_v21 = vsel %vm6758_vm15, %v4847_v61, %v4743_v45  ;;  %vm6761_vm15 = vcmp.lt.s32.totalorder %v3019_v40, 127 }
 0x3c0   : > { %v1153_v53 = vadd.f32 %v1104_v21, %v4379_v32  ;;  %vm6762_vm1 = vmmov %vm6761_vm15  ;;  %v4927_v21 = vpop.eup %2677 }
 0x3c1   : > { %v4934_v9 = vpop.eup %2679 }
 0x3c2   : > { %v4937_v16 = vpop.eup %2681  ;;  %v1419_v62 = vmul.f32 %v4934_v9, %v4832_v2  ;;  %v1108_v2 = vsel %vm6764_vm8, %v4743_v45, %v4847_v61 }
 0x3c5   : > { %v4862_v18 = vpop.permute.xlu1 %1094 }
 0x3c6   : > { %v1107_v22 = vsel %vm6760_vm2, %v4862_v18, %v4765_v47  ;;  %vm6765_vm2 = vmmov %vm6762_vm1 }
 0x3c7   : > { %v1159_v34 = vadd.f32 %v1107_v22, %v4421_v59  ;;  %v4958_v22 = vadd.f32 %v1382_v25, %v1374_v41 }
 0x3c9   : > { %v4877_v37 = vpop.permute.xlu1 %1122 }
 0x3ca   : > { %v4873_v31 = vpop.permute.xlu0 %1092  ;;  %v1141_v32 = vsel %vm6762_vm1, %v4795_v38, %v4877_v37 }
 0x3cb   : > { %v1106_v23 = vsel %vm6764_vm8, %v4873_v31, %v4778_v58  ;;  %v4944_v7 = vadd.f32 %v1155_v17, %v1141_v32 }
 0x3cc   : > { %v1157_v46 = vadd.f32 %v1106_v23, %v4445_v51 }
 0x3cd   : > { %v1127_v27 = vpop.permute.xlu1 %1126  ;;  %v6505_v5 = vrot.slane %v4944_v7, 7  ;;  %v1195_v45 = vrot.slane %v4944_v7, 1 }
 0x3ce   : > { %v1121_v63 = vpop.permute.xlu0 %1120 }
 0x3cf   : > { %v1140_v20 = vsel %vm6761_vm15, %v4806_v13, %v1121_v63  ;;  %vm6500_vm15 = vcmp.eq.f32.partialorder %v4892_v52, 0.0 }
 0x3d0   : > { %v4930_v14 = vadd.f32 %v1153_v53, %v1140_v20  ;;  %v1417_v20 = vmul.f32 %v4927_v21, %v4825_v48  ;;  %v4956_v59 = vsel %vm6500_vm15, 1.0, %v4892_v52  ;;  %v4968_v48 = vmul.f32 %v4937_v16, %v4840_v19 }
 0x3d1   : > { %v1135_v49 = vpop.permute.xlu1 %1134  ;;  %2689 = vrcp.f32 %v4956_v59 }
 0x3d2   : > { %v1125_v15 = vpop.permute.xlu0 %1124  ;;  %v1143_v53 = vsel %vm6762_vm1, %v1135_v49, %v1127_v27  ;;  %v1169_v32 = vrot.slane %v4930_v14, 7  ;;  %vm6502_vm1 = vcmp.eq.f32.partialorder %v4958_v22, 0.0  ;;  %v6503_v19 = vrot.slane %v4930_v14, 1 }
 0x3d3   : > { %v4961_v17 = vadd.f32 %v1159_v34, %v1143_v53  ;;  %v1425_v34 = vsub.f32 2.0, %v1417_v20  ;;  %v1427_v53 = vsub.f32 2.0, %v1419_v62 }
 0x3d4   : > { %v1181_v41 = vsel %vm6506_vm0, %v1169_v32, %v6505_v5 }
 0x3d5   : > { %v6499_v52 = vrot.slane %v4961_v17, 7  ;;  %v1433_v5 = vmul.f32 %v4927_v21, %v1425_v34  ;;  %v6783_v21 = vrot.slane %v4944_v7, 7 }
 0x3d6   : > { %v1133_v4 = vpop.permute.xlu0 %1132 }
 0x3d7   : > { %v1142_v25 = vsel %vm6765_vm2, %v1133_v4, %v1125_v15  ;;  %v1183_v23 = vsel %vm6506_vm0, %v6499_v52, %v1169_v32  ;;  %vm6766_vm2 = vmmov %vm6764_vm8  ;;  %vm6767_vm8 = vcmp.eq.s32.totalorder %v3019_v40, 8 }
 0x3d8   : > { %v4979_v51 = vadd.f32 %v1157_v46, %v1142_v25  ;;  %v1185_v20 = vsel %vm3943_vm9, %v4930_v14, %v1183_v23  ;;  %v1429_v46 = vsub.f32 2.0, %v4968_v48  ;;  %v2684_v25 = vpop.eup %2683  ;;  %v1109_v52 = vsel %vm6766_vm2, %v4721_v39, %v4820_v1  ;;  %vm6768_vm15 = vmmov %vm6766_vm2 }
 0x3d9   : > { %v1112_v32 = vsel %vm6767_vm8, %v4552_v43, %v1108_v2  ;;  %v1111_v62 = vsel %vm6768_vm15, %v4765_v47, %v4862_v18  ;;  %v5011_v23 = vsel %vm6502_vm1, 1.0, %v4958_v22  ;;  %vm6769_vm3 = vmmov %vm6766_vm2  ;;  %vm6770_vm2 = vcmp.lt.s32.totalorder %v3019_v40, 127 }
 0x3da   : > { %v6504_v61 = vrot.slane %v4979_v51, 1  ;;  %v1110_v48 = vsel %vm6769_vm3, %v4778_v58, %v4873_v31  ;;  %v1137_v39 = vsel %vm6770_vm2, %v4877_v37, %v4795_v38  ;;  %v1187_v1 = vsel %vm3908_vm10, %v4944_v7, %v1181_v41  ;;  %vm6772_vm8 = vmmov %vm6770_vm2  ;;  %v5038_v37 = vpop.eup %2685 }
 0x3db   : > { %vm6771_vm15 = vcmp.lt.s32.totalorder %v2983_v11, 7  ;;  %v1136_v18 = vsel %vm6772_vm8, %v1121_v63, %v4806_v13  ;;  %vm6773_vm3 = vmmov %vm6770_vm2  ;;  %v1217_v38 = vadd.f32 %v1185_v20, %v4930_v14  ;;  %vm6775_vm1 = vcmp.eq.s32.totalorder %v3019_v40, 8 }
 0x3dc   : > { %v1203_v47 = vsel %vm6771_vm15, %v1195_v45, %v6504_v61  ;;  %v1139_v31 = vsel %vm6773_vm3, %v1127_v27, %v1135_v49  ;;  %vm6774_vm2 = vmmov %vm6771_vm15  ;;  %v1114_v2 = vsel %vm6775_vm1, %v4532_v36, %v1109_v52  ;;  %v1423_v63 = vmul.f32 %v2684_v25, %v4882_v24  ;;  %v5048_v27 = vpop.eup %2687 }
 0x3dd   : > { %v1205_v58 = vsel %vm6774_vm2, %v6503_v19, %v1195_v45  ;;  %v1211_v13 = vsel %vm3920_vm11, %v4944_v7, %v1203_v47  ;;  %2691 = vrcp.f32 %v5011_v23  ;;  %v1152_v49 = vadd.f32 %v1112_v32, %v4552_v43  ;;  %vm6776_vm15 = vmmov %vm6775_vm1 }
 0x3de   : > { %v1118_v41 = vsel %vm6776_vm15, %v4577_v26, %v1111_v62  ;;  %vm6777_vm8 = vmmov %vm6775_vm1  ;;  %v1219_v45 = vadd.f32 %v1187_v1, %v4944_v7  ;;  %vm6778_vm1 = vcmp.eq.s32.totalorder %v3019_v40, 103  ;;  %v1209_v62 = vsel %vm3980_vm12, %v4930_v14, %v1205_v58 }
 0x3df   : > { %v1116_v52 = vsel %vm6777_vm8, %v4590_v42, %v1110_v48  ;;  %v1146_v24 = vsel %vm6778_vm1, %v4532_v36, %v1137_v39  ;;  %vm6779_vm3 = vmmov %vm6778_vm1  ;;  %vm6781_vm15 = vcmp.lt.s32.totalorder %v3019_v40, 127  ;;  %v1173_v1 = vrot.slane %v4979_v51, 7 }
 0x3e0   : > { %v1144_v20 = vsel %vm6779_vm3, %v4552_v43, %v1136_v18  ;;  %vm6780_vm2 = vmmov %vm6778_vm1  ;;  %v1138_v48 = vsel %vm6781_vm15, %v1125_v15, %v1133_v4  ;;  %v1225_v47 = vadd.f32 %v1217_v38, %v1209_v62  ;;  %v1227_v19 = vadd.f32 %v1219_v45, %v1211_v13  ;;  %v5083_v4 = vpop.eup %2689 }
 0x3e1   : > { %v1150_v32 = vsel %vm6780_vm2, %v4577_v26, %v1139_v31  ;;  %v1154_v39 = vadd.f32 %v1114_v2, %v4532_v36  ;;  %v1158_v61 = vadd.f32 %v1118_v41, %v4577_v26  ;;  %v1431_v43 = vsub.f32 2.0, %v1423_v63  ;;  %vm6782_vm8 = vmmov %vm6778_vm1 }
 0x3e2   : > { %v1416_v18 = vmul.f32 %v5038_v37, %v4905_v55  ;;  %v5077_v31 = vadd.f32 %v1152_v49, %v1144_v20  ;;  %v1435_v58 = vmul.f32 %v4934_v9, %v1427_v53  ;;  %v1418_v15 = vmul.f32 %v5048_v27, %v4914_v8 }
 0x3e3   : > { %v1156_v38 = vadd.f32 %v1116_v52, %v4590_v42  ;;  %v5086_v36 = vadd.f32 %v1154_v39, %v1146_v24  ;;  %v5088_v26 = vadd.f32 %v1158_v61, %v1150_v32  ;;  %v1148_v55 = vsel %vm6782_vm8, %v4590_v42, %v1138_v48 }
 0x3e4   : > { %v1441_v2 = vmul.f32 %v1433_v5, %v1225_v47  ;;  %v1443_v13 = vmul.f32 %v1435_v58, %v1227_v19  ;;  %v1179_v9 = vsel %vm6506_vm0, %v6783_v21, %v1173_v1  ;;  %v6784_v8 = vrot.slane %v4961_v17, 7 }
 0x3e5   : > { %v1199_v53 = vrot.slane %v4961_v17, 1  ;;  %v1437_v61 = vmul.f32 %v4937_v16, %v1429_v46  ;;  %v1439_v63 = vmul.f32 %v2684_v25, %v1431_v43  ;;  %v1424_v49 = vsub.f32 2.0, %v1416_v18 }
 0x3e6   : > { %v1177_v34 = vsel %vm6506_vm0, %v1173_v1, %v6784_v8  ;;  %v1168_v42 = vrot.slane %v5077_v31, 7  ;;  %v5104_v5 = vadd.f32 %v1156_v38, %v1148_v55  ;;  %vm6785_vm1 = vcmp.eq.f32.partialorder %v6655_v56, 0.0  ;;  %v6795_v8 = vld [vmem:[#allocation44_spill] sm:$0xff] }
 0x3e7   : > { %vm1449_vm3 = vmor %vm6785_vm1, %vm1393_vm13  ;;  %v1426_v7 = vsub.f32 2.0, %v1418_v15  ;;  %v5112_v19 = vmul.f32 %v5083_v4, %v4956_v59  ;;  %v1192_v41 = vrot.slane %v5077_v31, 1  ;;  %v1174_v16 = vrot.slane %v5088_v26, 7 }
 0x3e8   : > { %vm6786_vm2 = vcmp.eq.f32.partialorder %v6643_v6, 0.0  ;;  %v1189_v50 = vsel %vm4002_vm14, %v4979_v51, %v1179_v9  ;;  %v1191_v56 = vsel %vm3987_vm7, %v4961_v17, %v1177_v34  ;;  %v1170_v59 = vrot.slane %v5086_v36, 7  ;;  %v6797_v34 = vld [vmem:[#allocation33_spill] sm:$0xff] }
 0x3e9   : > { %vm1451_vm15 = vmor %vm6786_vm2, %vm1395_vm6  ;;  %v1194_v46 = vrot.slane %v5086_v36, 1  ;;  %v5129_v25 = vsel %vm1449_vm3, %v4369_v35, %v1441_v2  ;;  %vm6787_vm13 = vcmp.eq.f32.partialorder %v6715_v29, 0.0  ;;  %vm6788_vm6 = vcmp.eq.f32.partialorder %v6716_v0, 0.0 }
 0x3ea   : > { %v5132_v33 = vsel %vm1451_vm15, %v4298_v44, %v1443_v13  ;;  %v5137_v6 = vsel %vm6787_vm13, %v5129_v25, 0.0  ;;  %v6789_v45 = vrot.slane %v4979_v51, 1  ;;  %vm6790_vm8 = vcmp.lt.s32.totalorder %v2983_v11, 7  ;;  %v2692_v20 = vpop.eup %2691 }
 0x3eb   : > { %v5142_v52 = vsel %vm6788_vm6, %v5132_v33, 0.0  ;;  %v6791_v35 = vrot.slane %v4930_v14, 1  ;;  %vm6792_vm1 = vmmov %vm6790_vm8  ;;  %v1196_v32 = vrot.slane %v5104_v5, 1  ;;  %1488 = vrot.lane.b32.xlu0 %v5137_v6, %s2837_s30  ;;  %v1221_v62 = vadd.f32 %v1189_v50, %v4979_v51 }
 0x3ec   : > { %v1201_v24 = vsel %vm6790_vm8, %v6789_v45, %v1199_v53  ;;  %1490 = vrot.lane.b32.xlu1 %v5142_v52, %s2837_s30  ;;  %v1223_v48 = vadd.f32 %v1191_v56, %v4961_v17  ;;  %v1432_v1 = vmul.f32 %v5038_v37, %v1424_v49  ;;  %v1182_v14 = vsel %vm6506_vm0, %v1174_v16, %v1168_v42  ;;  %vm6793_vm3 = vmmov %vm6792_vm1 }
 0x3ed   : > { %v1207_v44 = vsel %vm6792_vm1, %v1199_v53, %v6791_v35  ;;  %v1204_v47 = vsel %vm6793_vm3, %v1192_v41, %v1194_v46  ;;  %v1180_v39 = vsel %vm6506_vm0, %v1168_v42, %v1170_v59  ;;  %v1434_v43 = vmul.f32 %v5048_v27, %v1426_v7  ;;  %vm6794_vm2 = vmmov %vm6792_vm1  ;;  %v6799_v42 = vld [vmem:[#allocation50_spill] sm:$0xff]  ;;  %v6801_v7 = vld [vmem:[#allocation35_spill] sm:$0xff] }
 0x3ee   : > { %v1172_v18 = vrot.slane %v5104_v5, 7  ;;  %v1213_v58 = vsel %vm4059_vm5, %v4979_v51, %v1201_v24  ;;  %v1215_v37 = vsel %vm3996_vm4, %v4961_v17, %v1207_v44  ;;  %v1428_v15 = vsub.f32 2.0, %v5112_v19  ;;  %v6807_v35 = vld [vmem:[#allocation25_spill] sm:$0xff]  ;;  %v6809_v44 = vld [vmem:[#allocation27_spill] sm:$0xff] }
 0x3ef   : > { %v1198_v38 = vrot.slane %v5088_v26, 1  ;;  %v1229_v55 = vadd.f32 %v1221_v62, %v1213_v58  ;;  %v1231_v2 = vadd.f32 %v1223_v48, %v1215_v37  ;;  %v1422_v13 = vmul.f32 %v2692_v20, %v5011_v23 }
 0x3f0   : > { %v1184_v27 = vsel %vm3943_vm9, %v5077_v31, %v1182_v14  ;;  %v1208_v51 = vsel %vm3980_vm12, %v5077_v31, %v1204_v47  ;;  %v1186_v17 = vsel %vm3908_vm10, %v5086_v36, %v1180_v39  ;;  %v1202_v21 = vsel %vm6794_vm2, %v1194_v46, %v1196_v32  ;;  %v6805_v46 = vld [vmem:[#allocation39_spill] sm:$0xff] }
 0x3f1   : > { %v1445_v9 = vmul.f32 %v1437_v61, %v1229_v55  ;;  %vm6796_vm15 = vcmp.eq.f32.partialorder %v6795_v8, 0.0  ;;  %vm6798_vm13 = vcmp.eq.f32.partialorder %v6797_v34, 0.0  ;;  %v1447_v23 = vmul.f32 %v1439_v63, %v1231_v2  ;;  %v6803_v63 = vld [vmem:[#allocation51_spill] sm:$0xff]  ;;  %v6814_v2 = vld [vmem:[#allocation36_spill] sm:$0xff] }
 0x3f2   : > { %vm1453_vm6 = vmor %vm6798_vm13, %vm6796_vm15  ;;  %v1216_v53 = vadd.f32 %v1184_v27, %v5077_v31  ;;  %v1210_v49 = vsel %vm3920_vm11, %v5086_v36, %v1202_v21  ;;  %vm6800_vm8 = vcmp.eq.f32.partialorder %v6799_v42, 0.0  ;;  %vm6802_vm1 = vcmp.eq.f32.partialorder %v6801_v7, 0.0  ;;  %v6812_v55 = vld [vmem:[#allocation43_spill] sm:$0xff]  ;;  %v6816_v27 = vld [vmem:[#allocation49_spill] sm:$0xff] }
 0x3f3   : > { %vm1455_vm3 = vmor %vm6802_vm1, %vm6800_vm8  ;;  %v1218_v19 = vadd.f32 %v1186_v17, %v5086_v36  ;;  %v1178_v61 = vsel %vm6506_vm0, %v1170_v59, %v1172_v18  ;;  %v1200_v50 = vsel %vm6794_vm2, %v1196_v32, %v1198_v38  ;;  %v1176_v31 = vsel %vm6506_vm0, %v1172_v18, %v1174_v16  ;;  %v6826_v8 = vld [vmem:[#allocation32_spill] sm:$0xff]  ;;  %v6835_v42 = vld [vmem:[#allocation46_spill] sm:$0xff] }
 0x3f4   : > { %v5208_v56 = vsel %vm1453_vm6, %v6803_v63, %v1445_v9  ;;  %v5211_v45 = vsel %vm1455_vm3, %v6805_v46, %v1447_v23  ;;  %v1224_v24 = vadd.f32 %v1216_v53, %v1208_v51  ;;  %v1188_v36 = vsel %vm4002_vm14, %v5104_v5, %v1178_v61  ;;  %vm6811_vm6 = vmmov %vm6794_vm2  ;;  %v6820_v51 = vld [vmem:[#allocation52_spill] sm:$0xff]  ;;  %v6824_v9 = vld [vmem:[#allocation29_spill] sm:$0xff] }
 0x3f5   : > { %6804 = vst [vmem:[#allocation31_spill] sm:$0xff] %v5208_v56  ;;  %6806 = vst [vmem:[#allocation62_spill] sm:$0xff] %v5211_v45  ;;  %vm6808_vm15 = vcmp.eq.f32.partialorder %v6807_v35, 0.0  ;;  %vm6810_vm13 = vcmp.eq.f32.partialorder %v6809_v44, 0.0  ;;  %v1226_v32 = vadd.f32 %v1218_v19, %v1210_v49  ;;  %v1430_v62 = vsub.f32 2.0, %v1422_v13  ;;  %v6830_v23 = vld [vmem:[#allocation30_spill] sm:$0xff] }
 0x3f6   : > { %v5219_v59 = vsel %vm6808_vm15, %v5208_v56, 0.0  ;;  %v5224_v16 = vsel %vm6810_vm13, %v5211_v45, 0.0  ;;  %v1440_v48 = vmul.f32 %v1432_v1, %v1224_v24  ;;  %v1220_v14 = vadd.f32 %v1188_v36, %v5104_v5  ;;  %v6833_v49 = vld [vmem:[#allocation34_spill] sm:$0xff]  ;;  %v6837_v19 = vld [vmem:[#allocation37_spill] sm:$0xff]  ;;  %v6843_v46 = vld [vmem:[#allocation19_spill] sm:$0xff] }
 0x3f7   : > { %1492 = vrot.lane.b32.xlu0 %v5219_v59, %s2837_s30  ;;  %1494 = vrot.lane.b32.xlu1 %v5224_v16, %s2837_s30  ;;  %v1190_v47 = vsel %vm3987_vm7, %v5088_v26, %v1176_v31  ;;  %v1442_v39 = vmul.f32 %v1434_v43, %v1226_v32  ;;  %v1212_v18 = vsel %vm4059_vm5, %v5104_v5, %v1200_v50  ;;  %vm6813_vm8 = vcmp.eq.f32.partialorder %v6812_v55, 0.0  ;;  %v6818_v5 = vld [vmem:[#allocation38_spill] sm:$0xff]  ;;  %v6839_v50 = vld [vmem:[#allocation24_spill] sm:$0xff]  ;;  %v6845_v36 = vld [vmem:[#allocation17_spill] sm:$0xff] }
 0x3f8   : > { %v1206_v58 = vsel %vm6811_vm6, %v1198_v38, %v1192_v41  ;;  %v1222_v37 = vadd.f32 %v1190_v47, %v5088_v26  ;;  %vm6815_vm1 = vcmp.eq.f32.partialorder %v6814_v2, 0.0  ;;  %v1228_v1 = vadd.f32 %v1220_v14, %v1212_v18  ;;  %v6844_v24 = vld [vmem:[#allocation22_spill] sm:$0xff]  ;;  %v6846_v32 = vld [vmem:[#allocation20_spill] sm:$0xff] }
 0x3f9   : > { %vm1448_vm3 = vmor %vm6815_vm1, %vm6813_vm8  ;;  %v1436_v13 = vmul.f32 %v5083_v4, %v1428_v15  ;;  %v1214_v43 = vsel %vm3996_vm4, %v5088_v26, %v1206_v58  ;;  %vm6817_vm2 = vcmp.eq.f32.partialorder %v6816_v27, 0.0  ;;  %vm6819_vm15 = vcmp.eq.f32.partialorder %v6818_v5, 0.0  ;;  %v6822_v4 = vld [vmem:[#allocation42_spill] sm:$0xff]  ;;  %v6852_v18 = vld [vmem:[#allocation16_spill] sm:$0xff] }
 0x3fa   : > { %vm1450_vm13 = vmor %vm6819_vm15, %vm6817_vm2  ;;  %v1230_v41 = vadd.f32 %v1222_v37, %v1214_v43  ;;  %v1438_v38 = vmul.f32 %v2692_v20, %v1430_v62  ;;  %v5257_v17 = vsel %vm1448_vm3, %v6820_v51, %v1440_v48  ;;  %vm6825_vm6 = vcmp.eq.f32.partialorder %v6824_v9, 0.0  ;;  %v6828_v20 = vld [vmem:[#allocation28_spill] sm:$0xff]  ;;  %v6853_v58 = vld [vmem:[#allocation21_spill] sm:$0xff]  ;;  %v2583_v51 = vpop.permute.xlu0 %2582 }
 0x3fb   : > { %1520 = vrot.lane.b32.xlu0 %v5137_v6, %s2838_s26  ;;  %1522 = vrot.lane.b32.xlu1 %v5142_v52, %s2838_s26  ;;  %6821 = vst [vmem:[#allocation59_spill] sm:$0xff] %v5257_v17  ;;  %v5260_v15 = vsel %vm1450_vm13, %v6822_v4, %v1442_v39  ;;  %v1444_v26 = vmul.f32 %v1436_v13, %v1228_v1  ;;  %vm6827_vm8 = vcmp.eq.f32.partialorder %v6826_v8, 0.0  ;;  %vm6829_vm2 = vcmp.eq.f32.partialorder %v6828_v20, 0.0  ;;  %v6851_v39 = vld [vmem:[#allocation18_spill] sm:$0xff]  ;;  %v6855_v1 = vld [vmem:[#allocation23_spill] sm:$0xff] }
 0x3fc   : > { %6823 = vst [vmem:[#allocation60_spill] sm:$0xff] %v5260_v15  ;;  %v1446_v21 = vmul.f32 %v1438_v38, %v1230_v41  ;;  %vm1452_vm1 = vmor %vm6827_vm8, %vm6825_vm6  ;;  %v5269_v34 = vsel %vm6829_vm2, %v5257_v17, 0.0  ;;  %vm6831_vm15 = vcmp.eq.f32.partialorder %v6830_v23, 0.0  ;;  %vm6832_vm3 = vcmp.eq.f32.partialorder %v4958_v22, 0.0  ;;  %v6841_v22 = vld [vmem:[#allocation26_spill] sm:$0xff] }
 0x3fd   : > { %v5274_v53 = vsel %vm6831_vm15, %v5260_v15, 0.0  ;;  %vm6834_vm13 = vcmp.eq.f32.partialorder %v6833_v49, 0.0  ;;  %v5285_v7 = vsel %vm1452_vm1, %v6835_v42, %v1444_v26  ;;  %vm6840_vm6 = vcmp.eq.f32.partialorder %v6839_v50, 0.0  ;;  %v2588_v26 = vpop.permute.xlu1 %2587 }
 0x3fe   : > { %vm1454_vm0 = vmor %vm6834_vm13, %vm6832_vm3  ;;  %6836 = vst [vmem:[#allocation61_spill] sm:$0xff] %v5285_v7  ;;  %v5293_v31 = vsel %vm6840_vm6, %v5285_v7, 0.0  ;;  %vm6842_vm8 = vcmp.eq.f32.partialorder %v6841_v22, 0.0  ;;  %vm6534_vm1 = vcmp.eq.f32.partialorder %v6844_v24, 0.0  ;;  %vm6513_vm2 = vcmp.eq.f32.partialorder %v6845_v36, 0.0  ;;  %v2593_v4 = vpop.permute.xlu0 %2592 }
 0x3ff   : > { %1480 = vrot.lane.b32.xlu0 %v5269_v34, %s2837_s30  ;;  %1482 = vrot.lane.b32.xlu1 %v5274_v53, %s2837_s30  ;;  %v5288_v61 = vsel %vm1454_vm0, %v6837_v19, %v1446_v21  ;;  %vm6529_vm0 = vcmp.eq.f32.partialorder %v6843_v46, 0.0  ;;  %vm6511_vm15 = vcmp.eq.f32.partialorder %v6846_v32, 0.0  ;;  %v6847_v62 = vmov 0.0  }
 0x400   : > { %6838 = vst [vmem:[#allocation58_spill] sm:$0xff] %v5288_v61  ;;  %v5298_v63 = vsel %vm6842_vm8, %v5288_v61, 0.0  ;;  %v5319_v48 = vsel %vm6529_vm0, 1.0, %v6847_v62  ;;  %v5324_v14 = vsel %vm6534_vm1, 1.0, %v6847_v62  ;;  %v5329_v47 = vsel %vm6513_vm2, 1.0, %v6847_v62 }
 0x401   : > { %6848 = vst [vmem:[#allocation55_spill] sm:$0xff] %v5319_v48  ;;  %6849 = vst [vmem:[#allocation56_spill] sm:$0xff] %v5324_v14  ;;  %vm6530_vm3 = vcmp.eq.f32.partialorder %v6851_v39, 0.0  ;;  %vm6512_vm13 = vcmp.eq.f32.partialorder %v6852_v18, 0.0  ;;  %vm6516_vm6 = vcmp.eq.f32.partialorder %v6853_v58, 0.0  ;;  %v5341_v37 = vsel %vm6511_vm15, 1.0, %v6847_v62  ;;  %v2598_v9 = vpop.permute.xlu1 %2597 }
 0x402   : > { %6850 = vst [vmem:[#allocation57_spill] sm:$0xff] %v5329_v47  ;;  %6854 = vst [vmem:[#allocation44_spill] sm:$0xff] %v5341_v37  ;;  %v2621_v55 = vpack.i.bf16 %v5341_v37, %v5319_v48  ;;  %v2626_v2 = vpack.i.bf16 %v5324_v14, %v5329_v47  ;;  %vm6535_vm8 = vcmp.eq.f32.partialorder %v6855_v1, 0.0  ;;  %v5351_v13 = vsel %vm6530_vm3, 1.0, %v6847_v62  ;;  %v2603_v21 = vpop.permute.xlu0 %2602  ;;  %v6865_v48 = vld [vmem:[#allocation47_spill] sm:$0xff] }
 0x403   : > { %1484 = vrot.lane.b32.xlu0 %v5293_v31, %s2837_s30  ;;  %1486 = vrot.lane.b32.xlu1 %v5298_v63, %s2837_s30  ;;  %6856 = vst [vmem:[#allocation33_spill] sm:$0xff] %v5351_v13  ;;  %v5356_v43 = vsel %vm6512_vm13, 1.0, %v6847_v62  ;;  %v5361_v27 = vsel %vm6516_vm6, 1.0, %v6847_v62  ;;  %v5368_v5 = vsel %vm6535_vm8, 1.0, %v6847_v62  ;;  %v2595_v49 = vunpack.i.h.bf16 %v2593_v4 }
 0x404   : > { %6857 = vst [vmem:[#allocation50_spill] sm:$0xff] %v5356_v43  ;;  %6858 = vst [vmem:[#allocation35_spill] sm:$0xff] %v5361_v27  ;;  %v2631_v41 = vpack.i.bf16 %v5351_v13, %v5368_v5  ;;  %v2636_v38 = vpack.i.bf16 %v5361_v27, %v5356_v43  ;;  %v2594_v42 = vunpack.i.l.bf16 %v2593_v4  ;;  %v2585_v62 = vunpack.i.h.bf16 %v2583_v51  ;;  %v6864_v4 = vld [vmem:[#allocation40_spill] sm:$0xff] }
 0x405   : > { %6859 = vst [vmem:[#allocation51_spill] sm:$0xff] %v5368_v5  ;;  %v2608_v19 = vpop.permute.xlu1 %2607  ;;  %v2584_v27 = vunpack.i.l.bf16 %v2583_v51  ;;  %vm6860_vm15 = vcmp.lt.s32.totalorder %v3019_v40, 1  ;;  %vm6862_vm2 = vcmp.lt.s32.totalorder %v3019_v40, 127  ;;  %v2599_v32 = vunpack.i.l.bf16 %v2598_v9 }
 0x406   : > { %v2613_v8 = vpop.permute.xlu0 %2612  ;;  %vm6861_vm13 = vmmov %vm6860_vm15  ;;  %v2590_v18 = vunpack.i.h.bf16 %v2588_v26  ;;  %v2589_v61 = vunpack.i.l.bf16 %v2588_v26 }
 0x407   : > { %1512 = vrot.lane.b32.xlu0 %v5269_v34, %s2838_s26  ;;  %1514 = vrot.lane.b32.xlu1 %v5274_v53, %s2838_s26  ;;  %v2615_v43 = vunpack.i.h.bf16 %v2613_v8  ;;  %v2614_v13 = vunpack.i.l.bf16 %v2613_v8  ;;  %vm6863_vm6 = vmmov %vm6862_vm2  ;;  %v2600_v8 = vunpack.i.h.bf16 %v2598_v9 }
 0x409   : > { %v2618_v37 = vpop.permute.xlu1 %2617 }
 0x40a   : > { %v2620_v36 = vunpack.i.h.bf16 %v2618_v37 }
 0x40b   : > { %1516 = vrot.lane.b32.xlu0 %v5293_v31, %s2838_s26  ;;  %1518 = vrot.lane.b32.xlu1 %v5298_v63, %s2838_s26 }
 0x40f   : > { %1524 = vrot.lane.b32.xlu0 %v5219_v59, %s2838_s26  ;;  %1526 = vrot.lane.b32.xlu1 %v5224_v16, %s2838_s26 }
 0x413   : > { %2622 = vrot.lane.b32.xlu0 %v2621_v55, %s2837_s30  ;;  %2627 = vrot.lane.b32.xlu1 %v2626_v2, %s2837_s30 }
 0x417   : > { %2632 = vrot.lane.b32.xlu0 %v2631_v41, %s2837_s30  ;;  %2637 = vrot.lane.b32.xlu1 %v2636_v38, %s2837_s30 }
 0x41b   : > { %2642 = vrot.lane.b32.xlu0 %v2621_v55, %s2838_s26  ;;  %2647 = vrot.lane.b32.xlu1 %v2626_v2, %s2838_s26  ;;  %v1656_v55 = vsel %vm6860_vm15, %v2584_v27, %v2594_v42  ;;  %v1657_v2 = vsel %vm6861_vm13, %v2585_v62, %v2595_v49  ;;  %vm6866_vm15 = vmmov %vm6861_vm13 }
 0x41c   : > { %v1705_v5 = vadd.f32 %v6864_v4, %v1656_v55  ;;  %v1707_v51 = vadd.f32 %v6865_v48, %v1657_v2  ;;  %v1660_v22 = vsel %vm6866_vm15, %v2594_v42, %v2584_v27  ;;  %v2609_v55 = vunpack.i.l.bf16 %v2608_v19  ;;  %v6870_v27 = vld [vmem:[#allocation53_spill] sm:$0xff] }
 0x41d   : > { %v2610_v2 = vunpack.i.h.bf16 %v2608_v19  ;;  %vm6871_vm15 = vcmp.eq.s32.totalorder %v3019_v40, 8  ;;  %v6873_v42 = vld [vmem:[#allocation45_spill] sm:$0xff] }
 0x41e   : > { %v6875_v4 = vld [vmem:[#allocation41_spill] sm:$0xff] }
 0x41f   : > { %2652 = vrot.lane.b32.xlu0 %v2631_v41, %s2838_s26  ;;  %2657 = vrot.lane.b32.xlu1 %v2636_v38, %s2838_s26  ;;  %v2605_v41 = vunpack.i.h.bf16 %v2603_v21  ;;  %v2604_v38 = vunpack.i.l.bf16 %v2603_v21  ;;  %v2619_v21 = vunpack.i.l.bf16 %v2618_v37  ;;  %v1664_v37 = vsel %vm6871_vm15, %v6870_v27, %v1660_v22 }
 0x420   : > { %v1704_v58 = vadd.f32 %v6870_v27, %v1664_v37 }
 0x421   : > { %v1692_v47 = vsel %vm6862_vm2, %v2614_v13, %v2604_v38  ;;  %v1693_v14 = vsel %vm6863_vm6, %v2615_v43, %v2605_v41  ;;  %vm6867_vm2 = vmmov %vm6861_vm13 }
 0x422   : > { %v5390_v15 = vadd.f32 %v1705_v5, %v1692_v47  ;;  %v5392_v23 = vadd.f32 %v1707_v51, %v1693_v14  ;;  %v1658_v7 = vsel %vm6867_vm2, %v2589_v61, %v2599_v32  ;;  %vm6868_vm13 = vmmov %vm6867_vm2  ;;  %v1688_v47 = vsel %vm6863_vm6, %v2604_v38, %v2614_v13 }
 0x423   : > { %v1663_v48 = vsel %vm6868_vm13, %v2600_v8, %v2590_v18  ;;  %vm6869_vm0 = vmmov %vm6867_vm2  ;;  %v1709_v13 = vadd.f32 %v6875_v4, %v1658_v7  ;;  %v6883_v4 = vld [vmem:[#allocation63_spill] sm:$0xff] }
 0x424   : > { %v1721_v14 = vrot.slane %v5390_v15, 7  ;;  %v1723_v5 = vrot.slane %v5392_v23, 7  ;;  %v1659_v26 = vsel %vm6869_vm0, %v2590_v18, %v2600_v8  ;;  %vm6872_vm2 = vmmov %vm6863_vm6  ;;  %v6880_v8 = vld [vmem:[#allocation48_spill] sm:$0xff]  ;;  %v1747_v37 = vrot.slane %v5392_v23, 1 }
 0x425   : > { %v1694_v9 = vsel %vm6872_vm2, %v2619_v21, %v2609_v55  ;;  %vm6874_vm13 = vmmov %vm6871_vm15  ;;  %vm6879_vm15 = vcmp.eq.s32.totalorder %v3019_v40, 103  ;;  %v1711_v50 = vadd.f32 %v6880_v8, %v1659_v26 }
 0x426   : > { %v1670_v19 = vsel %vm6874_vm13, %v6873_v42, %v1663_v48  ;;  %vm6876_vm6 = vmmov %vm6869_vm0  ;;  %v1696_v22 = vsel %vm6879_vm15, %v6870_v27, %v1688_v47  ;;  %v5426_v48 = vadd.f32 %v1709_v13, %v1694_v9 }
 0x427   : > { %v1661_v38 = vsel %vm6876_vm6, %v2595_v49, %v2585_v62  ;;  %vm6877_vm3 = vmmov %vm6872_vm2  ;;  %v1710_v62 = vadd.f32 %v6873_v42, %v1670_v19  ;;  %v5443_v27 = vadd.f32 %v1704_v58, %v1696_v22  ;;  %v6886_v19 = vld [vmem:[#allocation54_spill] sm:$0xff] }
 0x428   : > { %v1691_v51 = vsel %vm6877_vm3, %v2610_v2, %v2620_v36  ;;  %vm6878_vm0 = vmmov %vm6872_vm2  ;;  %vm6881_vm2 = vcmp.lt.s32.totalorder %v2983_v11, 1  ;;  %vm6884_vm3 = vcmp.eq.s32.totalorder %v3019_v40, 8  ;;  %v1749_v9 = vrot.slane %v5426_v48, 1 }
 0x429   : > { %v1695_v18 = vsel %vm6878_vm0, %v2620_v36, %v2610_v2  ;;  %v1733_v7 = vsel %vm6881_vm2, %v1721_v14, %v1723_v5  ;;  %vm6882_vm13 = vmmov %vm6876_vm6  ;;  %v1666_v36 = vsel %vm6884_vm3, %v6883_v4, %v1661_v38  ;;  %v1689_v26 = vsel %vm6878_vm0, %v2605_v41, %v2615_v43 }
 0x42a   : > { %v1662_v49 = vsel %vm6882_vm13, %v2599_v32, %v2589_v61  ;;  %vm6885_vm6 = vmmov %vm6879_vm15  ;;  %v5439_v47 = vadd.f32 %v1711_v50, %v1695_v18  ;;  %v1739_v61 = vsel %vm3908_vm10, %v5392_v23, %v1733_v7  ;;  %v1725_v18 = vrot.slane %v5426_v48, 7 }
 0x42b   : > { %v1702_v2 = vsel %vm6885_vm6, %v6873_v42, %v1691_v51  ;;  %vm6887_vm15 = vmmov %vm6884_vm3  ;;  %v1706_v42 = vadd.f32 %v6883_v4, %v1666_v36  ;;  %vm6890_vm3 = vcmp.lt.s32.totalorder %v2983_v11, 7  ;;  %v1771_v13 = vadd.f32 %v1739_v61, %v5392_v23 }
 0x42c   : > { %v5449_v32 = vadd.f32 %v1710_v62, %v1702_v2  ;;  %v1668_v50 = vsel %vm6887_vm15, %v6886_v19, %v1662_v49  ;;  %vm6888_vm2 = vmmov %vm6878_vm0  ;;  %v1755_v41 = vsel %vm6890_vm3, %v1747_v37, %v1749_v9  ;;  %v1727_v38 = vrot.slane %v5439_v47, 7 }
 0x42d   : > { %v1690_v58 = vsel %vm6888_vm2, %v2609_v55, %v2619_v21  ;;  %vm6889_vm13 = vmmov %vm6885_vm6  ;;  %v1720_v51 = vrot.slane %v5443_v27, 7  ;;  %vm6891_vm0 = vcmp.lt.s32.totalorder %v2983_v11, 1  ;;  %v1708_v7 = vadd.f32 %v6886_v19, %v1668_v50 }
 0x42e   : > { %v1698_v43 = vsel %vm6889_vm13, %v6883_v4, %v1689_v26  ;;  %v1700_v22 = vsel %vm6885_vm6, %v6886_v19, %v1690_v58  ;;  %v1735_v55 = vsel %vm6891_vm0, %v1727_v38, %v1721_v14  ;;  %v1726_v8 = vrot.slane %v5449_v32, 7  ;;  %vm6892_vm15 = vmmov %vm6891_vm0 }
 0x42f   : > { %v5470_v21 = vadd.f32 %v1706_v42, %v1698_v43  ;;  %v1763_v4 = vsel %vm3920_vm11, %v5392_v23, %v1755_v41  ;;  %v1731_v36 = vsel %vm6892_vm15, %v1723_v5, %v1725_v18  ;;  %v1745_v26 = vrot.slane %v5390_v15, 1  ;;  %vm6893_vm2 = vmmov %vm6891_vm0 }
 0x430   : > { %v5485_v2 = vadd.f32 %v1771_v13, %v1763_v4  ;;  %v1734_v14 = vsel %vm6893_vm2, %v1726_v8, %v1720_v51  ;;  %v5490_v61 = vadd.f32 %v1708_v7, %v1700_v22  ;;  %v1737_v19 = vsel %vm3943_vm9, %v5390_v15, %v1735_v55  ;;  %vm6894_vm13 = vmmov %vm6891_vm0 }
 0x431   : > { %v1751_v50 = vrot.slane %v5439_v47, 1  ;;  %v1729_v23 = vsel %vm6894_vm13, %v1725_v18, %v1727_v38  ;;  %v1741_v5 = vsel %vm4002_vm14, %v5426_v48, %v1731_v36  ;;  %v1744_v42 = vrot.slane %v5443_v27, 1 }
 0x432   : > { %v1746_v58 = vrot.slane %v5470_v21, 1  ;;  %v1736_v43 = vsel %vm3943_vm9, %v5443_v27, %v1734_v14  ;;  %v1722_v41 = vrot.slane %v5470_v21, 7  ;;  %vm1787_vm3 = vcmp.eq.f32.partialorder %v5485_v2, 0.0 }
 0x433   : > { %vm6895_vm6 = vcmp.lt.s32.totalorder %v2983_v11, 7  ;;  %v1769_v38 = vadd.f32 %v1737_v19, %v5390_v15  ;;  %v1743_v18 = vsel %vm3987_vm7, %v5439_v47, %v1729_v23  ;;  %v1773_v4 = vadd.f32 %v1741_v5, %v5426_v48 }
 0x434   : > { %v1757_v13 = vsel %vm6895_vm6, %v1745_v26, %v1747_v37  ;;  %vm6896_vm0 = vmmov %vm6895_vm6  ;;  %v1724_v37 = vrot.slane %v5490_v61, 7  ;;  %v1768_v19 = vadd.f32 %v1736_v43, %v5443_v27  ;;  %v1775_v45 = vadd.f32 %v1743_v18, %v5439_v47 }
 0x435   : > { %v1753_v7 = vsel %vm6896_vm0, %v1749_v9, %v1751_v50  ;;  %vm6897_vm15 = vmmov %vm6896_vm0  ;;  %v1761_v23 = vsel %vm3980_vm12, %v5390_v15, %v1757_v13 }
 0x436   : > { %v1759_v36 = vsel %vm6897_vm15, %v1751_v50, %v1745_v26  ;;  %vm6898_vm2 = vmmov %vm6896_vm0  ;;  %v1730_v9 = vsel %vm6894_vm13, %v1722_v41, %v1724_v37  ;;  %v5536_v26 = vsel %vm1787_vm3, 1.0, %v5485_v2  ;;  %v5538_v50 = vadd.f32 %v1769_v38, %v1761_v23 }
 0x437   : > { %v1756_v14 = vsel %vm6898_vm2, %v1744_v42, %v1746_v58  ;;  %v1765_v5 = vsel %vm4059_vm5, %v5426_v48, %v1753_v7  ;;  %v1767_v15 = vsel %vm3996_vm4, %v5439_v47, %v1759_v36  ;;  %v1748_v38 = vrot.slane %v5490_v61, 1  ;;  %vm6901_vm15 = vmmov %vm6898_vm2 }
 0x438   : > { %v5550_v18 = vadd.f32 %v1773_v4, %v1765_v5  ;;  %v1760_v44 = vsel %vm3980_vm12, %v5443_v27, %v1756_v14  ;;  %v1750_v23 = vrot.slane %v5449_v32, 1  ;;  %v1740_v48 = vsel %vm4002_vm14, %v5490_v61, %v1730_v9  ;;  %vm6902_vm2 = vmmov %vm6894_vm13 }
 0x439   : > { %v5557_v46 = vadd.f32 %v1768_v19, %v1760_v44  ;;  %2693 = vrcp.f32 %v5536_v26  ;;  %v5563_v47 = vadd.f32 %v1775_v45, %v1767_v15  ;;  %vm1785_vm6 = vcmp.eq.f32.partialorder %v5538_v50, 0.0  ;;  %vm6903_vm1 = vmmov %vm6902_vm2 }
 0x43a   : > { %vm1789_vm0 = vcmp.eq.f32.partialorder %v5550_v18, 0.0  ;;  %v1752_v44 = vsel %vm6901_vm15, %v1748_v38, %v1750_v23  ;;  %v1772_v27 = vadd.f32 %v1740_v48, %v5490_v61  ;;  %v1728_v36 = vsel %vm6902_vm2, %v1724_v37, %v1726_v8 }
 0x43b   : > { %6899 = vst [vmem:[#allocation39_spill] sm:$0xff] %v5557_v46  ;;  %6900 = vst [vmem:[#allocation25_spill] sm:$0xff] %v5563_v47  ;;  %vm1784_vm13 = vcmp.eq.f32.partialorder %v5557_v46, 0.0  ;;  %v1732_v45 = vsel %vm6903_vm1, %v1720_v51, %v1722_v41  ;;  %v5582_v14 = vsel %vm1785_vm6, 1.0, %v5538_v50  ;;  %vm6539_vm8 = vcmp.eq.f32.partialorder %v5563_v47, 0.0 }
 0x43c   : > { %v5588_v19 = vsel %vm1789_vm0, 1.0, %v5550_v18  ;;  %v1764_v8 = vsel %vm4059_vm5, %v5490_v61, %v1752_v44  ;;  %v1742_v51 = vsel %vm3987_vm7, %v5449_v32, %v1728_v36  ;;  %v5601_v9 = vsel %vm1784_vm13, 1.0, %v5557_v46  ;;  %vm6905_vm1 = vmmov %vm6901_vm15  ;;  %v6953_v18 = vld [vmem:[#allocation28_spill] sm:$0xff] }
 0x43d   : > { %v5603_v5 = vadd.f32 %v1772_v27, %v1764_v8  ;;  %v1758_v15 = vsel %vm6905_vm1, %v1750_v23, %v1744_v42  ;;  %v1738_v61 = vsel %vm3908_vm10, %v5470_v21, %v1732_v45  ;;  %2695 = vrcp.f32 %v5582_v14 }
 0x43e   : > { %v5614_v48 = vsel %vm6539_vm8, 1.0, %v5563_v47  ;;  %vm6906_vm15 = vcmp.lt.s32.totalorder %v3019_v40, 1  ;;  %2697 = vrcp.f32 %v5588_v19  ;;  %v1774_v23 = vadd.f32 %v1742_v51, %v5449_v32 }
 0x43f   : > { %6904 = vst [vmem:[#allocation43_spill] sm:$0xff] %v5603_v5  ;;  %vm6907_vm2 = vmmov %vm6906_vm15  ;;  %2699 = vrcp.f32 %v5601_v9  ;;  %v1766_v27 = vsel %vm3996_vm4, %v5449_v32, %v1758_v15  ;;  %v1754_v36 = vsel %vm6905_vm1, %v1746_v58, %v1748_v38  ;;  %v1770_v45 = vadd.f32 %v1738_v61, %v5470_v21 }
 0x440   : > { %2701 = vrcp.f32 %v5614_v48  ;;  %v5643_v58 = vadd.f32 %v1774_v23, %v1766_v27  ;;  %v1762_v38 = vsel %vm3920_vm11, %v5470_v21, %v1754_v36 }
 0x442   : > { %6910 = vst [vmem:[#allocation36_spill] sm:$0xff] %v5643_v58 }
 0x446   : > { %v2694_v15 = vpop.eup %2693 }
 0x45d   : > { %v5476_v49 = vpop.permute.xlu0 %1488 }
 0x45e   : > { %v5478_v62 = vpop.permute.xlu1 %1490 }
 0x469   : > { %v5514_v22 = vpop.permute.xlu0 %1492  ;;  %v5516_v55 = vpop.permute.xlu1 %1494 }
 0x46d   : > { %v5546_v43 = vpop.permute.xlu0 %1520  ;;  %v5548_v13 = vpop.permute.xlu1 %1522 }
 0x471   : > { %v5566_v7 = vpop.permute.xlu0 %1480  ;;  %v5568_v4 = vpop.permute.xlu1 %1482 }
 0x472   : > { %v1496_v44 = vsel %vm6906_vm15, %v5566_v7, %v5476_v49  ;;  %v1497_v42 = vsel %vm6907_vm2, %v5568_v4, %v5478_v62  ;;  %vm6540_vm15 = vcmp.eq.f32.partialorder %v5603_v5, 0.0  ;;  %vm6908_vm2 = vcmp.lt.s32.totalorder %v3019_v40, 127 }
 0x473   : > { %v1545_v17 = vadd.f32 %v1496_v44, %v5137_v6  ;;  %v1547_v51 = vadd.f32 %v1497_v42, %v5142_v52  ;;  %vm6909_vm8 = vmmov %vm6908_vm2  ;;  %v5652_v52 = vadd.f32 %v1770_v45, %v1762_v38  ;;  %v5659_v20 = vsel %vm6540_vm15, 1.0, %v5603_v5  ;;  %v5686_v5 = vpop.eup %2695 }
 0x474   : > { %2703 = vrcp.f32 %v5659_v20 }
 0x475   : > { %v5596_v41 = vpop.permute.xlu0 %1484  ;;  %v1487_v37 = vpop.permute.xlu1 %1486  ;;  %vm6548_vm15 = vcmp.eq.f32.partialorder %v5652_v52, 0.0 }
 0x479   : > { %v1513_v8 = vpop.permute.xlu0 %1512  ;;  %v1515_v47 = vpop.permute.xlu1 %1514 }
 0x47a   : > { %v1532_v39 = vsel %vm6908_vm2, %v5546_v43, %v1513_v8  ;;  %v1533_v32 = vsel %vm6909_vm8, %v5548_v13, %v1515_v47  ;;  %vm6911_vm8 = vcmp.lt.s32.totalorder %v3019_v40, 1  ;;  %vm6547_vm2 = vcmp.eq.f32.partialorder %v5643_v58, 0.0 }
 0x47b   : > { %v5648_v61 = vadd.f32 %v1545_v17, %v1532_v39  ;;  %v5650_v6 = vadd.f32 %v1547_v51, %v1533_v32  ;;  %v1498_v21 = vsel %vm6911_vm8, %v5596_v41, %v5514_v22  ;;  %vm6912_vm1 = vmmov %vm6911_vm8  ;;  %v1811_v39 = vmul.f32 %v2694_v15, %v5536_v26 }
 0x47c   : > { %v1499_v17 = vsel %vm6912_vm1, %v1487_v37, %v5516_v55  ;;  %v1549_v36 = vadd.f32 %v1498_v21, %v5219_v59  ;;  %vm6913_vm8 = vcmp.lt.s32.totalorder %v3019_v40, 127  ;;  %v5684_v27 = vsel %vm6547_vm2, 1.0, %v5643_v58  ;;  %v5697_v21 = vpop.eup %2697 }
 0x47d   : > { %v5654_v44 = vpop.permute.xlu0 %1516  ;;  %v1519_v42 = vpop.permute.xlu1 %1518  ;;  %v1561_v23 = vrot.slane %v5648_v61, 7  ;;  %v1551_v45 = vadd.f32 %v1499_v17, %v5224_v16  ;;  %vm6914_vm1 = vmmov %vm6913_vm8  ;;  %v5695_v16 = vsel %vm6548_vm15, 1.0, %v5652_v52  ;;  %v6915_v17 = vrot.slane %v5650_v6, 7 }
 0x47e   : > { %v1819_v58 = vsub.f32 2.0, %v1811_v39  ;;  %v5703_v3 = vpop.eup %2699  ;;  %2705 = vrcp.f32 %v5684_v27 }
 0x47f   : > { %2707 = vrcp.f32 %v5695_v16 }
 0x481   : > { %v1525_v51 = vpop.permute.xlu0 %1524  ;;  %v1527_v32 = vpop.permute.xlu1 %1526 }
 0x482   : > { %v1534_v26 = vsel %vm6913_vm8, %v1525_v51, %v5654_v44  ;;  %v1535_v38 = vsel %vm6914_vm1, %v1527_v32, %v1519_v42  ;;  %vm6916_vm8 = vcmp.lt.s32.totalorder %v2983_v11, 1  ;;  %vm6917_vm1 = vcmp.lt.s32.totalorder %v3019_v40, 1 }
 0x483   : > { %v5688_v46 = vadd.f32 %v1549_v36, %v1534_v26  ;;  %v5690_v59 = vadd.f32 %v1551_v45, %v1535_v38  ;;  %v1573_v56 = vsel %vm6916_vm8, %v1561_v23, %v6915_v17  ;;  %v1500_v36 = vsel %vm6917_vm1, %v5476_v49, %v5566_v7  ;;  %vm6918_vm2 = vmmov %vm6917_vm1  ;;  %v5714_v38 = vpop.eup %2701 }
 0x484   : > { %v1503_v45 = vsel %vm6918_vm2, %v5516_v55, %v1487_v37  ;;  %vm6919_vm8 = vmmov %vm6917_vm1  ;;  %v1587_v17 = vrot.slane %v5650_v6, 1  ;;  %v1809_v49 = vmul.f32 %v5686_v5, %v5582_v14  ;;  %vm6920_vm2 = vcmp.lt.s32.totalorder %v3019_v40, 127 }
 0x485   : > { %v6549_v26 = vrot.slane %v5688_v46, 1  ;;  %v1501_v39 = vsel %vm6919_vm8, %v5478_v62, %v5568_v4  ;;  %v1528_v55 = vsel %vm6920_vm2, %v1513_v8, %v5546_v43  ;;  %vm6921_vm1 = vmmov %vm6920_vm2  ;;  %v1567_v37 = vrot.slane %v5690_v59, 7 }
 0x486   : > { %v1531_v7 = vsel %vm6921_vm1, %v1519_v42, %v1527_v32  ;;  %v1579_v62 = vsel %vm3908_vm10, %v5650_v6, %v1573_v56  ;;  %vm6922_vm8 = vcmp.eq.s32.totalorder %v3019_v40, 8  ;;  %vm6924_vm2 = vcmp.lt.s32.totalorder %v2983_v11, 7 }
 0x487   : > { %v1504_v4 = vsel %vm6922_vm8, %v5269_v34, %v1500_v36  ;;  %vm6923_vm15 = vmmov %vm6922_vm8  ;;  %v1595_v43 = vsel %vm6924_vm2, %v1587_v17, %v6549_v26  ;;  %v1813_v8 = vmul.f32 %v5697_v21, %v5588_v19  ;;  %v1529_v56 = vsel %vm6921_vm1, %v1515_v47, %v5548_v13 }
 0x488   : > { %v1510_v14 = vsel %vm6923_vm15, %v5298_v63, %v1503_v45  ;;  %v1603_v42 = vsel %vm3920_vm11, %v5650_v6, %v1595_v43  ;;  %v1808_v32 = vmul.f32 %v5703_v3, %v5601_v9  ;;  %v1815_v36 = vmul.f32 %v5714_v38, %v5614_v48  ;;  %vm6925_vm15 = vmmov %vm6922_vm8 }
 0x489   : > { %v1506_v45 = vsel %vm6925_vm15, %v5274_v53, %v1501_v39  ;;  %vm6926_vm8 = vcmp.eq.s32.totalorder %v3019_v40, 103  ;;  %v1611_v47 = vadd.f32 %v1579_v62, %v5650_v6  ;;  %v1544_v43 = vadd.f32 %v1504_v4, %v5269_v34  ;;  %v5779_v4 = vpop.eup %2703 }
 0x48a   : > { %v1536_v19 = vsel %vm6926_vm8, %v5269_v34, %v1528_v55  ;;  %vm6927_vm2 = vmmov %vm6926_vm8  ;;  %vm6928_vm1 = vcmp.lt.s32.totalorder %v3019_v40, 1  ;;  %v1550_v48 = vadd.f32 %v1510_v14, %v5298_v63  ;;  %vm6929_vm15 = vcmp.lt.s32.totalorder %v2983_v11, 1 }
 0x48b   : > { %v1542_v13 = vsel %vm6927_vm2, %v5298_v63, %v1531_v7  ;;  %v1502_v9 = vsel %vm6928_vm1, %v5514_v22, %v5596_v41  ;;  %v1575_v39 = vsel %vm6929_vm15, %v1567_v37, %v1561_v23  ;;  %v1585_v55 = vrot.slane %v5648_v61, 1  ;;  %vm6930_vm8 = vmmov %vm6927_vm2 }
 0x48c   : > { %v1538_v7 = vsel %vm6930_vm8, %v5274_v53, %v1529_v56  ;;  %v1619_v62 = vadd.f32 %v1611_v47, %v1603_v42  ;;  %v1827_v34 = vmul.f32 %v2694_v15, %v1819_v58  ;;  %v1546_v26 = vadd.f32 %v1506_v45, %v5274_v53  ;;  %vm6933_vm15 = vmmov %vm6930_vm8 }
 0x48d   : > { %v5782_v22 = vadd.f32 %v1544_v43, %v1536_v19  ;;  %vm6931_vm2 = vcmp.lt.s32.totalorder %v3019_v40, 127  ;;  %v5787_v41 = vadd.f32 %v1550_v48, %v1542_v13  ;;  %vm6932_vm1 = vcmp.eq.s32.totalorder %v3019_v40, 8 }
 0x48e   : > { %v1530_v63 = vsel %vm6931_vm2, %v5654_v44, %v1525_v51  ;;  %v1508_v23 = vsel %vm6932_vm1, %v5293_v31, %v1502_v9  ;;  %v1565_v14 = vrot.slane %v5688_v46, 7  ;;  %v1577_v58 = vsel %vm3943_vm9, %v5648_v61, %v1575_v39 }
 0x48f   : > { %v1817_v15 = vsub.f32 2.0, %v1809_v49  ;;  %v5796_v53 = vadd.f32 %v1546_v26, %v1538_v7  ;;  %v1821_v56 = vsub.f32 2.0, %v1813_v8  ;;  %v1816_v42 = vsub.f32 2.0, %v1808_v32 }
 0x490   : > { %v1823_v45 = vsub.f32 2.0, %v1815_v36  ;;  %v1540_v44 = vsel %vm6933_vm15, %v5293_v31, %v1530_v63  ;;  %v1835_v51 = vmul.f32 %v1827_v34, %v1619_v62  ;;  %vm6934_vm8 = vcmp.lt.s32.totalorder %v2983_v11, 7  ;;  %v5815_v36 = vpop.eup %2705 }
 0x491   : > { %v1597_v19 = vsel %vm6934_vm8, %v1585_v55, %v1587_v17  ;;  %v1812_v13 = vmul.f32 %v5779_v4, %v5659_v20  ;;  %v1548_v49 = vadd.f32 %v1508_v23, %v5293_v31  ;;  %v1560_v26 = vrot.slane %v5782_v22, 7  ;;  %v5826_v2 = vpop.eup %2707 }
 0x492   : > { %v1566_v8 = vrot.slane %v5787_v41, 7  ;;  %vm6935_vm2 = vcmp.eq.f32.partialorder %v6716_v0, 0.0  ;;  %v1609_v32 = vadd.f32 %v1577_v58, %v5648_v61  ;;  %v1584_v17 = vrot.slane %v5782_v22, 1 }
 0x493   : > { %vm1843_vm1 = vmor %vm6935_vm2, %vm1787_vm3  ;;  %v1591_v47 = vrot.slane %v5690_v59, 1  ;;  %v6936_v31 = vrot.slane %v5650_v6, 7  ;;  %vm6937_vm15 = vcmp.lt.s32.totalorder %v2983_v11, 1  ;;  %v1586_v0 = vrot.slane %v5796_v53, 1 }
 0x494   : > { %v5820_v20 = vsel %vm1843_vm1, %v5132_v33, %v1835_v51  ;;  %v5829_v9 = vadd.f32 %v1548_v49, %v1540_v44  ;;  %vm6938_vm3 = vcmp.eq.f32.partialorder %v6855_v1, 0.0  ;;  %v1601_v33 = vsel %vm3980_vm12, %v5648_v61, %v1597_v19  ;;  %vm6939_vm8 = vmmov %vm6937_vm15 }
 0x495   : > { %v1571_v43 = vsel %vm6937_vm15, %v6936_v31, %v1565_v14  ;;  %v5834_v48 = vsel %vm6938_vm3, %v5820_v20, 0.0  ;;  %v1617_v6 = vadd.f32 %v1609_v32, %v1601_v33  ;;  %v1825_v39 = vmul.f32 %v5686_v5, %v1817_v15 }
 0x496   : > { %1882 = vrot.lane.b32.xlu0 %v5834_v48, %s2837_s30  ;;  %v1829_v7 = vmul.f32 %v5697_v21, %v1821_v56  ;;  %v1581_v62 = vsel %vm4002_vm14, %v5688_v46, %v1571_v43  ;;  %v1574_v34 = vsel %vm6939_vm8, %v1566_v8, %v1560_v26  ;;  %v1824_v63 = vmul.f32 %v5703_v3, %v1816_v42 }
 0x497   : > { %v1831_v23 = vmul.f32 %v5714_v38, %v1823_v45  ;;  %v1562_v58 = vrot.slane %v5796_v53, 7  ;;  %v6940_v44 = vrot.slane %v5688_v46, 1  ;;  %vm6941_vm2 = vcmp.lt.s32.totalorder %v2983_v11, 7 }
 0x498   : > { %v1820_v21 = vsub.f32 2.0, %v1812_v13  ;;  %v1814_v15 = vmul.f32 %v5815_v36, %v5684_v27  ;;  %v1564_v56 = vrot.slane %v5829_v9, 7  ;;  %v1588_v51 = vrot.slane %v5829_v9, 1  ;;  %vm6942_vm1 = vmmov %vm6941_vm2 }
 0x499   : > { %v1593_v5 = vsel %vm6941_vm2, %v6940_v44, %v1591_v47  ;;  %v1833_v19 = vmul.f32 %v1825_v39, %v1617_v6  ;;  %v1596_v3 = vsel %vm6942_vm1, %v1584_v17, %v1586_v0  ;;  %v1590_v38 = vrot.slane %v5787_v41, 1  ;;  %vm6946_vm2 = vmmov %vm6939_vm8  ;;  %v6951_v39 = vld [vmem:[#allocation31_spill] sm:$0xff] }
 0x49a   : > { %vm6943_vm15 = vcmp.eq.f32.partialorder %v6715_v29, 0.0  ;;  %1914 = vrot.lane.b32.xlu0 %v5834_v48, %s2838_s26  ;;  %v1613_v27 = vadd.f32 %v1581_v62, %v5688_v46  ;;  %v1576_v42 = vsel %vm3943_vm9, %v5782_v22, %v1574_v34  ;;  %v1569_v45 = vsel %vm6939_vm8, %v1565_v14, %v1567_v37  ;;  %vm6945_vm9 = vmmov %vm6942_vm1  ;;  %v6955_v34 = vld [vmem:[#allocation18_spill] sm:$0xff] }
 0x49b   : > { %vm1841_vm3 = vmor %vm6943_vm15, %vm1785_vm6  ;;  %v1605_v29 = vsel %vm4059_vm5, %v5688_v46, %v1593_v5  ;;  %v1608_v50 = vadd.f32 %v1576_v42, %v5782_v22  ;;  %v1583_v49 = vsel %vm3987_vm7, %v5690_v59, %v1569_v45  ;;  %vm6944_vm6 = vcmp.eq.f32.partialorder %v6844_v24, 0.0  ;;  %v6967_v45 = vld [vmem:[#allocation62_spill] sm:$0xff] }
 0x49c   : > { %v1849_v13 = vsel %vm1841_vm3, %v5129_v25, %v1833_v19  ;;  %v1621_v32 = vadd.f32 %v1613_v27, %v1605_v29  ;;  %v1600_v37 = vsel %vm3980_vm12, %v5782_v22, %v1596_v3  ;;  %v1599_v25 = vsel %vm6945_vm9, %v1591_v47, %v1585_v55  ;;  %vm6947_vm12 = vmmov %vm6946_vm2  ;;  %v6982_v47 = vld [vmem:[#allocation16_spill] sm:$0xff] }
 0x49d   : > { %v5892_v57 = vsel %vm6944_vm6, %v1849_v13, 0.0  ;;  %v1616_v46 = vadd.f32 %v1608_v50, %v1600_v37  ;;  %v1822_v14 = vsub.f32 2.0, %v1814_v15  ;;  %v1572_v24 = vsel %vm6946_vm2, %v1560_v26, %v1562_v58  ;;  %vm6950_vm3 = vmmov %vm6945_vm9  ;;  %v6959_v15 = vld [vmem:[#allocation19_spill] sm:$0xff]  ;;  %v6968_v50 = vld [vmem:[#allocation21_spill] sm:$0xff] }
 0x49e   : > { %1880 = vrot.lane.b32.xlu1 %v5892_v57, %s2837_s30  ;;  %v1810_v31 = vmul.f32 %v5826_v2, %v5695_v16  ;;  %v1837_v43 = vmul.f32 %v1829_v7, %v1621_v32  ;;  %v1615_v28 = vadd.f32 %v1583_v49, %v5690_v59  ;;  %v1570_v61 = vsel %vm6947_vm12, %v1562_v58, %v1564_v56  ;;  %v6957_v58 = vld [vmem:[#allocation59_spill] sm:$0xff] }
 0x49f   : > { %v1828_v33 = vmul.f32 %v5779_v4, %v1820_v21  ;;  %vm6948_vm1 = vcmp.eq.f32.partialorder %v6807_v35, 0.0  ;;  %v1832_v55 = vmul.f32 %v1824_v63, %v1616_v46  ;;  %v1607_v26 = vsel %vm3996_vm4, %v5690_v59, %v1599_v25  ;;  %v6974_v46 = vld [vmem:[#allocation61_spill] sm:$0xff] }
 0x4a0   : > { %vm1845_vm15 = vmor %vm6948_vm1, %vm1789_vm0  ;;  %v1580_v16 = vsel %vm4002_vm14, %v5829_v9, %v1570_v61  ;;  %v1592_v6 = vsel %vm6950_vm3, %v1588_v51, %v1590_v38  ;;  %vm6954_vm8 = vcmp.eq.f32.partialorder %v6953_v18, 0.0  ;;  %v1623_v35 = vadd.f32 %v1615_v28, %v1607_v26  ;;  %v6977_v28 = vld [vmem:[#allocation36_spill] sm:$0xff]  ;;  %v6981_v61 = vld [vmem:[#allocation58_spill] sm:$0xff] }
 0x4a1   : > { %v5924_v7 = vsel %vm1845_vm15, %v6951_v39, %v1837_v43  ;;  %vm1840_vm0 = vmor %vm6954_vm8, %vm1784_vm13  ;;  %v1604_v59 = vsel %vm4059_vm5, %v5829_v9, %v1592_v6  ;;  %v1578_v62 = vsel %vm3908_vm10, %v5796_v53, %v1572_v24  ;;  %vm6956_vm6 = vcmp.eq.f32.partialorder %v6955_v34, 0.0  ;;  %v6988_v39 = vld [vmem:[#allocation20_spill] sm:$0xff] }
 0x4a2   : > { %v5939_v63 = vsel %vm6956_vm6, %v5924_v7, 0.0  ;;  %v1848_v44 = vsel %vm1840_vm0, %v6957_v58, %v1832_v55  ;;  %v1612_v5 = vadd.f32 %v1580_v16, %v5829_v9  ;;  %vm6958_vm13 = vmmov %vm6946_vm2  ;;  %vm6960_vm9 = vcmp.eq.f32.partialorder %v6959_v15, 0.0  ;;  %v6985_v16 = vld [vmem:[#allocation30_spill] sm:$0xff] }
 0x4a3   : > { %v1568_v21 = vsel %vm6958_vm13, %v1564_v56, %v1566_v8  ;;  %1884 = vrot.lane.b32.xlu1 %v5939_v63, %s2837_s30  ;;  %v5951_v19 = vsel %vm6960_vm9, %v1848_v44, 0.0  ;;  %v1839_v3 = vmul.f32 %v1831_v23, %v1623_v35  ;;  %vm6961_vm2 = vmmov %vm6950_vm3  ;;  %v6962_v8 = vld [vmem:[#allocation25_spill] sm:$0xff]  ;;  %v6964_v56 = vld [vmem:[#allocation27_spill] sm:$0xff]  ;;  %v1818_v22 = vsub.f32 2.0, %v1810_v31  ;;  %v2628_v35 = vpop.permute.xlu1 %2627 }
 0x4a4   : > { %v1582_v27 = vsel %vm3987_vm7, %v5787_v41, %v1568_v21  ;;  %v1598_v9 = vsel %vm6961_vm2, %v1590_v38, %v1584_v17  ;;  %1872 = vrot.lane.b32.xlu0 %v5951_v19, %s2837_s30  ;;  %vm6963_vm12 = vcmp.eq.f32.partialorder %v6962_v8, 0.0  ;;  %vm6965_vm1 = vcmp.eq.f32.partialorder %v6964_v56, 0.0  ;;  %vm6966_vm7 = vmmov %vm6961_vm2  ;;  %v6975_v31 = vld [vmem:[#allocation17_spill] sm:$0xff] }
 0x4a5   : > { %vm1847_vm15 = vmor %vm6965_vm1, %vm6963_vm12  ;;  %v1620_v42 = vadd.f32 %v1612_v5, %v1604_v59  ;;  %v1614_v23 = vadd.f32 %v1582_v27, %v5787_v41  ;;  %v1594_v10 = vsel %vm6966_vm7, %v1586_v0, %v1588_v51  ;;  %v1606_v17 = vsel %vm3996_vm4, %v5787_v41, %v1598_v9  ;;  %v6970_v51 = vld [vmem:[#allocation43_spill] sm:$0xff]  ;;  %v6972_v41 = vld [vmem:[#allocation24_spill] sm:$0xff] }
 0x4a6   : > { %v1855_v13 = vsel %vm1847_vm15, %v6967_v45, %v1839_v3  ;;  %v1602_v38 = vsel %vm3920_vm11, %v5796_v53, %v1594_v10  ;;  %v1610_v29 = vadd.f32 %v1578_v62, %v5796_v53  ;;  %vm6969_vm3 = vcmp.eq.f32.partialorder %v6968_v50, 0.0 }
 0x4a7   : > { %v5981_v49 = vsel %vm6969_vm3, %v1855_v13, 0.0  ;;  %v1836_v32 = vmul.f32 %v1828_v33, %v1620_v42  ;;  %v1622_v37 = vadd.f32 %v1614_v23, %v1606_v17  ;;  %v1830_v0 = vmul.f32 %v5815_v36, %v1822_v14  ;;  %v6979_v36 = vld [vmem:[#allocation26_spill] sm:$0xff]  ;;  %v2638_v62 = vpop.permute.xlu1 %2637  ;;  %v6994_v17 = vld [vmem:[#allocation44_spill] sm:$0xff] }
 0x4a8   : > { %1886 = vrot.lane.b32.xlu1 %v5981_v49, %s2837_s30  ;;  %vm6971_vm8 = vcmp.eq.f32.partialorder %v6970_v51, 0.0  ;;  %vm6973_vm4 = vcmp.eq.f32.partialorder %v6972_v41, 0.0  ;;  %v1618_v25 = vadd.f32 %v1610_v29, %v1602_v38  ;;  %vm6976_vm6 = vcmp.eq.f32.partialorder %v6975_v31, 0.0  ;;  %v7001_v41 = vld [vmem:[#allocation51_spill] sm:$0xff] }
 0x4a9   : > { %vm1844_vm0 = vmor %vm6973_vm4, %vm6971_vm8  ;;  %v1838_v53 = vmul.f32 %v1830_v0, %v1622_v37  ;;  %vm6978_vm13 = vcmp.eq.f32.partialorder %v6977_v28, 0.0  ;;  %vm6980_vm9 = vcmp.eq.f32.partialorder %v6979_v36, 0.0  ;;  %v1826_v14 = vmul.f32 %v5826_v2, %v1818_v22  ;;  %v6987_v2 = vld [vmem:[#allocation60_spill] sm:$0xff]  ;;  %v6999_v0 = vld [vmem:[#allocation55_spill] sm:$0xff] }
 0x4aa   : > { %v5991_v24 = vsel %vm1844_vm0, %v6974_v46, %v1836_v32  ;;  %vm1846_vm2 = vmor %vm6980_vm9, %vm6978_vm13  ;;  %vm6983_vm12 = vcmp.eq.f32.partialorder %v6982_v47, 0.0  ;;  %vm6984_vm1 = vcmp.eq.f32.partialorder %v5652_v52, 0.0  ;;  %vm6986_vm15 = vcmp.eq.f32.partialorder %v6985_v16, 0.0  ;;  %v2623_v52 = vpop.permute.xlu0 %2622 }
 0x4ab   : > { %v5996_v43 = vsel %vm6976_vm6, %v5991_v24, 0.0  ;;  %v1854_v33 = vsel %vm1846_vm2, %v6981_v61, %v1838_v53  ;;  %v1834_v55 = vmul.f32 %v1826_v14, %v1618_v25  ;;  %vm1842_vm7 = vmor %vm6986_vm15, %vm6984_vm1  ;;  %vm6989_vm3 = vcmp.eq.f32.partialorder %v6988_v39, 0.0  ;;  %v2648_v5 = vpop.permute.xlu1 %2647  ;;  %v7005_v61 = vld [vmem:[#allocation56_spill] sm:$0xff] }
 0x4ac   : > { %1876 = vrot.lane.b32.xlu0 %v5996_v43, %s2837_s30  ;;  %1912 = vrot.lane.b32.xlu1 %v5892_v57, %s2838_s26  ;;  %v6010_v26 = vsel %vm6983_vm12, %v1854_v33, 0.0  ;;  %v2625_v21 = vunpack.i.h.bf16 %v2623_v52  ;;  %v2624_v15 = vunpack.i.l.bf16 %v2623_v52  ;;  %v2630_v3 = vunpack.i.h.bf16 %v2628_v35 }
 0x4ad   : > { %v6021_v6 = vsel %vm1842_vm7, %v6987_v2, %v1834_v55  ;;  %vm6990_vm8 = vcmp.lt.s32.totalorder %v3019_v40, 1  ;;  %v2650_v42 = vunpack.i.h.bf16 %v2648_v5  ;;  %vm6993_vm6 = vcmp.lt.s32.totalorder %v3019_v40, 127 }
 0x4ae   : > { %v6028_v4 = vsel %vm6989_vm3, %v6021_v6, 0.0  ;;  %v2633_v18 = vpop.permute.xlu0 %2632  ;;  %vm6991_vm4 = vmmov %vm6990_vm8  ;;  %v2629_v13 = vunpack.i.l.bf16 %v2628_v35  ;;  %vm6995_vm13 = vcmp.eq.s32.totalorder %v3019_v40, 8  ;;  %vm7002_vm15 = vcmp.eq.s32.totalorder %v3019_v40, 103  ;;  %v7009_v35 = vld [vmem:[#allocation57_spill] sm:$0xff] }
 0x4af   : > { %v2634_v44 = vunpack.i.l.bf16 %v2633_v18  ;;  %v2024_v23 = vsel %vm6991_vm4, %v2630_v3, %v2624_v15  ;;  %v2635_v10 = vunpack.i.h.bf16 %v2633_v18  ;;  %vm6992_vm0 = vmmov %vm6991_vm4  ;;  %v2649_v14 = vunpack.i.l.bf16 %v2648_v5 }
 0x4b0   : > { %1878 = vrot.lane.b32.xlu0 %v6010_v26, %s2837_s30  ;;  %1916 = vrot.lane.b32.xlu1 %v5939_v63, %s2838_s26  ;;  %vm6996_vm9 = vmmov %vm6992_vm0 }
 0x4b1   : > { %v2025_v9 = vsel %vm6990_vm8, %v2634_v44, %v2625_v21  ;;  %v2021_v22 = vsel %vm6992_vm0, %v2625_v21, %v2634_v44  ;;  %v2020_v29 = vsel %vm6996_vm9, %v2624_v15, %v2630_v3  ;;  %vm6997_vm2 = vmmov %vm6993_vm6  ;;  %v2639_v44 = vunpack.i.l.bf16 %v2638_v62  ;;  %v2658_v21 = vpop.permute.xlu1 %2657 }
 0x4b2   : > { %v2643_v59 = vpop.permute.xlu0 %2642  ;;  %v2030_v38 = vsel %vm6995_vm13, %v6994_v17, %v2025_v9  ;;  %vm6998_vm12 = vmmov %vm6997_vm2  ;;  %v2071_v25 = vadd.f32 %v7001_v41, %v2021_v22  ;;  %v2069_v33 = vadd.f32 %v7005_v61, %v2020_v29 }
 0x4b3   : > { %v2645_v8 = vunpack.i.h.bf16 %v2643_v59  ;;  %v2644_v56 = vunpack.i.l.bf16 %v2643_v59  ;;  %vm7000_vm1 = vmmov %vm6995_vm13  ;;  %v2070_v28 = vadd.f32 %v6994_v17, %v2030_v38 }
 0x4b4   : > { %1904 = vrot.lane.b32.xlu0 %v5951_v19, %s2838_s26  ;;  %1874 = vrot.lane.b32.xlu1 %v6028_v4, %s2837_s30  ;;  %v2028_v51 = vsel %vm7000_vm1, %v6999_v0, %v2024_v23  ;;  %vm7003_vm7 = vmmov %vm6992_vm0  ;;  %v2660_v23 = vunpack.i.h.bf16 %v2658_v21 }
 0x4b5   : > { %v2052_v50 = vsel %vm6997_vm2, %v2644_v56, %v2650_v42  ;;  %v2026_v53 = vsel %vm7003_vm7, %v2635_v10, %v2629_v13  ;;  %vm7004_vm3 = vmmov %vm6997_vm2  ;;  %v2068_v16 = vadd.f32 %v6999_v0, %v2028_v51 }
 0x4b6   : > { %v2653_v58 = vpop.permute.xlu0 %2652  ;;  %v2056_v36 = vsel %vm7004_vm3, %v2650_v42, %v2644_v56  ;;  %vm7006_vm8 = vmmov %vm7002_vm15 }
 0x4b7   : > { %v2654_v27 = vunpack.i.l.bf16 %v2653_v58  ;;  %v2655_v32 = vunpack.i.h.bf16 %v2653_v58  ;;  %v2060_v55 = vsel %vm7006_vm8, %v6999_v0, %v2052_v50  ;;  %vm7007_vm4 = vmmov %vm6992_vm0  ;;  %v2640_v58 = vunpack.i.h.bf16 %v2638_v62 }
 0x4b8   : > { %1908 = vrot.lane.b32.xlu0 %v5996_v43, %s2838_s26  ;;  %1906 = vrot.lane.b32.xlu1 %v6028_v4, %s2838_s26  ;;  %v2022_v2 = vsel %vm7007_vm4, %v2629_v13, %v2635_v10  ;;  %vm7008_vm0 = vmmov %vm6997_vm2  ;;  %v2077_v5 = vadd.f32 %v2069_v33, %v2056_v36  ;;  %v2076_v15 = vadd.f32 %v2068_v16, %v2060_v55  ;;  %v2659_v10 = vunpack.i.l.bf16 %v2658_v21 }
 0x4b9   : > { %v2053_v45 = vsel %vm6993_vm6, %v2645_v8, %v2654_v27  ;;  %v2057_v37 = vsel %vm6998_vm12, %v2654_v27, %v2645_v8  ;;  %v2054_v52 = vsel %vm7008_vm0, %v2649_v14, %v2655_v32  ;;  %vm7010_vm6 = vmmov %vm7000_vm1  ;;  %v7012_v27 = vld [vmem:[#allocation33_spill] sm:$0xff]  ;;  %vm7016_vm1 = vcmp.lt.s32.totalorder %v2983_v11, 1 }
 0x4ba   : > { %v2062_v46 = vsel %vm7002_vm15, %v6994_v17, %v2053_v45  ;;  %v2079_v47 = vadd.f32 %v2071_v25, %v2057_v37  ;;  %v2032_v59 = vsel %vm7010_vm6, %v7009_v35, %v2026_v53  ;;  %vm7011_vm13 = vmmov %vm7008_vm0  ;;  %v2073_v9 = vadd.f32 %v7012_v27, %v2022_v2  ;;  %v7022_v25 = vld [vmem:[#allocation35_spill] sm:$0xff] }
 0x4bb   : > { %v2078_v18 = vadd.f32 %v2070_v28, %v2062_v46  ;;  %v2058_v3 = vsel %vm7011_vm13, %v2655_v32, %v2649_v14  ;;  %vm7013_vm9 = vmmov %vm7006_vm8  ;;  %v2072_v42 = vadd.f32 %v7009_v35, %v2032_v59  ;;  %v2085_v45 = vrot.slane %v2077_v5, 7  ;;  %v7017_v32 = vld [vmem:[#allocation50_spill] sm:$0xff] }
 0x4bc   : > { %1910 = vrot.lane.b32.xlu0 %v6010_v26, %s2838_s26  ;;  %1918 = vrot.lane.b32.xlu1 %v5981_v49, %s2838_s26  ;;  %v2064_v8 = vsel %vm7013_vm9, %v7009_v35, %v2054_v52  ;;  %v2087_v56 = vrot.slane %v2079_v47, 7  ;;  %vm7014_vm2 = vmmov %vm7007_vm4  ;;  %v2081_v13 = vadd.f32 %v2073_v9, %v2058_v3  ;;  %v2084_v38 = vrot.slane %v2076_v15, 7 }
 0x4bd   : > { %v2086_v22 = vrot.slane %v2078_v18, 7  ;;  %v2027_v62 = vsel %vm7014_vm2, %v2640_v58, %v2639_v44  ;;  %vm7015_vm12 = vmmov %vm7014_vm2  ;;  %v2080_v29 = vadd.f32 %v2072_v42, %v2064_v8  ;;  %v2099_v53 = vrot.slane %v2079_v47, 1 }
 0x4be   : > { %v2023_v17 = vsel %vm7015_vm12, %v2639_v44, %v2640_v58  ;;  %v2093_v50 = vsel %vm7016_vm1, %v2085_v45, %v2087_v56  ;;  %vm7018_vm15 = vmmov %vm7010_vm6  ;;  %v2101_v28 = vrot.slane %v2081_v13, 1  ;;  %v2089_v36 = vrot.slane %v2081_v13, 7 }
 0x4bf   : > { %v2034_v37 = vsel %vm7018_vm15, %v7017_v32, %v2027_v62  ;;  %vm7019_vm7 = vmmov %vm7008_vm0  ;;  %v2075_v46 = vadd.f32 %v7022_v25, %v2023_v17  ;;  %v2095_v14 = vsel %vm3908_vm10, %v2079_v47, %v2093_v50  ;;  %v2098_v61 = vrot.slane %v2078_v18, 1 }
 0x4c0   : > { %v2055_v0 = vsel %vm7019_vm7, %v2659_v10, %v2660_v23  ;;  %vm7020_vm3 = vmmov %vm7008_vm0  ;;  %v2100_v33 = vrot.slane %v2080_v29, 1  ;;  %v2074_v52 = vadd.f32 %v7017_v32, %v2034_v37  ;;  %v2088_v35 = vrot.slane %v2080_v29, 7 }
 0x4c1   : > { %v2059_v51 = vsel %vm7020_vm3, %v2660_v23, %v2659_v10  ;;  %vm7021_vm8 = vmmov %vm7016_vm1  ;;  %vm7024_vm0 = vcmp.lt.s32.totalorder %v2983_v11, 7  ;;  %v2113_v58 = vadd.f32 %v2095_v14, %v2079_v47 }
 0x4c2   : > { %v2092_v41 = vsel %vm7021_vm8, %v2084_v38, %v2086_v22  ;;  %vm7023_vm4 = vmmov %vm7013_vm9  ;;  %v2083_v16 = vadd.f32 %v2075_v46, %v2059_v51  ;;  %v2107_v59 = vsel %vm7024_vm0, %v2099_v53, %v2101_v28  ;;  %vm7030_vm8 = vcmp.lt.s32.totalorder %v3019_v40, 1 }
 0x4c3   : > { %v2066_v55 = vsel %vm7023_vm4, %v7017_v32, %v2055_v0  ;;  %v2094_v2 = vsel %vm3908_vm10, %v2078_v18, %v2092_v41  ;;  %vm7025_vm6 = vmmov %vm7016_vm1  ;;  %v2109_v27 = vsel %vm3920_vm11, %v2079_v47, %v2107_v59 }
 0x4c4   : > { %v2091_v44 = vsel %vm7025_vm6, %v2087_v56, %v2089_v36  ;;  %v2082_v5 = vadd.f32 %v2074_v52, %v2066_v55  ;;  %vm7026_vm13 = vmmov %vm7024_vm0  ;;  %v2112_v15 = vadd.f32 %v2094_v2, %v2078_v18  ;;  %v2103_v3 = vrot.slane %v2083_v16, 1 }
 0x4c5   : > { %v2106_v21 = vsel %vm7026_vm13, %v2098_v61, %v2100_v33  ;;  %v2097_v9 = vsel %vm4002_vm14, %v2081_v13, %v2091_v44  ;;  %vm7027_vm9 = vmmov %vm7016_vm1  ;;  %v6124_v42 = vadd.f32 %v2113_v58, %v2109_v27  ;;  %vm7034_vm13 = vcmp.eq.s32.totalorder %v3019_v40, 8 }
 0x4c6   : > { %v2090_v8 = vsel %vm7027_vm9, %v2086_v22, %v2088_v35  ;;  %v2108_v56 = vsel %vm3920_vm11, %v2078_v18, %v2106_v21  ;;  %v2102_v23 = vrot.slane %v2082_v5, 1  ;;  %vm7028_vm2 = vmmov %vm7024_vm0  ;;  %v2115_v45 = vadd.f32 %v2097_v9, %v2081_v13 }
 0x4c7   : > { %v6128_v10 = vadd.f32 %v2112_v15, %v2108_v56  ;;  %v2105_v62 = vsel %vm7028_vm2, %v2101_v28, %v2103_v3  ;;  %v2096_v47 = vsel %vm4002_vm14, %v2080_v29, %v2090_v8  ;;  %vm2121_vm12 = vcmp.eq.f32.partialorder %v6124_v42, 0.0  ;;  %vm7029_vm15 = vmmov %vm7024_vm0 }
 0x4c8   : > { %v2111_v22 = vsel %vm4059_vm5, %v2081_v13, %v2105_v62  ;;  %v2104_v18 = vsel %vm7029_vm15, %v2100_v33, %v2102_v23  ;;  %v2114_v17 = vadd.f32 %v2096_v47, %v2080_v29  ;;  %v2125_v50 = vsel %vm2121_vm12, 1.0, %v6124_v42  ;;  %vm7031_vm4 = vmmov %vm7030_vm8 }
 0x4c9   : > { %vm2120_vm1 = vcmp.eq.f32.partialorder %v6128_v10, 0.0  ;;  %v6140_v38 = vadd.f32 %v2115_v45, %v2111_v22  ;;  %v2110_v37 = vsel %vm4059_vm5, %v2080_v29, %v2104_v18  ;;  %2709 = vrcp.f32 %v2125_v50  ;;  %vm7032_vm0 = vmmov %vm7031_vm4 }
 0x4ca   : > { %v2124_v32 = vsel %vm2120_vm1, 1.0, %v6128_v10  ;;  %v6150_v0 = vadd.f32 %v2114_v17, %v2110_v37  ;;  %vm7033_vm6 = vmmov %vm7032_vm0 }
 0x4cb   : > { %vm2123_vm7 = vcmp.eq.f32.partialorder %v6140_v38, 0.0  ;;  %2711 = vrcp.f32 %v2124_v32  ;;  %vm7035_vm9 = vmmov %vm7032_vm0 }
 0x4cc   : > { %v2127_v51 = vsel %vm2123_vm7, 1.0, %v6140_v38  ;;  %vm2122_vm3 = vcmp.eq.f32.partialorder %v6150_v0, 0.0  ;;  %vm7036_vm2 = vmmov %vm7034_vm13 }
 0x4cd   : > { %2713 = vrcp.f32 %v2127_v51  ;;  %v2126_v29 = vsel %vm2122_vm3, 1.0, %v6150_v0  ;;  %vm7037_vm15 = vmmov %vm7032_vm0 }
 0x4ce   : > { %2715 = vrcp.f32 %v2126_v29 }
 0x4d6   : > { %v2710_v28 = vpop.eup %2709 }
 0x4d7   : > { %v2133_v61 = vmul.f32 %v2710_v28, %v2125_v50 }
 0x4d8   : > { %v2712_v36 = vpop.eup %2711 }
 0x4d9   : > { %v2132_v33 = vmul.f32 %v2712_v36, %v2124_v32  ;;  %v2137_v52 = vsub.f32 2.0, %v2133_v61 }
 0x4da   : > { %v6160_v16 = vpop.eup %2713 }
 0x4db   : > { %v2136_v35 = vsub.f32 2.0, %v2132_v33  ;;  %v6162_v59 = vpop.eup %2715  ;;  %v6167_v5 = vmul.f32 %v6160_v16, %v2127_v51  ;;  %v6178_v8 = vmul.f32 %v2710_v28, %v2137_v52 }
 0x4dc   : > { %v6183_v23 = vmul.f32 %v6162_v59, %v2126_v29 }
 0x4dd   : > { %v6180_v56 = vmul.f32 %v2712_v36, %v2136_v35  ;;  %v2139_v18 = vsub.f32 2.0, %v6167_v5 }
 0x508   : > { %v1883_v13 = vpop.permute.xlu0 %1882 }
 0x50c   : > { %v1915_v25 = vpop.permute.xlu0 %1914 }
 0x510   : > { %v1881_v41 = vpop.permute.xlu1 %1880 }
 0x515   : > { %v1885_v46 = vpop.permute.xlu1 %1884 }
 0x516   : > { %v1873_v53 = vpop.permute.xlu0 %1872 }
 0x517   : > { %v1892_v58 = vsel %vm7030_vm8, %v1881_v41, %v1873_v53  ;;  %v1888_v21 = vsel %vm7031_vm4, %v1873_v53, %v1881_v41  ;;  %vm7038_vm8 = vmmov %vm7036_vm2  ;;  %vm7039_vm4 = vcmp.lt.s32.totalorder %v3019_v40, 127 }
 0x518   : > { %v1896_v9 = vsel %vm7034_vm13, %v5951_v19, %v1892_v58  ;;  %v1937_v62 = vadd.f32 %v1888_v21, %v5892_v57  ;;  %vm7042_vm13 = vmmov %vm7035_vm9 }
 0x519   : > { %v1936_v51 = vadd.f32 %v1896_v9, %v5951_v19 }
 0x51a   : > { %v1887_v14 = vpop.permute.xlu1 %1886 }
 0x51e   : > { %v1877_v55 = vpop.permute.xlu0 %1876  ;;  %v1913_v2 = vpop.permute.xlu1 %1912 }
 0x51f   : > { %v1894_v15 = vsel %vm7032_vm0, %v1885_v46, %v1877_v55  ;;  %v1890_v45 = vsel %vm7035_vm9, %v1877_v55, %v1885_v46  ;;  %vm7040_vm0 = vmmov %vm7039_vm4 }
 0x520   : > { %v1900_v47 = vsel %vm7036_vm2, %v5996_v43, %v1894_v15  ;;  %v1941_v53 = vadd.f32 %v1890_v45, %v5939_v63 }
 0x521   : > { %v1940_v61 = vadd.f32 %v1900_v47, %v5996_v43 }
 0x522   : > { %v1879_v44 = vpop.permute.xlu0 %1878  ;;  %v1917_v3 = vpop.permute.xlu1 %1916 }
 0x523   : > { %v1895_v27 = vsel %vm7033_vm6, %v1887_v14, %v1879_v44  ;;  %v1891_v17 = vsel %vm7037_vm15, %v1879_v44, %v1887_v14  ;;  %vm7041_vm6 = vcmp.eq.s32.totalorder %v3019_v40, 103  ;;  %v2138_v14 = vsub.f32 2.0, %v6183_v23  ;;  %vm7043_vm15 = vmmov %vm7040_vm0 }
 0x524   : > { %v1902_v50 = vsel %vm7038_vm8, %v6010_v26, %v1895_v27  ;;  %vm7044_vm8 = vmmov %vm7040_vm0 }
 0x525   : > { %v1942_v33 = vadd.f32 %v1902_v50, %v6010_v26  ;;  %v2142_v42 = vmul.f32 %v6162_v59, %v2138_v14 }
 0x526   : > { %v1905_v22 = vpop.permute.xlu0 %1904  ;;  %v1875_v37 = vpop.permute.xlu1 %1874 }
 0x527   : > { %v1920_v57 = vsel %vm7039_vm4, %v1905_v22, %v1913_v2  ;;  %v1924_v32 = vsel %vm7040_vm0, %v1913_v2, %v1905_v22  ;;  %v1889_v29 = vsel %vm7042_vm13, %v1875_v37, %v1883_v13  ;;  %v1893_v46 = vsel %vm7035_vm9, %v1883_v13, %v1875_v37  ;;  %vm7045_vm4 = vmmov %vm7041_vm6 }
 0x528   : > { %v1928_v41 = vsel %vm7041_vm6, %v5951_v19, %v1920_v57  ;;  %v1945_v28 = vadd.f32 %v1937_v62, %v1924_v32  ;;  %v1898_v36 = vsel %vm7036_vm2, %v6028_v4, %v1893_v46  ;;  %v1943_v19 = vadd.f32 %v1891_v17, %v5981_v49  ;;  %vm7046_vm6 = vmmov %vm7040_vm0 }
 0x529   : > { %v1944_v55 = vadd.f32 %v1936_v51, %v1928_v41  ;;  %v1938_v52 = vadd.f32 %v1898_v36, %v6028_v4  ;;  %v1939_v13 = vadd.f32 %v1889_v29, %v5834_v48  ;;  %vm7047_vm13 = vmmov %vm7045_vm4 }
 0x52a   : > { %v1909_v2 = vpop.permute.xlu0 %1908  ;;  %v1907_v58 = vpop.permute.xlu1 %1906  ;;  %v1953_v27 = vrot.slane %v1945_v28, 7  ;;  %vm7048_vm9 = vmmov %vm7040_vm0 }
 0x52b   : > { %v1922_v63 = vsel %vm7043_vm15, %v1909_v2, %v1917_v3  ;;  %v1926_v35 = vsel %vm7044_vm8, %v1917_v3, %v1909_v2  ;;  %v1921_v49 = vsel %vm7040_vm0, %v1907_v58, %v1915_v25  ;;  %v1925_v15 = vsel %vm7046_vm6, %v1915_v25, %v1907_v58  ;;  %vm7049_vm2 = vmmov %vm7040_vm0 }
 0x52c   : > { %v1932_v44 = vsel %vm7045_vm4, %v5996_v43, %v1922_v63  ;;  %v1949_v21 = vadd.f32 %v1941_v53, %v1926_v35  ;;  %v1930_v9 = vsel %vm7047_vm13, %v6028_v4, %v1921_v49  ;;  %v1947_v62 = vadd.f32 %v1939_v13, %v1925_v15  ;;  %vm7050_vm15 = vmmov %vm7045_vm4 }
 0x52d   : > { %v1948_v48 = vadd.f32 %v1940_v61, %v1932_v44  ;;  %v1952_v3 = vrot.slane %v1944_v55, 7  ;;  %v1946_v47 = vadd.f32 %v1938_v52, %v1930_v9  ;;  %vm7051_vm8 = vcmp.lt.s32.totalorder %v2983_v11, 1 }
 0x52e   : > { %v1957_v45 = vrot.slane %v1949_v21, 7  ;;  %v1969_v22 = vrot.slane %v1949_v21, 1  ;;  %v1955_v43 = vrot.slane %v1947_v62, 7  ;;  %v1967_v50 = vrot.slane %v1947_v62, 1  ;;  %v1911_v57 = vpop.permute.xlu0 %1910  ;;  %v1919_v37 = vpop.permute.xlu1 %1918  ;;  %vm7053_vm0 = vmmov %vm7051_vm8 }
 0x52f   : > { %v1956_v17 = vrot.slane %v1948_v48, 7  ;;  %v1968_v32 = vrot.slane %v1948_v48, 1  ;;  %v1954_v51 = vrot.slane %v1946_v47, 7  ;;  %v1966_v41 = vrot.slane %v1946_v47, 1  ;;  %vm7055_vm13 = vmmov %vm7053_vm0 }
 0x530   : > { %v1923_v25 = vsel %vm7048_vm9, %v1911_v57, %v1919_v37  ;;  %v1927_v29 = vsel %vm7049_vm2, %v1919_v37, %v1911_v57  ;;  %v1961_v53 = vsel %vm7051_vm8, %v1953_v27, %v1955_v43  ;;  %vm7052_vm4 = vcmp.lt.s32.totalorder %v2983_v11, 7 }
 0x531   : > { %v1934_v4 = vsel %vm7050_vm15, %v6010_v26, %v1923_v25  ;;  %v1951_v46 = vadd.f32 %v1943_v19, %v1927_v29  ;;  %v1975_v28 = vsel %vm7052_vm4, %v1967_v50, %v1969_v22  ;;  %v1963_v61 = vsel %vm3908_vm10, %v1947_v62, %v1961_v53  ;;  %vm7054_vm6 = vmmov %vm7052_vm4 }
 0x532   : > { %v1950_v36 = vadd.f32 %v1942_v33, %v1934_v4  ;;  %v1977_v55 = vsel %vm3920_vm11, %v1947_v62, %v1975_v28  ;;  %v1960_v2 = vsel %vm7053_vm0, %v1952_v3, %v1954_v51  ;;  %v1981_v40 = vadd.f32 %v1963_v61, %v1947_v62  ;;  %vm7056_vm9 = vmmov %vm7052_vm4 }
 0x533   : > { %v1971_v52 = vrot.slane %v1951_v46, 1  ;;  %v1962_v26 = vsel %vm3908_vm10, %v1946_v47, %v1960_v2  ;;  %v1974_v19 = vsel %vm7054_vm6, %v1966_v41, %v1968_v32  ;;  %v1959_v35 = vsel %vm7055_vm13, %v1955_v43, %v1957_v45  ;;  %vm7057_vm10 = vmmov %vm7053_vm0 }
 0x534   : > { %v1970_v13 = vrot.slane %v1950_v36, 1  ;;  %v1976_v33 = vsel %vm3920_vm11, %v1946_v47, %v1974_v19  ;;  %v1980_v63 = vadd.f32 %v1962_v26, %v1946_v47  ;;  %v1985_v44 = vadd.f32 %v1981_v40, %v1977_v55  ;;  %vm7058_vm2 = vmmov %vm7052_vm4 }
 0x535   : > { %v1973_v58 = vsel %vm7056_vm9, %v1969_v22, %v1971_v52  ;;  %v1965_v49 = vsel %vm4002_vm14, %v1949_v21, %v1959_v35  ;;  %v1958_v54 = vsel %vm7057_vm10, %v1954_v51, %v1956_v17  ;;  %vm7059_vm11 = vcmp.eq.f32.partialorder %v6855_v1, 0.0 }
 0x536   : > { %v1972_v15 = vsel %vm7058_vm2, %v1968_v32, %v1970_v13  ;;  %v1979_v12 = vsel %vm4059_vm5, %v1949_v21, %v1973_v58  ;;  %v1984_v27 = vadd.f32 %v1980_v63, %v1976_v33  ;;  %v1983_v9 = vadd.f32 %v1965_v49, %v1949_v21  ;;  %vm2149_vm15 = vmor %vm7059_vm11, %vm2121_vm12 }
 0x537   : > { %v2145_v62 = vmul.f32 %v6178_v8, %v1985_v44  ;;  %v1964_v3 = vsel %vm4002_vm14, %v1948_v48, %v1958_v54  ;;  %v1978_v45 = vsel %vm4059_vm5, %v1948_v48, %v1972_v15  ;;  %v2143_v21 = vmul.f32 %v6160_v16, %v2139_v18 }
 0x538   : > { %v2144_v11 = vmul.f32 %v6180_v56, %v1984_v27  ;;  %v1987_v47 = vadd.f32 %v1983_v9, %v1979_v12  ;;  %v1982_v22 = vadd.f32 %v1964_v3, %v1948_v48  ;;  %vm7060_vm14 = vcmp.eq.f32.partialorder %v6988_v39, 0.0 }
 0x539   : > { %v2153_v8 = vsel %vm2149_vm15, %v5820_v20, %v2145_v62  ;;  %vm2148_vm5 = vmor %vm7060_vm14, %vm2120_vm1  ;;  %vm7061_vm12 = vcmp.eq.f32.partialorder %v6955_v34, 0.0  ;;  %vm7062_vm1 = vcmp.eq.f32.partialorder %v6975_v31, 0.0  ;;  %vm2168_vm0 = vcmask 982016  }
 0x53a   : > { %2162 = vrot.lane.b32.xlu1 %v2153_v8, %s2840_s25  ;;  %v2152_v60 = vsel %vm2148_vm5, %v6021_v6, %v2144_v11  ;;  %v2147_v30 = vmul.f32 %v2143_v21, %v1987_v47  ;;  %v1986_v1 = vadd.f32 %v1982_v22, %v1978_v45  ;;  %vm2151_vm8 = vmor %vm7061_vm12, %vm2123_vm7 }
 0x53b   : > { %2160 = vrot.lane.b32.xlu0 %v2152_v60, %s2840_s25  ;;  %vm2150_vm4 = vmor %vm7062_vm1, %vm2122_vm3 }
 0x53c   : > { %v2146_v20 = vmul.f32 %v2142_v42, %v1986_v1  ;;  %v2155_v39 = vsel %vm2151_vm8, %v5924_v7, %v2147_v30 }
 0x53e   : > { %2166 = vrot.lane.b32.xlu1 %v2155_v39, %s2840_s25  ;;  %v2154_v6 = vsel %vm2150_vm4, %v5991_v24, %v2146_v20 }
 0x53f   : > { %2164 = vrot.lane.b32.xlu0 %v2154_v6, %s2840_s25 }
 0x5ac   : > { %v2163_v34 = vpop.permute.xlu1 %2162 }
 0x5ad   : > { %v2161_v10 = vpop.permute.xlu0 %2160 }
 0x5ae   : > { %v2169_v7 = vsel %vm2168_vm0, %v2161_v10, %v2163_v34 }
 0x5af   : > { %2173 = vst [vmem:[%s2929_s29] sm:$0xff] %v2169_v7 }
 0x5b0   : > { %v2167_v38 = vpop.permute.xlu1 %2166 }
 0x5b1   : > { %v2165_v31 = vpop.permute.xlu0 %2164 }
 0x5b2   : > { %v2170_v24 = vsel %vm2168_vm0, %v2165_v31, %v2167_v38 }
 0x5b3   : > { %2174 = vst [vmem:[%s2929_s29 + $0x8] sm:$0xff] %v2170_v24 }
 0x5b4   : > { %2774 = shalt.err (!%p2771_p0)
}
 0x5b5   : > { %s2842_s30 = smov 128   ;;  %s2843_s26 = smov 8  }
 0x5b6   : > { %2326 = dma.vmem_to_hbm [thread:$0]  (%p2907_p8), %s2192_s8, 256, %s2190_s20, %s2176_s11, %s2842_s30, %s2842_s30, %s2843_s26  }
 0x5b7 PF: > { %p2332_p1 = scmp.ge.s32.totalorder %s2833_s13, 1  ;;  %s2206_s24 = sand.u32 1, %s2817_s9  }
 0x5b8   : > { %s2207_s29 = scalar_lea.sflag [#allocation6], %s2206_s24 }
 0x5b9   : > { %p2329_p2 = pnand %p2332_p1, %p2896_p4 }
 0x5bb   : > { %p2330_p3 = pneg %p2329_p2 }
 0x5bd   : > { %2812 = dma.done.wait (%p2330_p3), %s2207_s29, 256  }
 0x5be   : > { %2814 = vsyncadd (%p2330_p3), %s2207_s29, 4294967040  ;;  %s15_s13 = sadd.s32 1, %s2833_s13   ;;  %s7063_s9 = smov %s2821_s10 }
 0x5bf   : > { %p12_p5 = scmp.ge.s32.totalorder %s15_s13, 7   ;;  %s7064_s10 = smov %s2905_s22 }
 0x5c0   : > { %s7065_s11 = smov %s7068_s14  ;;  %s7066_s12 = smov %s7072_s15 }
 0x5c1   :  { %14 = sbr.rel (!%p12_p5) target bundleno = 4 (0x4), region = 56 }
 0x5c6   :  { %2212 = vsyncpa [#allocation6], 1 }
 0x5c7   :  { %2214 = vsyncpa [#allocation6 + $0x1], 1 }
 0x5c8   :  { %2215 = vsyncmov [#allocation4] }
 0x5cb   :  { %s2216_s18 = vpop.sfrf %2215 }
 0x5cc   :  { %p2323_p4 = scmp.ne.s32.totalorder %s2216_s18, 0 }
 0x5ce   :  { %2220 = shalt.err (%p2323_p4)  }
 0x5cf   :  { %2222 = vsyncmov [#allocation4 + $0x1] }
 0x5d2   :  { %s2223_s23 = vpop.sfrf %2222 }
 0x5d3   :  { %p2324_p8 = scmp.ne.s32.totalorder %s2223_s23, 0 }
 0x5d5   :  { %2227 = shalt.err (%p2324_p8)  }

</bundles_post_ra>
